<compile_context>
chip_gen: v6e
topology: v6e:2x2x1
jax: 0.10.0
libtpu: 0.0.40
codegen_flags: <defaults>
</compile_context>

<pallas_src>
import functools

import jax
import jax.numpy as jnp
from jax.experimental import pallas as pl
from jax.experimental.pallas import tpu as pltpu


# --------------------------------------------------------------------------- kernel

def _branch_kernel(x_ref, m_ref, tmod_ref, win_ref, bin_ref, wd_ref, bd_ref,
                   wp_ref, bp_ref, whead_ref, bhead_ref, out_ref,
                   *, num_layers, td):
    """Fused SSTCN branch; batch folded into lanes (channels on sublanes).

    All matmuls are bf16 x bf16 with f32 accumulation; the elementwise
    epilogue stays in f32 on the VPU (v5e-safe).
    """
    lane = x_ref.shape[-1]          # folded lane length of this block (k * Td)
    f = win_ref.shape[0]            # num_filters

    x = x_ref[...]                  # (Fin, lane)  bf16
    m = m_ref[...]                  # (1,   lane)  f32   downsampled frame mask
    t_local = tmod_ref[...]         # (1,   lane)  int32 lane index mod Td

    # input 1x1 conv (no mask / relu in the reference)
    h = jnp.dot(win_ref[...], x, preferred_element_type=jnp.float32) + bin_ref[...]

    for l in range(num_layers):     # static unroll (num_layers is small)
        d = l + 1                   # linear dilation sequence of the reference
        hb = h.astype(jnp.bfloat16)
        # one (3F,F)x(F,lane) MXU matmul on the UNSHIFTED activation; rows are
        # ordered [tap t-d | tap t | tap t+d]
        z = jnp.dot(wd_ref[l], hb, preferred_element_type=jnp.float32)  # (3F, lane)
        # single-sided validity per tap; multiply broadcasts over sublanes and
        # also zeroes lanes whose roll crossed a folded batch boundary
        left_ok = jnp.where(t_local >= d, 1.0, 0.0)          # (1, lane) f32
        right_ok = jnp.where(t_local < td - d, 1.0, 0.0)     # (1, lane) f32
        hd = (z[f:2 * f]
              + pltpu.roll(z[0:f], shift=d, axis=1) * left_ok
              + pltpu.roll(z[2 * f:3 * f], shift=lane - d, axis=1) * right_ok
              + bd_ref[l])
        hd = jnp.maximum(hd, 0.0)
        y = jnp.dot(wp_ref[l], hd.astype(jnp.bfloat16),
                    preferred_element_type=jnp.float32) + bp_ref[l]
        # TODO(synk): dropout = identity (eval mode)
        h = (y + h) * m             # residual + downsampled mask

    # fused classifier + fuse-head matmul: whead = [wc; wf] (2C, F),
    # bhead = [bc; 0].  1x1 convs commute with the block-repeat upsample, so
    # only this class-width slab ever leaves the kernel.
    out_ref[...] = (jnp.dot(whead_ref[...], h.astype(jnp.bfloat16),
                            preferred_element_type=jnp.float32)
                    + bhead_ref[...])


# --------------------------------------------------------------------- call wrapper

def sstcn_branch(xf, mf, tmod, bp, *, td, lane_blocks=1):
    """xf: (Fin, N*Td) bf16, mf/tmod: (1, N*Td) -> (2C, N*Td) f32 head slab."""
    fin, lane_total = xf.shape
    assert lane_total % lane_blocks == 0
    lane_blk = lane_total // lane_blocks
    assert lane_blk % td == 0        # each grid step handles whole batch elements
    num_layers = int(bp["wd"].shape[0])
    assert num_layers < td           # max dilation must fit in the downsampled length
    two_c = bp["whead"].shape[0]

    def lane_spec(rows):
        # lane-folded block: full channel extent, one slab of folded lanes
        return pl.BlockSpec((rows, lane_blk), lambda g: (0, g))

    def whole_spec(arr):
        # whole-array block with constant index_map: fetched once, kept
        # VMEM-resident across grid steps.
        return pl.BlockSpec(arr.shape, lambda g, r=arr.ndim: (0,) * r)

    kernel = functools.partial(_branch_kernel, num_layers=num_layers, td=td)

    return pl.pallas_call(
        kernel,
        grid=(lane_blocks,),
        in_specs=[
            lane_spec(fin), lane_spec(1), lane_spec(1),
            whole_spec(bp["win"]), whole_spec(bp["bin"]),
            whole_spec(bp["wd"]), whole_spec(bp["bd"]),
            whole_spec(bp["wp"]), whole_spec(bp["bp"]),
            whole_spec(bp["whead"]), whole_spec(bp["bhead"]),
        ],
        out_specs=lane_spec(two_c),
        out_shape=jax.ShapeDtypeStruct((two_c, lane_total), jnp.float32),
        compiler_params=pltpu.CompilerParams(
            dimension_semantics=("parallel",)),
    )(xf, mf, tmod, bp["win"], bp["bin"], bp["wd"], bp["bd"],
      bp["wp"], bp["bp"], bp["whead"], bp["bhead"])


# ------------------------------------------------------------------------ model glue

def multiscale_tcn_forward(params, x, mask, scales, lane_blocks=1):
    """x: (N, feature_len, T), mask: (N, 1, T) -- PyTorch NCT layout."""
    n, _, t = x.shape

    branch_cls = []
    fuse_contribs = []
    for bp, s in zip(params["branches"], scales):
        assert s > 1  # reference defines mask_sampled only when sampling
        x_ds = x[:, :, ::s]                       # (N, Fin, Td)
        m_ds = mask[:, :, ::s]                    # (N, 1,  Td)
        td = x_ds.shape[-1]
        # fold batch into the lane axis (tiny tensors; pure layout plumbing)
        xf = jnp.transpose(x_ds, (1, 0, 2)).reshape(x_ds.shape[1], n * td)
        xf = xf.astype(jnp.bfloat16)
        mf = jnp.transpose(m_ds, (1, 0, 2)).reshape(1, n * td)
        tmod = jnp.tile(jnp.arange(td, dtype=jnp.int32), n).reshape(1, n * td)

        head = sstcn_branch(xf, mf, tmod, bp, td=td, lane_blocks=lane_blocks)
        c = bp["whead"].shape[0] // 2
        head = head.reshape(2 * c, n, td).transpose(1, 0, 2)   # (N, 2C, Td)
        cls_ds, fuse_ds = head[:, :c], head[:, c:]

        # torch `out.repeat(1,1,s)[:, :, :T]` block-repeat upsample + crop,
        # applied to the tiny class-width tensors only (1x1 convs commute
        # with it).  Classifier masked with the FULL-resolution mask, as in
        # the reference.
        branch_cls.append(jnp.tile(cls_ds, (1, 1, s))[:, :, :t] * mask)
        fuse_contribs.append(jnp.tile(fuse_ds, (1, 1, s))[:, :, :t])

    # Reproduce the reference averaging loop EXACTLY (including its index bug:
    # it re-adds branches_outputs[i] for i in range(len-1), not branch i+1).
    # The fuse conv's matmul was applied per-branch inside the kernel; only
    # the 1/len scale and the shared bias remain here.
    average = fuse_contribs[0]
    for i in range(len(fuse_contribs) - 1):
        average = average + fuse_contribs[i]
    average = average * (1.0 / len(scales)) + params["bf"]      # (N, C, T)

    return {"average_output": average, "branches_outputs": branch_cls}


# -------------------------------------------------------------------------- param init

def init_params(key, scales, num_layers, num_filters, feature_len, num_classes):
    wdt = jnp.bfloat16   # MXU-native weight dtype; biases stay f32
    # TODO(synk): PyTorch reference is f32 end-to-end; bf16 weights/activations
    #             with f32 accumulation bound the drift but logits tolerance
    #             should be verified if comparing against torch numerics.

    def wmat(k, shape, scale=0.1):
        return (jax.random.normal(k, shape, jnp.float32) * scale).astype(wdt)

    def bvec(k, shape, scale=0.1):
        return jax.random.normal(k, shape, jnp.float32) * scale

    keys = jax.random.split(key, len(scales) + 1)
    kfw, kfb = jax.random.split(keys[-1])
    wf = wmat(kfw, (num_classes, num_filters))      # shared fuse conv weight
    bf = bvec(kfb, (1, num_classes, 1))             # shared fuse conv bias

    branches = []
    for bk in keys[:-1]:
        k_in, k_bin, k_cls, k_bcls, k_layers = jax.random.split(bk, 5)
        lkeys = jax.random.split(k_layers, num_layers)
        wd, bd, wp_, bp_ = [], [], [], []
        for lk in lkeys:
            k0, k1, k2, kb, kpw, kpb = jax.random.split(lk, 6)
            # dilated conv taps stacked along OUTPUT rows (shift-commutes
            # trick): rows ordered [tap t-d | tap t | tap t+d]  ->  (3F, F)
            wd.append(jnp.concatenate(
                [wmat(k0, (num_filters, num_filters)),
                 wmat(k1, (num_filters, num_filters)),
                 wmat(k2, (num_filters, num_filters))], axis=0))
            bd.append(bvec(kb, (num_filters, 1)))
            wp_.append(wmat(kpw, (num_filters, num_filters)))
            bp_.append(bvec(kpb, (num_filters, 1)))
        wc = wmat(k_cls, (num_classes, num_filters))
        bc = bvec(k_bcls, (num_classes, 1))
        branches.append(dict(
            win=wmat(k_in, (num_filters, feature_len)),
            bin=bvec(k_bin, (num_filters, 1)),
            wd=jnp.stack(wd), bd=jnp.stack(bd),
            wp=jnp.stack(wp_), bp=jnp.stack(bp_),
            # fused classifier + fuse-head weights/bias: [wc; wf], [bc; 0]
            whead=jnp.concatenate([wc, wf], axis=0),
            bhead=jnp.concatenate(
                [bc, jnp.zeros((num_classes, 1), jnp.float32)], axis=0),
        ))
    return dict(branches=branches, bf=bf)


# ------------------------------------------------------------------------------- main

if __name__ == "__main__":
    scales = [2, 4]
    num_layers = 3
    num_filters = 32
    feature_len = 16
    num_classes = 8
    N, T = 2, 512   # Td = 256 / 128 per branch -> lane-aligned folded lanes

    key = jax.random.PRNGKey(0)
    kx, km, kp = jax.random.split(key, 3)
    x = jax.random.normal(kx, (N, feature_len, T), jnp.float32)            # NCT
    mask = (jax.random.uniform(km, (N, 1, T)) > 0.2).astype(jnp.float32)   # (N,1,T)
    params = init_params(kp, scales, num_layers, num_filters, feature_len,
                         num_classes)

    # lane_blocks=1: single big step (best on v5e/v6e); on v7x pass
    # lane_blocks=2 to shard the folded batch across both TensorCores.
    fwd = jax.jit(functools.partial(multiscale_tcn_forward, scales=scales))
    out = fwd(params, x, mask)
    jax.block_until_ready(out)

    assert out["average_output"].shape == (N, num_classes, T)
    assert all(b.shape == (N, num_classes, T) for b in out["branches_outputs"])
    assert bool(jnp.isfinite(out["average_output"]).all())
    assert all(bool(jnp.isfinite(b).all()) for b in out["branches_outputs"])
    print("KERNEL_OK")
</pallas_src>

<mosaic_0001>
module attributes {stable_mosaic.version = 11 : i64} {
  func.func @_branch_kernel(%arg0: i32, %arg1: memref<16x256xbf16, #tpu.memory_space<vmem>>, %arg2: memref<1x256xf32, #tpu.memory_space<vmem>>, %arg3: memref<1x256xi32, #tpu.memory_space<vmem>>, %arg4: memref<32x16xbf16, #tpu.memory_space<vmem>>, %arg5: memref<32x1xf32, #tpu.memory_space<vmem>>, %arg6: memref<3x96x32xbf16, #tpu.memory_space<vmem>>, %arg7: memref<3x32x1xf32, #tpu.memory_space<vmem>>, %arg8: memref<3x32x32xbf16, #tpu.memory_space<vmem>>, %arg9: memref<3x32x1xf32, #tpu.memory_space<vmem>>, %arg10: memref<16x32xbf16, #tpu.memory_space<vmem>>, %arg11: memref<16x1xf32, #tpu.memory_space<vmem>>, %arg12: memref<16x256xf32, #tpu.memory_space<vmem>>) attributes {dimension_semantics = [#tpu.dimension_semantics<parallel>], iteration_bounds = array<i64: 1>, scalar_prefetch = 0 : i64, scratch_operands = 0 : i64, tpu.core_type = #tpu.core_type<tc>, window_params = [{transform_indices = @transform_0, window_bounds = array<i64: 16, 256>}, {transform_indices = @transform_1, window_bounds = array<i64: 1, 256>}, {transform_indices = @transform_2, window_bounds = array<i64: 1, 256>}, {pipeline_mode = #tpu.pipeline_mode<synchronous>, transform_indices = @transform_3, window_bounds = array<i64: 32, 16>}, {pipeline_mode = #tpu.pipeline_mode<synchronous>, transform_indices = @transform_4, window_bounds = array<i64: 32, 1>}, {pipeline_mode = #tpu.pipeline_mode<synchronous>, transform_indices = @transform_5, window_bounds = array<i64: 3, 96, 32>}, {pipeline_mode = #tpu.pipeline_mode<synchronous>, transform_indices = @transform_6, window_bounds = array<i64: 3, 32, 1>}, {pipeline_mode = #tpu.pipeline_mode<synchronous>, transform_indices = @transform_7, window_bounds = array<i64: 3, 32, 32>}, {pipeline_mode = #tpu.pipeline_mode<synchronous>, transform_indices = @transform_8, window_bounds = array<i64: 3, 32, 1>}, {pipeline_mode = #tpu.pipeline_mode<synchronous>, transform_indices = @transform_9, window_bounds = array<i64: 16, 32>}, {pipeline_mode = #tpu.pipeline_mode<synchronous>, transform_indices = @transform_10, window_bounds = array<i64: 16, 1>}, {transform_indices = @transform_11, window_bounds = array<i64: 16, 256>}]} {
    %c0 = arith.constant 0 : index
    %c0_0 = arith.constant 0 : index
    %0 = vector.load %arg1[%c0, %c0_0] : memref<16x256xbf16, #tpu.memory_space<vmem>>, vector<16x256xbf16>
    %c0_1 = arith.constant 0 : index
    %c0_2 = arith.constant 0 : index
    %1 = vector.load %arg2[%c0_1, %c0_2] : memref<1x256xf32, #tpu.memory_space<vmem>>, vector<1x256xf32>
    %c0_3 = arith.constant 0 : index
    %c0_4 = arith.constant 0 : index
    %2 = vector.load %arg3[%c0_3, %c0_4] : memref<1x256xi32, #tpu.memory_space<vmem>>, vector<1x256xi32>
    %c0_5 = arith.constant 0 : index
    %c0_6 = arith.constant 0 : index
    %3 = vector.load %arg4[%c0_5, %c0_6] : memref<32x16xbf16, #tpu.memory_space<vmem>>, vector<32x16xbf16>
    %cst = arith.constant dense<0.000000e+00> : vector<32x256xf32>
    %4 = tpu.matmul %3, %0, %cst {dimension_numbers = #tpu.dot_dimension_numbers<[1], [0], [0], [1], [0, 0, 1, 1], [], []>} : vector<32x16xbf16>, vector<16x256xbf16>, vector<32x256xf32> -> vector<32x256xf32>
    %c0_7 = arith.constant 0 : index
    %c0_8 = arith.constant 0 : index
    %5 = vector.load %arg5[%c0_7, %c0_8] : memref<32x1xf32, #tpu.memory_space<vmem>>, vector<32x1xf32>
    %6 = vector.broadcast %5 : vector<32x1xf32> to vector<32x256xf32>
    %7 = arith.addf %4, %6 : vector<32x256xf32>
    %8 = arith.truncf %7 : vector<32x256xf32> to vector<32x256xbf16>
    %c0_9 = arith.constant 0 : index
    %c0_10 = arith.constant 0 : index
    %c0_11 = arith.constant 0 : index
    %9 = vector.load %arg6[%c0_9, %c0_10, %c0_11] : memref<3x96x32xbf16, #tpu.memory_space<vmem>>, vector<1x96x32xbf16>
    %10 = vector.shape_cast %9 : vector<1x96x32xbf16> to vector<96x32xbf16>
    %cst_12 = arith.constant dense<0.000000e+00> : vector<96x256xf32>
    %11 = tpu.matmul %10, %8, %cst_12 {dimension_numbers = #tpu.dot_dimension_numbers<[1], [0], [0], [1], [0, 0, 1, 1], [], []>} : vector<96x32xbf16>, vector<32x256xbf16>, vector<96x256xf32> -> vector<96x256xf32>
    %c1_i32 = arith.constant 1 : i32
    %12 = vector.broadcast %c1_i32 : i32 to vector<1x256xi32>
    %13 = arith.cmpi sge, %2, %12 : vector<1x256xi32>
    %cst_13 = arith.constant 1.000000e+00 : f32
    %cst_14 = arith.constant 0.000000e+00 : f32
    %14 = vector.broadcast %cst_13 : f32 to vector<1x256xf32>
    %15 = vector.broadcast %cst_14 : f32 to vector<1x256xf32>
    %16 = arith.select %13, %14, %15 : vector<1x256xi1>, vector<1x256xf32>
    %c127_i32 = arith.constant 127 : i32
    %17 = vector.broadcast %c127_i32 : i32 to vector<1x256xi32>
    %18 = arith.cmpi slt, %2, %17 : vector<1x256xi32>
    %cst_15 = arith.constant 1.000000e+00 : f32
    %cst_16 = arith.constant 0.000000e+00 : f32
    %19 = vector.broadcast %cst_15 : f32 to vector<1x256xf32>
    %20 = vector.broadcast %cst_16 : f32 to vector<1x256xf32>
    %21 = arith.select %18, %19, %20 : vector<1x256xi1>, vector<1x256xf32>
    %22 = vector.extract_strided_slice %11 {offsets = [32, 0], sizes = [32, 256], strides = [1, 1]} : vector<96x256xf32> to vector<32x256xf32>
    %23 = vector.extract_strided_slice %11 {offsets = [0, 0], sizes = [32, 256], strides = [1, 1]} : vector<96x256xf32> to vector<32x256xf32>
    %c1_i32_17 = arith.constant 1 : i32
    %24 = tpu.dynamic_rotate %23 by %c1_i32_17 dim 1 : vector<32x256xf32>, i32 -> vector<32x256xf32>
    %25 = vector.broadcast %16 : vector<1x256xf32> to vector<32x256xf32>
    %26 = arith.mulf %24, %25 : vector<32x256xf32>
    %27 = arith.addf %22, %26 : vector<32x256xf32>
    %28 = vector.extract_strided_slice %11 {offsets = [64, 0], sizes = [32, 256], strides = [1, 1]} : vector<96x256xf32> to vector<32x256xf32>
    %c255_i32 = arith.constant 255 : i32
    %29 = tpu.dynamic_rotate %28 by %c255_i32 dim 1 : vector<32x256xf32>, i32 -> vector<32x256xf32>
    %30 = vector.broadcast %21 : vector<1x256xf32> to vector<32x256xf32>
    %31 = arith.mulf %29, %30 : vector<32x256xf32>
    %32 = arith.addf %27, %31 : vector<32x256xf32>
    %c0_18 = arith.constant 0 : index
    %c0_19 = arith.constant 0 : index
    %c0_20 = arith.constant 0 : index
    %33 = vector.load %arg7[%c0_18, %c0_19, %c0_20] : memref<3x32x1xf32, #tpu.memory_space<vmem>>, vector<1x32x1xf32>
    %34 = vector.shape_cast %33 : vector<1x32x1xf32> to vector<32x1xf32>
    %35 = vector.broadcast %34 : vector<32x1xf32> to vector<32x256xf32>
    %36 = arith.addf %32, %35 : vector<32x256xf32>
    %cst_21 = arith.constant 0.000000e+00 : f32
    %37 = vector.broadcast %cst_21 : f32 to vector<32x256xf32>
    %38 = arith.maximumf %36, %37 : vector<32x256xf32>
    %c0_22 = arith.constant 0 : index
    %c0_23 = arith.constant 0 : index
    %c0_24 = arith.constant 0 : index
    %39 = vector.load %arg8[%c0_22, %c0_23, %c0_24] : memref<3x32x32xbf16, #tpu.memory_space<vmem>>, vector<1x32x32xbf16>
    %40 = vector.shape_cast %39 : vector<1x32x32xbf16> to vector<32x32xbf16>
    %41 = arith.truncf %38 : vector<32x256xf32> to vector<32x256xbf16>
    %cst_25 = arith.constant dense<0.000000e+00> : vector<32x256xf32>
    %42 = tpu.matmul %40, %41, %cst_25 {dimension_numbers = #tpu.dot_dimension_numbers<[1], [0], [0], [1], [0, 0, 1, 1], [], []>} : vector<32x32xbf16>, vector<32x256xbf16>, vector<32x256xf32> -> vector<32x256xf32>
    %c0_26 = arith.constant 0 : index
    %c0_27 = arith.constant 0 : index
    %c0_28 = arith.constant 0 : index
    %43 = vector.load %arg9[%c0_26, %c0_27, %c0_28] : memref<3x32x1xf32, #tpu.memory_space<vmem>>, vector<1x32x1xf32>
    %44 = vector.shape_cast %43 : vector<1x32x1xf32> to vector<32x1xf32>
    %45 = vector.broadcast %44 : vector<32x1xf32> to vector<32x256xf32>
    %46 = arith.addf %42, %45 : vector<32x256xf32>
    %47 = arith.addf %46, %7 : vector<32x256xf32>
    %48 = vector.broadcast %1 : vector<1x256xf32> to vector<32x256xf32>
    %49 = arith.mulf %47, %48 : vector<32x256xf32>
    %50 = arith.truncf %49 : vector<32x256xf32> to vector<32x256xbf16>
    %c1 = arith.constant 1 : index
    %c0_29 = arith.constant 0 : index
    %c0_30 = arith.constant 0 : index
    %51 = vector.load %arg6[%c1, %c0_29, %c0_30] : memref<3x96x32xbf16, #tpu.memory_space<vmem>>, vector<1x96x32xbf16>
    %52 = vector.shape_cast %51 : vector<1x96x32xbf16> to vector<96x32xbf16>
    %cst_31 = arith.constant dense<0.000000e+00> : vector<96x256xf32>
    %53 = tpu.matmul %52, %50, %cst_31 {dimension_numbers = #tpu.dot_dimension_numbers<[1], [0], [0], [1], [0, 0, 1, 1], [], []>} : vector<96x32xbf16>, vector<32x256xbf16>, vector<96x256xf32> -> vector<96x256xf32>
    %c2_i32 = arith.constant 2 : i32
    %54 = vector.broadcast %c2_i32 : i32 to vector<1x256xi32>
    %55 = arith.cmpi sge, %2, %54 : vector<1x256xi32>
    %cst_32 = arith.constant 1.000000e+00 : f32
    %cst_33 = arith.constant 0.000000e+00 : f32
    %56 = vector.broadcast %cst_32 : f32 to vector<1x256xf32>
    %57 = vector.broadcast %cst_33 : f32 to vector<1x256xf32>
    %58 = arith.select %55, %56, %57 : vector<1x256xi1>, vector<1x256xf32>
    %c126_i32 = arith.constant 126 : i32
    %59 = vector.broadcast %c126_i32 : i32 to vector<1x256xi32>
    %60 = arith.cmpi slt, %2, %59 : vector<1x256xi32>
    %cst_34 = arith.constant 1.000000e+00 : f32
    %cst_35 = arith.constant 0.000000e+00 : f32
    %61 = vector.broadcast %cst_34 : f32 to vector<1x256xf32>
    %62 = vector.broadcast %cst_35 : f32 to vector<1x256xf32>
    %63 = arith.select %60, %61, %62 : vector<1x256xi1>, vector<1x256xf32>
    %64 = vector.extract_strided_slice %53 {offsets = [32, 0], sizes = [32, 256], strides = [1, 1]} : vector<96x256xf32> to vector<32x256xf32>
    %65 = vector.extract_strided_slice %53 {offsets = [0, 0], sizes = [32, 256], strides = [1, 1]} : vector<96x256xf32> to vector<32x256xf32>
    %c2_i32_36 = arith.constant 2 : i32
    %66 = tpu.dynamic_rotate %65 by %c2_i32_36 dim 1 : vector<32x256xf32>, i32 -> vector<32x256xf32>
    %67 = vector.broadcast %58 : vector<1x256xf32> to vector<32x256xf32>
    %68 = arith.mulf %66, %67 : vector<32x256xf32>
    %69 = arith.addf %64, %68 : vector<32x256xf32>
    %70 = vector.extract_strided_slice %53 {offsets = [64, 0], sizes = [32, 256], strides = [1, 1]} : vector<96x256xf32> to vector<32x256xf32>
    %c254_i32 = arith.constant 254 : i32
    %71 = tpu.dynamic_rotate %70 by %c254_i32 dim 1 : vector<32x256xf32>, i32 -> vector<32x256xf32>
    %72 = vector.broadcast %63 : vector<1x256xf32> to vector<32x256xf32>
    %73 = arith.mulf %71, %72 : vector<32x256xf32>
    %74 = arith.addf %69, %73 : vector<32x256xf32>
    %c1_37 = arith.constant 1 : index
    %c0_38 = arith.constant 0 : index
    %c0_39 = arith.constant 0 : index
    %75 = vector.load %arg7[%c1_37, %c0_38, %c0_39] : memref<3x32x1xf32, #tpu.memory_space<vmem>>, vector<1x32x1xf32>
    %76 = vector.shape_cast %75 : vector<1x32x1xf32> to vector<32x1xf32>
    %77 = vector.broadcast %76 : vector<32x1xf32> to vector<32x256xf32>
    %78 = arith.addf %74, %77 : vector<32x256xf32>
    %cst_40 = arith.constant 0.000000e+00 : f32
    %79 = vector.broadcast %cst_40 : f32 to vector<32x256xf32>
    %80 = arith.maximumf %78, %79 : vector<32x256xf32>
    %c1_41 = arith.constant 1 : index
    %c0_42 = arith.constant 0 : index
    %c0_43 = arith.constant 0 : index
    %81 = vector.load %arg8[%c1_41, %c0_42, %c0_43] : memref<3x32x32xbf16, #tpu.memory_space<vmem>>, vector<1x32x32xbf16>
    %82 = vector.shape_cast %81 : vector<1x32x32xbf16> to vector<32x32xbf16>
    %83 = arith.truncf %80 : vector<32x256xf32> to vector<32x256xbf16>
    %cst_44 = arith.constant dense<0.000000e+00> : vector<32x256xf32>
    %84 = tpu.matmul %82, %83, %cst_44 {dimension_numbers = #tpu.dot_dimension_numbers<[1], [0], [0], [1], [0, 0, 1, 1], [], []>} : vector<32x32xbf16>, vector<32x256xbf16>, vector<32x256xf32> -> vector<32x256xf32>
    %c1_45 = arith.constant 1 : index
    %c0_46 = arith.constant 0 : index
    %c0_47 = arith.constant 0 : index
    %85 = vector.load %arg9[%c1_45, %c0_46, %c0_47] : memref<3x32x1xf32, #tpu.memory_space<vmem>>, vector<1x32x1xf32>
    %86 = vector.shape_cast %85 : vector<1x32x1xf32> to vector<32x1xf32>
    %87 = vector.broadcast %86 : vector<32x1xf32> to vector<32x256xf32>
    %88 = arith.addf %84, %87 : vector<32x256xf32>
    %89 = arith.addf %88, %49 : vector<32x256xf32>
    %90 = vector.broadcast %1 : vector<1x256xf32> to vector<32x256xf32>
    %91 = arith.mulf %89, %90 : vector<32x256xf32>
    %92 = arith.truncf %91 : vector<32x256xf32> to vector<32x256xbf16>
    %c2 = arith.constant 2 : index
    %c0_48 = arith.constant 0 : index
    %c0_49 = arith.constant 0 : index
    %93 = vector.load %arg6[%c2, %c0_48, %c0_49] : memref<3x96x32xbf16, #tpu.memory_space<vmem>>, vector<1x96x32xbf16>
    %94 = vector.shape_cast %93 : vector<1x96x32xbf16> to vector<96x32xbf16>
    %cst_50 = arith.constant dense<0.000000e+00> : vector<96x256xf32>
    %95 = tpu.matmul %94, %92, %cst_50 {dimension_numbers = #tpu.dot_dimension_numbers<[1], [0], [0], [1], [0, 0, 1, 1], [], []>} : vector<96x32xbf16>, vector<32x256xbf16>, vector<96x256xf32> -> vector<96x256xf32>
    %c3_i32 = arith.constant 3 : i32
    %96 = vector.broadcast %c3_i32 : i32 to vector<1x256xi32>
    %97 = arith.cmpi sge, %2, %96 : vector<1x256xi32>
    %cst_51 = arith.constant 1.000000e+00 : f32
    %cst_52 = arith.constant 0.000000e+00 : f32
    %98 = vector.broadcast %cst_51 : f32 to vector<1x256xf32>
    %99 = vector.broadcast %cst_52 : f32 to vector<1x256xf32>
    %100 = arith.select %97, %98, %99 : vector<1x256xi1>, vector<1x256xf32>
    %c125_i32 = arith.constant 125 : i32
    %101 = vector.broadcast %c125_i32 : i32 to vector<1x256xi32>
    %102 = arith.cmpi slt, %2, %101 : vector<1x256xi32>
    %cst_53 = arith.constant 1.000000e+00 : f32
    %cst_54 = arith.constant 0.000000e+00 : f32
    %103 = vector.broadcast %cst_53 : f32 to vector<1x256xf32>
    %104 = vector.broadcast %cst_54 : f32 to vector<1x256xf32>
    %105 = arith.select %102, %103, %104 : vector<1x256xi1>, vector<1x256xf32>
    %106 = vector.extract_strided_slice %95 {offsets = [32, 0], sizes = [32, 256], strides = [1, 1]} : vector<96x256xf32> to vector<32x256xf32>
    %107 = vector.extract_strided_slice %95 {offsets = [0, 0], sizes = [32, 256], strides = [1, 1]} : vector<96x256xf32> to vector<32x256xf32>
    %c3_i32_55 = arith.constant 3 : i32
    %108 = tpu.dynamic_rotate %107 by %c3_i32_55 dim 1 : vector<32x256xf32>, i32 -> vector<32x256xf32>
    %109 = vector.broadcast %100 : vector<1x256xf32> to vector<32x256xf32>
    %110 = arith.mulf %108, %109 : vector<32x256xf32>
    %111 = arith.addf %106, %110 : vector<32x256xf32>
    %112 = vector.extract_strided_slice %95 {offsets = [64, 0], sizes = [32, 256], strides = [1, 1]} : vector<96x256xf32> to vector<32x256xf32>
    %c253_i32 = arith.constant 253 : i32
    %113 = tpu.dynamic_rotate %112 by %c253_i32 dim 1 : vector<32x256xf32>, i32 -> vector<32x256xf32>
    %114 = vector.broadcast %105 : vector<1x256xf32> to vector<32x256xf32>
    %115 = arith.mulf %113, %114 : vector<32x256xf32>
    %116 = arith.addf %111, %115 : vector<32x256xf32>
    %c2_56 = arith.constant 2 : index
    %c0_57 = arith.constant 0 : index
    %c0_58 = arith.constant 0 : index
    %117 = vector.load %arg7[%c2_56, %c0_57, %c0_58] : memref<3x32x1xf32, #tpu.memory_space<vmem>>, vector<1x32x1xf32>
    %118 = vector.shape_cast %117 : vector<1x32x1xf32> to vector<32x1xf32>
    %119 = vector.broadcast %118 : vector<32x1xf32> to vector<32x256xf32>
    %120 = arith.addf %116, %119 : vector<32x256xf32>
    %cst_59 = arith.constant 0.000000e+00 : f32
    %121 = vector.broadcast %cst_59 : f32 to vector<32x256xf32>
    %122 = arith.maximumf %120, %121 : vector<32x256xf32>
    %c2_60 = arith.constant 2 : index
    %c0_61 = arith.constant 0 : index
    %c0_62 = arith.constant 0 : index
    %123 = vector.load %arg8[%c2_60, %c0_61, %c0_62] : memref<3x32x32xbf16, #tpu.memory_space<vmem>>, vector<1x32x32xbf16>
    %124 = vector.shape_cast %123 : vector<1x32x32xbf16> to vector<32x32xbf16>
    %125 = arith.truncf %122 : vector<32x256xf32> to vector<32x256xbf16>
    %cst_63 = arith.constant dense<0.000000e+00> : vector<32x256xf32>
    %126 = tpu.matmul %124, %125, %cst_63 {dimension_numbers = #tpu.dot_dimension_numbers<[1], [0], [0], [1], [0, 0, 1, 1], [], []>} : vector<32x32xbf16>, vector<32x256xbf16>, vector<32x256xf32> -> vector<32x256xf32>
    %c2_64 = arith.constant 2 : index
    %c0_65 = arith.constant 0 : index
    %c0_66 = arith.constant 0 : index
    %127 = vector.load %arg9[%c2_64, %c0_65, %c0_66] : memref<3x32x1xf32, #tpu.memory_space<vmem>>, vector<1x32x1xf32>
    %128 = vector.shape_cast %127 : vector<1x32x1xf32> to vector<32x1xf32>
    %129 = vector.broadcast %128 : vector<32x1xf32> to vector<32x256xf32>
    %130 = arith.addf %126, %129 : vector<32x256xf32>
    %131 = arith.addf %130, %91 : vector<32x256xf32>
    %132 = vector.broadcast %1 : vector<1x256xf32> to vector<32x256xf32>
    %133 = arith.mulf %131, %132 : vector<32x256xf32>
    %c0_67 = arith.constant 0 : index
    %c0_68 = arith.constant 0 : index
    %134 = vector.load %arg10[%c0_67, %c0_68] : memref<16x32xbf16, #tpu.memory_space<vmem>>, vector<16x32xbf16>
    %135 = arith.truncf %133 : vector<32x256xf32> to vector<32x256xbf16>
    %cst_69 = arith.constant dense<0.000000e+00> : vector<16x256xf32>
    %136 = tpu.matmul %134, %135, %cst_69 {dimension_numbers = #tpu.dot_dimension_numbers<[1], [0], [0], [1], [0, 0, 1, 1], [], []>} : vector<16x32xbf16>, vector<32x256xbf16>, vector<16x256xf32> -> vector<16x256xf32>
    %c0_70 = arith.constant 0 : index
    %c0_71 = arith.constant 0 : index
    %137 = vector.load %arg11[%c0_70, %c0_71] : memref<16x1xf32, #tpu.memory_space<vmem>>, vector<16x1xf32>
    %138 = vector.broadcast %137 : vector<16x1xf32> to vector<16x256xf32>
    %139 = arith.addf %136, %138 : vector<16x256xf32>
    %c0_72 = arith.constant 0 : index
    %c0_73 = arith.constant 0 : index
    %140 = vector.load %arg12[%c0_72, %c0_73] : memref<16x256xf32, #tpu.memory_space<vmem>>, vector<16x256xf32>
    tpu.vector_store %arg12[%c0_72, %c0_73], %139 {strides = array<i32>} : memref<16x256xf32, #tpu.memory_space<vmem>>, vector<16x256xf32>,
    return
  }
  func.func @transform_0(%arg0: i32) -> (i32, i32) {
    %c0_i32 = arith.constant 0 : i32
    %c0_i32_0 = arith.constant 0 : i32
    return %c0_i32, %arg0 : i32, i32
  }
  func.func @transform_1(%arg0: i32) -> (i32, i32) {
    %c0_i32 = arith.constant 0 : i32
    %c0_i32_0 = arith.constant 0 : i32
    return %c0_i32, %arg0 : i32, i32
  }
  func.func @transform_2(%arg0: i32) -> (i32, i32) {
    %c0_i32 = arith.constant 0 : i32
    %c0_i32_0 = arith.constant 0 : i32
    return %c0_i32, %arg0 : i32, i32
  }
  func.func @transform_3(%arg0: i32) -> (i32, i32) {
    %c0_i32 = arith.constant 0 : i32
    %c0_i32_0 = arith.constant 0 : i32
    %c0_i32_1 = arith.constant 0 : i32
    return %c0_i32, %c0_i32_0 : i32, i32
  }
  func.func @transform_4(%arg0: i32) -> (i32, i32) {
    %c0_i32 = arith.constant 0 : i32
    %c0_i32_0 = arith.constant 0 : i32
    %c0_i32_1 = arith.constant 0 : i32
    return %c0_i32, %c0_i32_0 : i32, i32
  }
  func.func @transform_5(%arg0: i32) -> (i32, i32, i32) {
    %c0_i32 = arith.constant 0 : i32
    %c0_i32_0 = arith.constant 0 : i32
    %c0_i32_1 = arith.constant 0 : i32
    %c0_i32_2 = arith.constant 0 : i32
    return %c0_i32, %c0_i32_0, %c0_i32_1 : i32, i32, i32
  }
  func.func @transform_6(%arg0: i32) -> (i32, i32, i32) {
    %c0_i32 = arith.constant 0 : i32
    %c0_i32_0 = arith.constant 0 : i32
    %c0_i32_1 = arith.constant 0 : i32
    %c0_i32_2 = arith.constant 0 : i32
    return %c0_i32, %c0_i32_0, %c0_i32_1 : i32, i32, i32
  }
  func.func @transform_7(%arg0: i32) -> (i32, i32, i32) {
    %c0_i32 = arith.constant 0 : i32
    %c0_i32_0 = arith.constant 0 : i32
    %c0_i32_1 = arith.constant 0 : i32
    %c0_i32_2 = arith.constant 0 : i32
    return %c0_i32, %c0_i32_0, %c0_i32_1 : i32, i32, i32
  }
  func.func @transform_8(%arg0: i32) -> (i32, i32, i32) {
    %c0_i32 = arith.constant 0 : i32
    %c0_i32_0 = arith.constant 0 : i32
    %c0_i32_1 = arith.constant 0 : i32
    %c0_i32_2 = arith.constant 0 : i32
    return %c0_i32, %c0_i32_0, %c0_i32_1 : i32, i32, i32
  }
  func.func @transform_9(%arg0: i32) -> (i32, i32) {
    %c0_i32 = arith.constant 0 : i32
    %c0_i32_0 = arith.constant 0 : i32
    %c0_i32_1 = arith.constant 0 : i32
    return %c0_i32, %c0_i32_0 : i32, i32
  }
  func.func @transform_10(%arg0: i32) -> (i32, i32) {
    %c0_i32 = arith.constant 0 : i32
    %c0_i32_0 = arith.constant 0 : i32
    %c0_i32_1 = arith.constant 0 : i32
    return %c0_i32, %c0_i32_0 : i32, i32
  }
  func.func @transform_11(%arg0: i32) -> (i32, i32) {
    %c0_i32 = arith.constant 0 : i32
    %c0_i32_0 = arith.constant 0 : i32
    return %c0_i32, %arg0 : i32, i32
  }
}

module attributes {stable_mosaic.version = 11 : i64} {
  func.func @_branch_kernel(%arg0: i32, %arg1: memref<16x512xbf16, #tpu.memory_space<vmem>>, %arg2: memref<1x512xf32, #tpu.memory_space<vmem>>, %arg3: memref<1x512xi32, #tpu.memory_space<vmem>>, %arg4: memref<32x16xbf16, #tpu.memory_space<vmem>>, %arg5: memref<32x1xf32, #tpu.memory_space<vmem>>, %arg6: memref<3x96x32xbf16, #tpu.memory_space<vmem>>, %arg7: memref<3x32x1xf32, #tpu.memory_space<vmem>>, %arg8: memref<3x32x32xbf16, #tpu.memory_space<vmem>>, %arg9: memref<3x32x1xf32, #tpu.memory_space<vmem>>, %arg10: memref<16x32xbf16, #tpu.memory_space<vmem>>, %arg11: memref<16x1xf32, #tpu.memory_space<vmem>>, %arg12: memref<16x512xf32, #tpu.memory_space<vmem>>) attributes {dimension_semantics = [#tpu.dimension_semantics<parallel>], iteration_bounds = array<i64: 1>, scalar_prefetch = 0 : i64, scratch_operands = 0 : i64, tpu.core_type = #tpu.core_type<tc>, window_params = [{transform_indices = @transform_0, window_bounds = array<i64: 16, 512>}, {transform_indices = @transform_1, window_bounds = array<i64: 1, 512>}, {transform_indices = @transform_2, window_bounds = array<i64: 1, 512>}, {pipeline_mode = #tpu.pipeline_mode<synchronous>, transform_indices = @transform_3, window_bounds = array<i64: 32, 16>}, {pipeline_mode = #tpu.pipeline_mode<synchronous>, transform_indices = @transform_4, window_bounds = array<i64: 32, 1>}, {pipeline_mode = #tpu.pipeline_mode<synchronous>, transform_indices = @transform_5, window_bounds = array<i64: 3, 96, 32>}, {pipeline_mode = #tpu.pipeline_mode<synchronous>, transform_indices = @transform_6, window_bounds = array<i64: 3, 32, 1>}, {pipeline_mode = #tpu.pipeline_mode<synchronous>, transform_indices = @transform_7, window_bounds = array<i64: 3, 32, 32>}, {pipeline_mode = #tpu.pipeline_mode<synchronous>, transform_indices = @transform_8, window_bounds = array<i64: 3, 32, 1>}, {pipeline_mode = #tpu.pipeline_mode<synchronous>, transform_indices = @transform_9, window_bounds = array<i64: 16, 32>}, {pipeline_mode = #tpu.pipeline_mode<synchronous>, transform_indices = @transform_10, window_bounds = array<i64: 16, 1>}, {transform_indices = @transform_11, window_bounds = array<i64: 16, 512>}]} {
    %c0 = arith.constant 0 : index
    %c0_0 = arith.constant 0 : index
    %0 = vector.load %arg1[%c0, %c0_0] : memref<16x512xbf16, #tpu.memory_space<vmem>>, vector<16x512xbf16>
    %c0_1 = arith.constant 0 : index
    %c0_2 = arith.constant 0 : index
    %1 = vector.load %arg2[%c0_1, %c0_2] : memref<1x512xf32, #tpu.memory_space<vmem>>, vector<1x512xf32>
    %c0_3 = arith.constant 0 : index
    %c0_4 = arith.constant 0 : index
    %2 = vector.load %arg3[%c0_3, %c0_4] : memref<1x512xi32, #tpu.memory_space<vmem>>, vector<1x512xi32>
    %c0_5 = arith.constant 0 : index
    %c0_6 = arith.constant 0 : index
    %3 = vector.load %arg4[%c0_5, %c0_6] : memref<32x16xbf16, #tpu.memory_space<vmem>>, vector<32x16xbf16>
    %cst = arith.constant dense<0.000000e+00> : vector<32x512xf32>
    %4 = tpu.matmul %3, %0, %cst {dimension_numbers = #tpu.dot_dimension_numbers<[1], [0], [0], [1], [0, 0, 1, 1], [], []>} : vector<32x16xbf16>, vector<16x512xbf16>, vector<32x512xf32> -> vector<32x512xf32>
    %c0_7 = arith.constant 0 : index
    %c0_8 = arith.constant 0 : index
    %5 = vector.load %arg5[%c0_7, %c0_8] : memref<32x1xf32, #tpu.memory_space<vmem>>, vector<32x1xf32>
    %6 = vector.broadcast %5 : vector<32x1xf32> to vector<32x512xf32>
    %7 = arith.addf %4, %6 : vector<32x512xf32>
    %8 = arith.truncf %7 : vector<32x512xf32> to vector<32x512xbf16>
    %c0_9 = arith.constant 0 : index
    %c0_10 = arith.constant 0 : index
    %c0_11 = arith.constant 0 : index
    %9 = vector.load %arg6[%c0_9, %c0_10, %c0_11] : memref<3x96x32xbf16, #tpu.memory_space<vmem>>, vector<1x96x32xbf16>
    %10 = vector.shape_cast %9 : vector<1x96x32xbf16> to vector<96x32xbf16>
    %cst_12 = arith.constant dense<0.000000e+00> : vector<96x512xf32>
    %11 = tpu.matmul %10, %8, %cst_12 {dimension_numbers = #tpu.dot_dimension_numbers<[1], [0], [0], [1], [0, 0, 1, 1], [], []>} : vector<96x32xbf16>, vector<32x512xbf16>, vector<96x512xf32> -> vector<96x512xf32>
    %c1_i32 = arith.constant 1 : i32
    %12 = vector.broadcast %c1_i32 : i32 to vector<1x512xi32>
    %13 = arith.cmpi sge, %2, %12 : vector<1x512xi32>
    %cst_13 = arith.constant 1.000000e+00 : f32
    %cst_14 = arith.constant 0.000000e+00 : f32
    %14 = vector.broadcast %cst_13 : f32 to vector<1x512xf32>
    %15 = vector.broadcast %cst_14 : f32 to vector<1x512xf32>
    %16 = arith.select %13, %14, %15 : vector<1x512xi1>, vector<1x512xf32>
    %c255_i32 = arith.constant 255 : i32
    %17 = vector.broadcast %c255_i32 : i32 to vector<1x512xi32>
    %18 = arith.cmpi slt, %2, %17 : vector<1x512xi32>
    %cst_15 = arith.constant 1.000000e+00 : f32
    %cst_16 = arith.constant 0.000000e+00 : f32
    %19 = vector.broadcast %cst_15 : f32 to vector<1x512xf32>
    %20 = vector.broadcast %cst_16 : f32 to vector<1x512xf32>
    %21 = arith.select %18, %19, %20 : vector<1x512xi1>, vector<1x512xf32>
    %22 = vector.extract_strided_slice %11 {offsets = [32, 0], sizes = [32, 512], strides = [1, 1]} : vector<96x512xf32> to vector<32x512xf32>
    %23 = vector.extract_strided_slice %11 {offsets = [0, 0], sizes = [32, 512], strides = [1, 1]} : vector<96x512xf32> to vector<32x512xf32>
    %c1_i32_17 = arith.constant 1 : i32
    %24 = tpu.dynamic_rotate %23 by %c1_i32_17 dim 1 : vector<32x512xf32>, i32 -> vector<32x512xf32>
    %25 = vector.broadcast %16 : vector<1x512xf32> to vector<32x512xf32>
    %26 = arith.mulf %24, %25 : vector<32x512xf32>
    %27 = arith.addf %22, %26 : vector<32x512xf32>
    %28 = vector.extract_strided_slice %11 {offsets = [64, 0], sizes = [32, 512], strides = [1, 1]} : vector<96x512xf32> to vector<32x512xf32>
    %c511_i32 = arith.constant 511 : i32
    %29 = tpu.dynamic_rotate %28 by %c511_i32 dim 1 : vector<32x512xf32>, i32 -> vector<32x512xf32>
    %30 = vector.broadcast %21 : vector<1x512xf32> to vector<32x512xf32>
    %31 = arith.mulf %29, %30 : vector<32x512xf32>
    %32 = arith.addf %27, %31 : vector<32x512xf32>
    %c0_18 = arith.constant 0 : index
    %c0_19 = arith.constant 0 : index
    %c0_20 = arith.constant 0 : index
    %33 = vector.load %arg7[%c0_18, %c0_19, %c0_20] : memref<3x32x1xf32, #tpu.memory_space<vmem>>, vector<1x32x1xf32>
    %34 = vector.shape_cast %33 : vector<1x32x1xf32> to vector<32x1xf32>
    %35 = vector.broadcast %34 : vector<32x1xf32> to vector<32x512xf32>
    %36 = arith.addf %32, %35 : vector<32x512xf32>
    %cst_21 = arith.constant 0.000000e+00 : f32
    %37 = vector.broadcast %cst_21 : f32 to vector<32x512xf32>
    %38 = arith.maximumf %36, %37 : vector<32x512xf32>
    %c0_22 = arith.constant 0 : index
    %c0_23 = arith.constant 0 : index
    %c0_24 = arith.constant 0 : index
    %39 = vector.load %arg8[%c0_22, %c0_23, %c0_24] : memref<3x32x32xbf16, #tpu.memory_space<vmem>>, vector<1x32x32xbf16>
    %40 = vector.shape_cast %39 : vector<1x32x32xbf16> to vector<32x32xbf16>
    %41 = arith.truncf %38 : vector<32x512xf32> to vector<32x512xbf16>
    %cst_25 = arith.constant dense<0.000000e+00> : vector<32x512xf32>
    %42 = tpu.matmul %40, %41, %cst_25 {dimension_numbers = #tpu.dot_dimension_numbers<[1], [0], [0], [1], [0, 0, 1, 1], [], []>} : vector<32x32xbf16>, vector<32x512xbf16>, vector<32x512xf32> -> vector<32x512xf32>
    %c0_26 = arith.constant 0 : index
    %c0_27 = arith.constant 0 : index
    %c0_28 = arith.constant 0 : index
    %43 = vector.load %arg9[%c0_26, %c0_27, %c0_28] : memref<3x32x1xf32, #tpu.memory_space<vmem>>, vector<1x32x1xf32>
    %44 = vector.shape_cast %43 : vector<1x32x1xf32> to vector<32x1xf32>
    %45 = vector.broadcast %44 : vector<32x1xf32> to vector<32x512xf32>
    %46 = arith.addf %42, %45 : vector<32x512xf32>
    %47 = arith.addf %46, %7 : vector<32x512xf32>
    %48 = vector.broadcast %1 : vector<1x512xf32> to vector<32x512xf32>
    %49 = arith.mulf %47, %48 : vector<32x512xf32>
    %50 = arith.truncf %49 : vector<32x512xf32> to vector<32x512xbf16>
    %c1 = arith.constant 1 : index
    %c0_29 = arith.constant 0 : index
    %c0_30 = arith.constant 0 : index
    %51 = vector.load %arg6[%c1, %c0_29, %c0_30] : memref<3x96x32xbf16, #tpu.memory_space<vmem>>, vector<1x96x32xbf16>
    %52 = vector.shape_cast %51 : vector<1x96x32xbf16> to vector<96x32xbf16>
    %cst_31 = arith.constant dense<0.000000e+00> : vector<96x512xf32>
    %53 = tpu.matmul %52, %50, %cst_31 {dimension_numbers = #tpu.dot_dimension_numbers<[1], [0], [0], [1], [0, 0, 1, 1], [], []>} : vector<96x32xbf16>, vector<32x512xbf16>, vector<96x512xf32> -> vector<96x512xf32>
    %c2_i32 = arith.constant 2 : i32
    %54 = vector.broadcast %c2_i32 : i32 to vector<1x512xi32>
    %55 = arith.cmpi sge, %2, %54 : vector<1x512xi32>
    %cst_32 = arith.constant 1.000000e+00 : f32
    %cst_33 = arith.constant 0.000000e+00 : f32
    %56 = vector.broadcast %cst_32 : f32 to vector<1x512xf32>
    %57 = vector.broadcast %cst_33 : f32 to vector<1x512xf32>
    %58 = arith.select %55, %56, %57 : vector<1x512xi1>, vector<1x512xf32>
    %c254_i32 = arith.constant 254 : i32
    %59 = vector.broadcast %c254_i32 : i32 to vector<1x512xi32>
    %60 = arith.cmpi slt, %2, %59 : vector<1x512xi32>
    %cst_34 = arith.constant 1.000000e+00 : f32
    %cst_35 = arith.constant 0.000000e+00 : f32
    %61 = vector.broadcast %cst_34 : f32 to vector<1x512xf32>
    %62 = vector.broadcast %cst_35 : f32 to vector<1x512xf32>
    %63 = arith.select %60, %61, %62 : vector<1x512xi1>, vector<1x512xf32>
    %64 = vector.extract_strided_slice %53 {offsets = [32, 0], sizes = [32, 512], strides = [1, 1]} : vector<96x512xf32> to vector<32x512xf32>
    %65 = vector.extract_strided_slice %53 {offsets = [0, 0], sizes = [32, 512], strides = [1, 1]} : vector<96x512xf32> to vector<32x512xf32>
    %c2_i32_36 = arith.constant 2 : i32
    %66 = tpu.dynamic_rotate %65 by %c2_i32_36 dim 1 : vector<32x512xf32>, i32 -> vector<32x512xf32>
    %67 = vector.broadcast %58 : vector<1x512xf32> to vector<32x512xf32>
    %68 = arith.mulf %66, %67 : vector<32x512xf32>
    %69 = arith.addf %64, %68 : vector<32x512xf32>
    %70 = vector.extract_strided_slice %53 {offsets = [64, 0], sizes = [32, 512], strides = [1, 1]} : vector<96x512xf32> to vector<32x512xf32>
    %c510_i32 = arith.constant 510 : i32
    %71 = tpu.dynamic_rotate %70 by %c510_i32 dim 1 : vector<32x512xf32>, i32 -> vector<32x512xf32>
    %72 = vector.broadcast %63 : vector<1x512xf32> to vector<32x512xf32>
    %73 = arith.mulf %71, %72 : vector<32x512xf32>
    %74 = arith.addf %69, %73 : vector<32x512xf32>
    %c1_37 = arith.constant 1 : index
    %c0_38 = arith.constant 0 : index
    %c0_39 = arith.constant 0 : index
    %75 = vector.load %arg7[%c1_37, %c0_38, %c0_39] : memref<3x32x1xf32, #tpu.memory_space<vmem>>, vector<1x32x1xf32>
    %76 = vector.shape_cast %75 : vector<1x32x1xf32> to vector<32x1xf32>
    %77 = vector.broadcast %76 : vector<32x1xf32> to vector<32x512xf32>
    %78 = arith.addf %74, %77 : vector<32x512xf32>
    %cst_40 = arith.constant 0.000000e+00 : f32
    %79 = vector.broadcast %cst_40 : f32 to vector<32x512xf32>
    %80 = arith.maximumf %78, %79 : vector<32x512xf32>
    %c1_41 = arith.constant 1 : index
    %c0_42 = arith.constant 0 : index
    %c0_43 = arith.constant 0 : index
    %81 = vector.load %arg8[%c1_41, %c0_42, %c0_43] : memref<3x32x32xbf16, #tpu.memory_space<vmem>>, vector<1x32x32xbf16>
    %82 = vector.shape_cast %81 : vector<1x32x32xbf16> to vector<32x32xbf16>
    %83 = arith.truncf %80 : vector<32x512xf32> to vector<32x512xbf16>
    %cst_44 = arith.constant dense<0.000000e+00> : vector<32x512xf32>
    %84 = tpu.matmul %82, %83, %cst_44 {dimension_numbers = #tpu.dot_dimension_numbers<[1], [0], [0], [1], [0, 0, 1, 1], [], []>} : vector<32x32xbf16>, vector<32x512xbf16>, vector<32x512xf32> -> vector<32x512xf32>
    %c1_45 = arith.constant 1 : index
    %c0_46 = arith.constant 0 : index
    %c0_47 = arith.constant 0 : index
    %85 = vector.load %arg9[%c1_45, %c0_46, %c0_47] : memref<3x32x1xf32, #tpu.memory_space<vmem>>, vector<1x32x1xf32>
    %86 = vector.shape_cast %85 : vector<1x32x1xf32> to vector<32x1xf32>
    %87 = vector.broadcast %86 : vector<32x1xf32> to vector<32x512xf32>
    %88 = arith.addf %84, %87 : vector<32x512xf32>
    %89 = arith.addf %88, %49 : vector<32x512xf32>
    %90 = vector.broadcast %1 : vector<1x512xf32> to vector<32x512xf32>
    %91 = arith.mulf %89, %90 : vector<32x512xf32>
    %92 = arith.truncf %91 : vector<32x512xf32> to vector<32x512xbf16>
    %c2 = arith.constant 2 : index
    %c0_48 = arith.constant 0 : index
    %c0_49 = arith.constant 0 : index
    %93 = vector.load %arg6[%c2, %c0_48, %c0_49] : memref<3x96x32xbf16, #tpu.memory_space<vmem>>, vector<1x96x32xbf16>
    %94 = vector.shape_cast %93 : vector<1x96x32xbf16> to vector<96x32xbf16>
    %cst_50 = arith.constant dense<0.000000e+00> : vector<96x512xf32>
    %95 = tpu.matmul %94, %92, %cst_50 {dimension_numbers = #tpu.dot_dimension_numbers<[1], [0], [0], [1], [0, 0, 1, 1], [], []>} : vector<96x32xbf16>, vector<32x512xbf16>, vector<96x512xf32> -> vector<96x512xf32>
    %c3_i32 = arith.constant 3 : i32
    %96 = vector.broadcast %c3_i32 : i32 to vector<1x512xi32>
    %97 = arith.cmpi sge, %2, %96 : vector<1x512xi32>
    %cst_51 = arith.constant 1.000000e+00 : f32
    %cst_52 = arith.constant 0.000000e+00 : f32
    %98 = vector.broadcast %cst_51 : f32 to vector<1x512xf32>
    %99 = vector.broadcast %cst_52 : f32 to vector<1x512xf32>
    %100 = arith.select %97, %98, %99 : vector<1x512xi1>, vector<1x512xf32>
    %c253_i32 = arith.constant 253 : i32
    %101 = vector.broadcast %c253_i32 : i32 to vector<1x512xi32>
    %102 = arith.cmpi slt, %2, %101 : vector<1x512xi32>
    %cst_53 = arith.constant 1.000000e+00 : f32
    %cst_54 = arith.constant 0.000000e+00 : f32
    %103 = vector.broadcast %cst_53 : f32 to vector<1x512xf32>
    %104 = vector.broadcast %cst_54 : f32 to vector<1x512xf32>
    %105 = arith.select %102, %103, %104 : vector<1x512xi1>, vector<1x512xf32>
    %106 = vector.extract_strided_slice %95 {offsets = [32, 0], sizes = [32, 512], strides = [1, 1]} : vector<96x512xf32> to vector<32x512xf32>
    %107 = vector.extract_strided_slice %95 {offsets = [0, 0], sizes = [32, 512], strides = [1, 1]} : vector<96x512xf32> to vector<32x512xf32>
    %c3_i32_55 = arith.constant 3 : i32
    %108 = tpu.dynamic_rotate %107 by %c3_i32_55 dim 1 : vector<32x512xf32>, i32 -> vector<32x512xf32>
    %109 = vector.broadcast %100 : vector<1x512xf32> to vector<32x512xf32>
    %110 = arith.mulf %108, %109 : vector<32x512xf32>
    %111 = arith.addf %106, %110 : vector<32x512xf32>
    %112 = vector.extract_strided_slice %95 {offsets = [64, 0], sizes = [32, 512], strides = [1, 1]} : vector<96x512xf32> to vector<32x512xf32>
    %c509_i32 = arith.constant 509 : i32
    %113 = tpu.dynamic_rotate %112 by %c509_i32 dim 1 : vector<32x512xf32>, i32 -> vector<32x512xf32>
    %114 = vector.broadcast %105 : vector<1x512xf32> to vector<32x512xf32>
    %115 = arith.mulf %113, %114 : vector<32x512xf32>
    %116 = arith.addf %111, %115 : vector<32x512xf32>
    %c2_56 = arith.constant 2 : index
    %c0_57 = arith.constant 0 : index
    %c0_58 = arith.constant 0 : index
    %117 = vector.load %arg7[%c2_56, %c0_57, %c0_58] : memref<3x32x1xf32, #tpu.memory_space<vmem>>, vector<1x32x1xf32>
    %118 = vector.shape_cast %117 : vector<1x32x1xf32> to vector<32x1xf32>
    %119 = vector.broadcast %118 : vector<32x1xf32> to vector<32x512xf32>
    %120 = arith.addf %116, %119 : vector<32x512xf32>
    %cst_59 = arith.constant 0.000000e+00 : f32
    %121 = vector.broadcast %cst_59 : f32 to vector<32x512xf32>
    %122 = arith.maximumf %120, %121 : vector<32x512xf32>
    %c2_60 = arith.constant 2 : index
    %c0_61 = arith.constant 0 : index
    %c0_62 = arith.constant 0 : index
    %123 = vector.load %arg8[%c2_60, %c0_61, %c0_62] : memref<3x32x32xbf16, #tpu.memory_space<vmem>>, vector<1x32x32xbf16>
    %124 = vector.shape_cast %123 : vector<1x32x32xbf16> to vector<32x32xbf16>
    %125 = arith.truncf %122 : vector<32x512xf32> to vector<32x512xbf16>
    %cst_63 = arith.constant dense<0.000000e+00> : vector<32x512xf32>
    %126 = tpu.matmul %124, %125, %cst_63 {dimension_numbers = #tpu.dot_dimension_numbers<[1], [0], [0], [1], [0, 0, 1, 1], [], []>} : vector<32x32xbf16>, vector<32x512xbf16>, vector<32x512xf32> -> vector<32x512xf32>
    %c2_64 = arith.constant 2 : index
    %c0_65 = arith.constant 0 : index
    %c0_66 = arith.constant 0 : index
    %127 = vector.load %arg9[%c2_64, %c0_65, %c0_66] : memref<3x32x1xf32, #tpu.memory_space<vmem>>, vector<1x32x1xf32>
    %128 = vector.shape_cast %127 : vector<1x32x1xf32> to vector<32x1xf32>
    %129 = vector.broadcast %128 : vector<32x1xf32> to vector<32x512xf32>
    %130 = arith.addf %126, %129 : vector<32x512xf32>
    %131 = arith.addf %130, %91 : vector<32x512xf32>
    %132 = vector.broadcast %1 : vector<1x512xf32> to vector<32x512xf32>
    %133 = arith.mulf %131, %132 : vector<32x512xf32>
    %c0_67 = arith.constant 0 : index
    %c0_68 = arith.constant 0 : index
    %134 = vector.load %arg10[%c0_67, %c0_68] : memref<16x32xbf16, #tpu.memory_space<vmem>>, vector<16x32xbf16>
    %135 = arith.truncf %133 : vector<32x512xf32> to vector<32x512xbf16>
    %cst_69 = arith.constant dense<0.000000e+00> : vector<16x512xf32>
    %136 = tpu.matmul %134, %135, %cst_69 {dimension_numbers = #tpu.dot_dimension_numbers<[1], [0], [0], [1], [0, 0, 1, 1], [], []>} : vector<16x32xbf16>, vector<32x512xbf16>, vector<16x512xf32> -> vector<16x512xf32>
    %c0_70 = arith.constant 0 : index
    %c0_71 = arith.constant 0 : index
    %137 = vector.load %arg11[%c0_70, %c0_71] : memref<16x1xf32, #tpu.memory_space<vmem>>, vector<16x1xf32>
    %138 = vector.broadcast %137 : vector<16x1xf32> to vector<16x512xf32>
    %139 = arith.addf %136, %138 : vector<16x512xf32>
    %c0_72 = arith.constant 0 : index
    %c0_73 = arith.constant 0 : index
    %140 = vector.load %arg12[%c0_72, %c0_73] : memref<16x512xf32, #tpu.memory_space<vmem>>, vector<16x512xf32>
    tpu.vector_store %arg12[%c0_72, %c0_73], %139 {strides = array<i32>} : memref<16x512xf32, #tpu.memory_space<vmem>>, vector<16x512xf32>,
    return
  }
  func.func @transform_0(%arg0: i32) -> (i32, i32) {
    %c0_i32 = arith.constant 0 : i32
    %c0_i32_0 = arith.constant 0 : i32
    return %c0_i32, %arg0 : i32, i32
  }
  func.func @transform_1(%arg0: i32) -> (i32, i32) {
    %c0_i32 = arith.constant 0 : i32
    %c0_i32_0 = arith.constant 0 : i32
    return %c0_i32, %arg0 : i32, i32
  }
  func.func @transform_2(%arg0: i32) -> (i32, i32) {
    %c0_i32 = arith.constant 0 : i32
    %c0_i32_0 = arith.constant 0 : i32
    return %c0_i32, %arg0 : i32, i32
  }
  func.func @transform_3(%arg0: i32) -> (i32, i32) {
    %c0_i32 = arith.constant 0 : i32
    %c0_i32_0 = arith.constant 0 : i32
    %c0_i32_1 = arith.constant 0 : i32
    return %c0_i32, %c0_i32_0 : i32, i32
  }
  func.func @transform_4(%arg0: i32) -> (i32, i32) {
    %c0_i32 = arith.constant 0 : i32
    %c0_i32_0 = arith.constant 0 : i32
    %c0_i32_1 = arith.constant 0 : i32
    return %c0_i32, %c0_i32_0 : i32, i32
  }
  func.func @transform_5(%arg0: i32) -> (i32, i32, i32) {
    %c0_i32 = arith.constant 0 : i32
    %c0_i32_0 = arith.constant 0 : i32
    %c0_i32_1 = arith.constant 0 : i32
    %c0_i32_2 = arith.constant 0 : i32
    return %c0_i32, %c0_i32_0, %c0_i32_1 : i32, i32, i32
  }
  func.func @transform_6(%arg0: i32) -> (i32, i32, i32) {
    %c0_i32 = arith.constant 0 : i32
    %c0_i32_0 = arith.constant 0 : i32
    %c0_i32_1 = arith.constant 0 : i32
    %c0_i32_2 = arith.constant 0 : i32
    return %c0_i32, %c0_i32_0, %c0_i32_1 : i32, i32, i32
  }
  func.func @transform_7(%arg0: i32) -> (i32, i32, i32) {
    %c0_i32 = arith.constant 0 : i32
    %c0_i32_0 = arith.constant 0 : i32
    %c0_i32_1 = arith.constant 0 : i32
    %c0_i32_2 = arith.constant 0 : i32
    return %c0_i32, %c0_i32_0, %c0_i32_1 : i32, i32, i32
  }
  func.func @transform_8(%arg0: i32) -> (i32, i32, i32) {
    %c0_i32 = arith.constant 0 : i32
    %c0_i32_0 = arith.constant 0 : i32
    %c0_i32_1 = arith.constant 0 : i32
    %c0_i32_2 = arith.constant 0 : i32
    return %c0_i32, %c0_i32_0, %c0_i32_1 : i32, i32, i32
  }
  func.func @transform_9(%arg0: i32) -> (i32, i32) {
    %c0_i32 = arith.constant 0 : i32
    %c0_i32_0 = arith.constant 0 : i32
    %c0_i32_1 = arith.constant 0 : i32
    return %c0_i32, %c0_i32_0 : i32, i32
  }
  func.func @transform_10(%arg0: i32) -> (i32, i32) {
    %c0_i32 = arith.constant 0 : i32
    %c0_i32_0 = arith.constant 0 : i32
    %c0_i32_1 = arith.constant 0 : i32
    return %c0_i32, %c0_i32_0 : i32, i32
  }
  func.func @transform_11(%arg0: i32) -> (i32, i32) {
    %c0_i32 = arith.constant 0 : i32
    %c0_i32_0 = arith.constant 0 : i32
    return %c0_i32, %arg0 : i32, i32
  }
}

</mosaic_0001>

<bundles_post_ra>
// kernel: multiscale_tcn_forward.3
= control target key start
LH: loop header
LB: loop body
LE: loop exit
PB: predicated region body
PF: predicated region fallthrough
CT: control target
= control target key end

     0   :  { %v1664_v1 = vmov 0   ;;  %vm91_vm0 = vcmask 130048   ;;  %vm197_vm1 = vcmask 261120   ;;  %s1666_s27 = smov 127   ;;  %s1668_s19 = smov 2   ;;  %s2339_s0 = inlined_call_operand.vmem [shape: bf16[16,256], index: 0, kind: input, shape index: {}]   ;;  %s2340_s3 = inlined_call_operand.vmem [shape: bf16[32,16], index: 3, kind: input, shape index: {}]   ;;  %s2341_s4 = inlined_call_operand.vmem [shape: f32[32,1], index: 4, kind: input, shape index: {}]   ;;  %s2342_s6 = inlined_call_operand.vmem [shape: f32[3,32,1], index: 6, kind: input, shape index: {}]   ;;  %s2343_s5 = inlined_call_operand.vmem [shape: bf16[3,96,32], index: 5, kind: input, shape index: {}]   ;;  %s2344_s8 = inlined_call_operand.vmem [shape: f32[3,32,1], index: 8, kind: input, shape index: {}]   ;;  %s2345_s7 = inlined_call_operand.vmem [shape: bf16[3,32,32], index: 7, kind: input, shape index: {}]   ;;  %s2346_s2 = inlined_call_operand.vmem [shape: s32[1,256], index: 2, kind: input, shape index: {}]   ;;  %s2347_s1 = inlined_call_operand.vmem [shape: f32[1,256], index: 1, kind: input, shape index: {}]   ;;  %s2348_s10 = inlined_call_operand.vmem [shape: f32[16,1], index: 10, kind: input, shape index: {}]   ;;  %s2349_s9 = inlined_call_operand.vmem [shape: bf16[16,32], index: 9, kind: input, shape index: {}]   ;;  %s2350_s11 = inlined_call_operand.vmem [shape: f32[16,256], index: 11, kind: output, shape index: {}]  }
   0x1   :  { %v1634_v0 = vld [vmem:[%s2339_s0 + $0x4] ss:$8 sps:$4 sm:$0xff]   ;;  %130 = vmatprep.mubr.bf16.mxu0 %v1664_v1  ;;  %1633 = vset.pattern.permute.xlu1 %v1664_v1  ;;  %v1636_v2 = vld [vmem:[%s2339_s0] ss:$8 sps:$4 sm:$0xff]   ;;  %v49_v5 = vld [vmem:[%s2341_s4 + $0x10] sm:$0xff]  ;;  %s1665_s0 = smov 1  }
   0x2   :  { %1632 = vset.pattern.permute.xlu0 %v1664_v1  ;;  %248 = vmatprep.mubr.bf16.mxu1 %v1664_v1  ;;  %v1637_v3 = vld [vmem:[%s2340_s3] sm:$0xff]   ;;  %v48_v6 = vld [vmem:[%s2341_s4 + $0x8] sm:$0xff]  ;;  %v50_v7 = vld [vmem:[%s2341_s4 + $0x18] sm:$0xff]  ;;  %s1669_s20 = smov 126  }
   0x3   :  { %112 = vmatprep.subr.bf16.mxu0 %v1634_v0  ;;  %v47_v4 = vld [vmem:[%s2341_s4] sm:$0xff]  ;;  %63 = vperm.xlu0 %1632, %v49_v5   ;;  %v421_v8 = vld [vmem:[%s2342_s6 + $0x10] sm:$0xff]  ;;  %v422_v9 = vld [vmem:[%s2342_s6 + $0x18] sm:$0xff] }
   0x4   :  { %113 = vmatpush1.bf16.msra.mxu0 %v1636_v2  ;;  %53 = vperm.xlu1 %1633, %v47_v4   ;;  %v1638_v10 = vld [vmem:[%s2340_s3 + $0x8] sm:$0xff]   ;;  %v1639_v35 = vld [vmem:[%s2343_s5] sm:$0xff]   ;;  %v1641_v37 = vld [vmem:[%s2343_s5 + $0x10] sm:$0xff]  }
   0x5   :  { %v1640_v36 = vld [vmem:[%s2343_s5 + $0x8] sm:$0xff]   ;;  %v1642_v38 = vld [vmem:[%s2343_s5 + $0x18] sm:$0xff]   ;;  %v1643_v39 = vld [vmem:[%s2343_s5 + $0x20] sm:$0xff]  }
   0x6   :  { %v1644_v40 = vld [vmem:[%s2343_s5 + $0x28] sm:$0xff]   ;;  %v419_v0 = vld [vmem:[%s2342_s6] sm:$0xff] }
   0x7   :  { %1520 = vmatmul.mubr.msk.bf16.vlgmr.msra.gmra.mxu0 %vm91_vm0, %v1637_v3  ;;  %68 = vperm.xlu0 %1632, %v50_v7   ;;  %v469_v3 = vld [vmem:[%s2344_s8 + $0x10] sm:$0xff]  ;;  %v420_v4 = vld [vmem:[%s2342_s6 + $0x8] sm:$0xff]  ;;  %v467_v5 = vld [vmem:[%s2344_s8] sm:$0xff] }
   0x8   :  { %140 = vmatprep.mubr.bf16.mxu0 %v1664_v1  ;;  %58 = vperm.xlu1 %1633, %v48_v6   ;;  %v470_v6 = vld [vmem:[%s2344_s8 + $0x18] sm:$0xff]  ;;  %v1564_v7 = vld [vmem:[%s2342_s6 + $0x30] sm:$0xff] }
   0xb   :  { %435 = vperm.xlu0 %1632, %v421_v8   ;;  %v468_v8 = vld [vmem:[%s2344_s8 + $0x8] sm:$0xff] }
   0xc   :  { %440 = vperm.xlu1 %1633, %v422_v9   ;;  %v1565_v9 = vld [vmem:[%s2342_s6 + $0x38] sm:$0xff] }
   0xf   :  { %1521 = vmatmul.mubr.msk.bf16.gmra.mxu0 %vm91_vm0, %v1638_v10 }
  0x10   :  { %539 = vmatprep.mubr.bf16.mxu0 %v1664_v1 }
  0x7e   :  { %v64_v15 = vpop.permute.xlu0 %63 }
  0x7f   :  { %v54_v16 = vpop.permute.xlu1 %53 }
  0x82   :  { %v69_v20 = vpop.permute.xlu0 %68 }
  0x83   :  { %v59_v21 = vpop.permute.xlu1 %58 }
  0x86   :  { %v1864_v10 = vpop.permute.xlu0 %435 }
  0xc7   :  { %v132_v11 = vpop.f32.mrf.mxu0 }
  0xc8   :  { %v1790_v33 = vadd.f32 %v132_v11, %v54_v16  ;;  %v1866_v11 = vpop.permute.xlu1 %440 }
  0xc9   :  { %v134_v12 = vpop.f32.mrf.mxu0 }
  0xca   :  { %v1780_v28 = vadd.f32 %v134_v12, %v54_v16 }
  0xcb   :  { %v136_v13 = vpop.f32.mrf.mxu0 }
  0xcc   :  { %v1784_v30 = vadd.f32 %v136_v13, %v59_v21 }
  0xcd   :  { %v138_v14 = vpop.f32.mrf.mxu0 }
  0xce   :  { %v1772_v24 = vadd.f32 %v138_v14, %v59_v21  ;;  %v151_v34 = vpack.c.bf16 %v1784_v30, %v1790_v33 }
  0xcf   :  { %v142_v17 = vpop.f32.mrf.mxu0 }
  0xd0   :  { %v1778_v27 = vadd.f32 %v142_v17, %v64_v15  ;;  %v152_v32 = vpack.c.bf16 %v1772_v24, %v1780_v28 }
  0xd1   :  { %v144_v18 = vpop.f32.mrf.mxu0 }
  0xd2   :  { %v1774_v25 = vadd.f32 %v144_v18, %v64_v15  ;;  %v329_v18 = vlaneseq }
  0xd3   :  { %v146_v19 = vpop.f32.mrf.mxu0 }
  0xd4   :  { %v1770_v22 = vadd.f32 %v146_v19, %v69_v20  ;;  %v342_v21 = vshrl.u32 %v329_v18, 7 }
  0xd5   :  { %v148_v23 = vpop.f32.mrf.mxu0 }
  0xd6   :  { %v1776_v26 = vadd.f32 %v148_v23, %v69_v20  ;;  %v153_v31 = vpack.c.bf16 %v1770_v22, %v1778_v27  ;;  %v1871_v20 = vld [vmem:[%s2346_s2] sm:$0x3] }
  0xd7   :  { %vm309_vm2 = vcmp.ge.s32.totalorder %v1871_v20, 1  ;;  %vm311_vm4 = vcmp.lt.s32.totalorder %v1871_v20, 127  ;;  %vm745_vm6 = vcmp.ge.s32.totalorder %v1871_v20, 2  ;;  %vm747_vm8 = vcmp.lt.s32.totalorder %v1871_v20, 126 }
  0xd8   :  { %v154_v29 = vpack.c.bf16 %v1776_v26, %v1774_v25  ;;  %vm1171_vm10 = vcmp.ge.s32.totalorder %v1871_v20, 3  ;;  %vm1173_vm12 = vcmp.lt.s32.totalorder %v1871_v20, 125 }
  0xda   :  { %228 = vmatprep.subr.bf16.mxu1 %v154_v29 }
  0xdb   :  { %229 = vmatpush1.bf16.msra.mxu1 %v153_v31  ;;  %v1874_v31 = vand.u32 127, %v329_v18 }
  0xdc   :  { %230 = vmatprep.subr.bf16.mxu1 %v152_v32  ;;  %v1876_v32 = vsub.s32 0, %v342_v21 }
  0xdd   :  { %vm331_vm3 = vcmp.lt.s32.totalorder %v1874_v31, 1  ;;  %vm383_vm5 = vcmp.lt.s32.totalorder %v1874_v31, 127  ;;  %vm765_vm7 = vcmp.lt.s32.totalorder %v1874_v31, 2  ;;  %vm817_vm9 = vcmp.lt.s32.totalorder %v1874_v31, 126 }
  0xde   :  { %vm1191_vm11 = vcmp.lt.s32.totalorder %v1874_v31, 3  ;;  %vm1243_vm13 = vcmp.lt.s32.totalorder %v1874_v31, 125 }
  0xdf   :  { %231 = vmatpush1.bf16.msra.mxu1 %v151_v34  ;;  %v1878_v34 = vsub.s32 1, %v342_v21 }
  0xe2   :  { %1528 = vmatmul.mubr.msk.bf16.vlgmr.msra.gmra.mxu1 %vm197_vm1, %v1639_v35  ;;  %v1667_v35 = vmov 0.0  }
  0xe3   :  { %258 = vmatprep.mubr.bf16.mxu1 %v1664_v1 }
  0xea   :  { %1529 = vmatmul.mubr.msk.bf16.gmra.mxu1 %vm197_vm1, %v1640_v36  ;;  %v310_v36 = vsel %vm309_vm2, 1.0, %v1667_v35 }
  0xeb   :  { %268 = vmatprep.mubr.bf16.mxu1 %v1664_v1 }
  0xf2   :  { %1530 = vmatmul.mubr.msk.bf16.gmra.mxu1 %vm197_vm1, %v1641_v37 }
  0xf3   :  { %278 = vmatprep.mubr.bf16.mxu1 %v1664_v1 }
  0xfa   :  { %1531 = vmatmul.mubr.msk.bf16.gmra.mxu1 %vm197_vm1, %v1642_v38 }
  0xfb   :  { %288 = vmatprep.mubr.bf16.mxu1 %v1664_v1 }
 0x102   :  { %1532 = vmatmul.mubr.msk.bf16.gmra.mxu1 %vm197_vm1, %v1643_v39 }
 0x103   :  { %298 = vmatprep.mubr.bf16.mxu1 %v1664_v1 }
 0x10a   :  { %1533 = vmatmul.mubr.msk.bf16.gmra.mxu1 %vm197_vm1, %v1644_v40 }
 0x10b   :  { %986 = vmatprep.mubr.bf16.mxu1 %v1664_v1 }
 0x1a2   :  { %v250_v41 = vpop.f32.mrf.mxu1 }
 0x1a3   :  { %313 = vrot.lane.b32.xlu0 %v250_v41, %s1665_s0  ;;  %v344_v41 = vrot.slane %v310_v36, %v1876_v32 }
 0x1a4   :  { %v252_v42 = vpop.f32.mrf.mxu1 }
 0x1a6   :  { %v254_v43 = vpop.f32.mrf.mxu1 }
 0x1a7   :  { %321 = vrot.lane.b32.xlu0 %v252_v42, %s1665_s0  ;;  %315 = vrot.lane.b32.xlu1 %v254_v43, %s1665_s0  ;;  %v348_v42 = vrot.slane %v310_v36, %v1878_v34 }
 0x1a8   :  { %v256_v44 = vpop.f32.mrf.mxu1 }
 0x1aa   :  { %v260_v45 = vpop.f32.mrf.mxu1 }
 0x1ab   :  { %323 = vrot.lane.b32.xlu1 %v256_v44, %s1665_s0  ;;  %317 = vrot.lane.b32.xlu0 %v260_v45, %s1665_s0 }
 0x1ac   :  { %v262_v46 = vpop.f32.mrf.mxu1 }
 0x1ae   :  { %v264_v47 = vpop.f32.mrf.mxu1 }
 0x1af   :  { %325 = vrot.lane.b32.xlu0 %v262_v46, %s1665_s0  ;;  %319 = vrot.lane.b32.xlu1 %v264_v47, %s1665_s0  ;;  %v312_v47 = vsel %vm311_vm4, 1.0, %v1667_v35 }
 0x1b0   :  { %v266_v48 = vpop.f32.mrf.mxu1 }
 0x1b2   :  { %v1824_v49 = vpop.f32.mrf.mxu1 }
 0x1b3   :  { %327 = vrot.lane.b32.xlu1 %v266_v48, %s1665_s0 }
 0x1b4   :  { %v1826_v50 = vpop.f32.mrf.mxu1 }
 0x1b6   :  { %v1828_v51 = vpop.f32.mrf.mxu1 }
 0x1b8   :  { %v1830_v52 = vpop.f32.mrf.mxu1 }
 0x1ba   :  { %v1832_v53 = vpop.f32.mrf.mxu1 }
 0x1bc   :  { %v1834_v54 = vpop.f32.mrf.mxu1 }
 0x1be   :  { %v1836_v55 = vpop.f32.mrf.mxu1 }
 0x1c0   :  { %v1838_v56 = vpop.f32.mrf.mxu1 }
 0x1c2   :  { %v290_v57 = vpop.f32.mrf.mxu1 }
 0x1c3   :  { %367 = vrot.lane.b32.xlu0 %v290_v57, %s1666_s27 }
 0x1c4   :  { %v292_v58 = vpop.f32.mrf.mxu1 }
 0x1c6   :  { %v294_v59 = vpop.f32.mrf.mxu1 }
 0x1c7   :  { %375 = vrot.lane.b32.xlu0 %v292_v58, %s1666_s27  ;;  %369 = vrot.lane.b32.xlu1 %v294_v59, %s1666_s27 }
 0x1c8   :  { %v296_v60 = vpop.f32.mrf.mxu1 }
 0x1ca   :  { %v300_v61 = vpop.f32.mrf.mxu1 }
 0x1cb   :  { %377 = vrot.lane.b32.xlu1 %v296_v60, %s1666_s27  ;;  %371 = vrot.lane.b32.xlu0 %v300_v61, %s1666_s27  ;;  %v396_v60 = vrot.slane %v312_v47, %v1876_v32  ;;  %v400_v61 = vrot.slane %v312_v47, %v1878_v34 }
 0x1cc   :  { %v302_v62 = vpop.f32.mrf.mxu1 }
 0x1ce   :  { %v304_v63 = vpop.f32.mrf.mxu1 }
 0x1cf   :  { %379 = vrot.lane.b32.xlu0 %v302_v62, %s1666_s27  ;;  %373 = vrot.lane.b32.xlu1 %v304_v63, %s1666_s27 }
 0x1d0   :  { %v306_v2 = vpop.f32.mrf.mxu1 }
 0x1d3   :  { %425 = vperm.xlu0 %1632, %v419_v0   ;;  %381 = vrot.lane.b32.xlu1 %v306_v2, %s1666_s27  ;;  %s1670_s27 = smov 3  }
 0x1d7   :  { %483 = vperm.xlu0 %1632, %v469_v3   ;;  %430 = vperm.xlu1 %1633, %v420_v4  }
 0x1db   :  { %473 = vperm.xlu0 %1632, %v467_v5   ;;  %488 = vperm.xlu1 %1633, %v470_v6  }
 0x1df   :  { %870 = vperm.xlu0 %1632, %v1564_v7   ;;  %478 = vperm.xlu1 %1633, %v468_v8  }
 0x1e3   :  { %875 = vperm.xlu1 %1633, %v1565_v9  }
 0x215   :  { %v314_v12 = vpop.permute.xlu0 %313 }
 0x219   :  { %v316_v13 = vpop.permute.xlu1 %315  ;;  %v322_v14 = vpop.permute.xlu0 %321 }
 0x21a   :  { %v332_v58 = vsel %vm331_vm3, %v314_v12, %v322_v14  ;;  %v336_v59 = vsel %vm331_vm3, %v322_v14, %v314_v12 }
 0x21b   :  { %v351_v9 = vmul.f32 %v344_v41, %v336_v59  ;;  %v352_v12 = vmul.f32 %v348_v42, %v332_v58 }
 0x21d   :  { %v324_v15 = vpop.permute.xlu1 %323  ;;  %v318_v16 = vpop.permute.xlu0 %317 }
 0x221   :  { %v320_v17 = vpop.permute.xlu1 %319  ;;  %v326_v19 = vpop.permute.xlu0 %325 }
 0x222   :  { %v334_v39 = vsel %vm331_vm3, %v318_v16, %v326_v19  ;;  %v338_v40 = vsel %vm331_vm3, %v326_v19, %v318_v16 }
 0x223   :  { %v355_v45 = vmul.f32 %v344_v41, %v338_v40  ;;  %v356_v46 = vmul.f32 %v348_v42, %v334_v39 }
 0x225   :  { %v328_v23 = vpop.permute.xlu1 %327  ;;  %v363_v0 = vadd.f32 %v355_v45, %v1832_v53  ;;  %v364_v2 = vadd.f32 %v356_v46, %v1834_v54  ;;  %v333_v53 = vsel %vm331_vm3, %v316_v13, %v324_v15  ;;  %v337_v54 = vsel %vm331_vm3, %v324_v15, %v316_v13 }
 0x226   :  { %v335_v48 = vsel %vm331_vm3, %v320_v17, %v328_v23  ;;  %v339_v57 = vsel %vm331_vm3, %v328_v23, %v320_v17  ;;  %v353_v47 = vmul.f32 %v344_v41, %v337_v54  ;;  %v1646_v54 = vld [vmem:[%s2345_s7 + $0x8] sm:$0xff]  }
 0x227   :  { %v357_v5 = vmul.f32 %v344_v41, %v339_v57  ;;  %v358_v6 = vmul.f32 %v348_v42, %v335_v48  ;;  %v354_v48 = vmul.f32 %v348_v42, %v333_v53  ;;  %v1645_v53 = vld [vmem:[%s2345_s7] sm:$0xff]  }
 0x229   :  { %v365_v21 = vadd.f32 %v357_v5, %v1836_v55  ;;  %v366_v23 = vadd.f32 %v358_v6, %v1838_v56  ;;  %v362_v41 = vadd.f32 %v354_v48, %v1830_v52 }
 0x235   :  { %v368_v29 = vpop.permute.xlu0 %367 }
 0x239   :  { %v376_v37 = vpop.permute.xlu0 %375  ;;  %v370_v38 = vpop.permute.xlu1 %369 }
 0x23a   :  { %v384_v40 = vsel %vm383_vm5, %v368_v29, %v376_v37 }
 0x23b   :  { %v403_v57 = vmul.f32 %v396_v60, %v384_v40 }
 0x23d   :  { %v378_v43 = vpop.permute.xlu1 %377  ;;  %v372_v44 = vpop.permute.xlu0 %371 }
 0x23e   :  { %v385_v13 = vsel %vm383_vm5, %v370_v38, %v378_v43  ;;  %v389_v15 = vsel %vm383_vm5, %v378_v43, %v370_v38 }
 0x23f   :  { %v406_v38 = vmul.f32 %v400_v61, %v389_v15 }
 0x241   :  { %v380_v62 = vpop.permute.xlu0 %379  ;;  %v374_v63 = vpop.permute.xlu1 %373 }
 0x242   :  { %v386_v3 = vsel %vm383_vm5, %v372_v44, %v380_v62  ;;  %v390_v4 = vsel %vm383_vm5, %v380_v62, %v372_v44  ;;  %v388_v44 = vsel %vm383_vm5, %v376_v37, %v368_v29  ;;  %v359_v37 = vadd.f32 %v351_v9, %v1824_v49 }
 0x243   :  { %v407_v7 = vmul.f32 %v396_v60, %v386_v3  ;;  %v408_v8 = vmul.f32 %v400_v61, %v390_v4  ;;  %v404_v58 = vmul.f32 %v400_v61, %v388_v44  ;;  %v360_v62 = vadd.f32 %v352_v12, %v1826_v50 }
 0x244   :  { %v411_v4 = vadd.f32 %v403_v57, %v359_v37  ;;  %v414_v50 = vadd.f32 %v406_v38, %v362_v41 }
 0x245   :  { %v415_v14 = vadd.f32 %v407_v7, %v363_v0  ;;  %v416_v16 = vadd.f32 %v408_v8, %v364_v2  ;;  %v382_v17 = vpop.permute.xlu1 %381  ;;  %v412_v5 = vadd.f32 %v404_v58, %v360_v62 }
 0x246   :  { %v387_v18 = vsel %vm383_vm5, %v374_v63, %v382_v17  ;;  %v391_v19 = vsel %vm383_vm5, %v382_v17, %v374_v63  ;;  %v405_v63 = vmul.f32 %v396_v60, %v385_v13 }
 0x247   :  { %v409_v36 = vmul.f32 %v396_v60, %v387_v18  ;;  %v410_v39 = vmul.f32 %v400_v61, %v391_v19  ;;  %v447_v45 = vadd.f32 %v1864_v10, %v415_v14  ;;  %v448_v56 = vadd.f32 %v1864_v10, %v416_v16 }
 0x248   :  { %v361_v10 = vadd.f32 %v353_v47, %v1828_v51  ;;  %v41_v47 = vld [vmem:[%s2347_s1] sm:$0x3] }
 0x249   :  { %v417_v46 = vadd.f32 %v409_v36, %v365_v21  ;;  %v418_v55 = vadd.f32 %v410_v39, %v366_v23  ;;  %v455_v43 = vmax.f32 %v447_v45, 0.0  ;;  %v456_v2 = vmax.f32 %v448_v56, 0.0 }
 0x24a   :  { %v413_v49 = vadd.f32 %v405_v63, %v361_v10 }
 0x24b   :  { %v449_v59 = vadd.f32 %v1866_v11, %v417_v46  ;;  %v450_v29 = vadd.f32 %v1866_v11, %v418_v55 }
 0x24d   :  { %v457_v0 = vmax.f32 %v449_v59, 0.0  ;;  %v458_v3 = vmax.f32 %v450_v29, 0.0 }
 0x24e   :  { %v426_v42 = vpop.permute.xlu0 %425 }
 0x24f   :  { %v466_v6 = vpack.c.bf16 %v458_v3, %v456_v2  ;;  %v465_v7 = vpack.c.bf16 %v457_v0, %v455_v43  ;;  %v443_v11 = vadd.f32 %v426_v42, %v411_v4  ;;  %v444_v8 = vadd.f32 %v426_v42, %v412_v5 }
 0x250   :  { %v1950_v43 = vrot.slane %v41_v47, %v1876_v32  ;;  %v1955_v3 = vrot.slane %v41_v47, %v1878_v34  ;;  %v1562_v47 = vld [vmem:[%s2342_s6 + $0x20] sm:$0xff] }
 0x251   :  { %519 = vmatprep.subr.bf16.mxu0 %v466_v6  ;;  %v451_v12 = vmax.f32 %v443_v11, 0.0  ;;  %v452_v14 = vmax.f32 %v444_v8, 0.0  ;;  %v1647_v11 = vld [vmem:[%s2343_s5 + $0x30] sm:$0xff]   ;;  %v1648_v8 = vld [vmem:[%s2343_s5 + $0x38] sm:$0xff]  }
 0x252   :  { %520 = vmatpush1.bf16.msra.mxu0 %v465_v7  ;;  %v431_v60 = vpop.permute.xlu1 %430  ;;  %v484_v36 = vpop.permute.xlu0 %483 }
 0x253   :  { %v445_v61 = vadd.f32 %v431_v60, %v413_v49  ;;  %v446_v9 = vadd.f32 %v431_v60, %v414_v50  ;;  %v1649_v49 = vld [vmem:[%s2343_s5 + $0x40] sm:$0xff]   ;;  %v1650_v50 = vld [vmem:[%s2343_s5 + $0x48] sm:$0xff]   ;;  %v1651_v60 = vld [vmem:[%s2343_s5 + $0x50] sm:$0xff]  }
 0x255   :  { %v453_v16 = vmax.f32 %v445_v61, 0.0  ;;  %v454_v51 = vmax.f32 %v446_v9, 0.0  ;;  %v1652_v61 = vld [vmem:[%s2343_s5 + $0x58] sm:$0xff]  }
 0x256   :  { %v489_v21 = vpop.permute.xlu1 %488  ;;  %v474_v46 = vpop.permute.xlu0 %473 }
 0x257   :  { %v463_v17 = vpack.c.bf16 %v453_v16, %v451_v12  ;;  %v464_v52 = vpack.c.bf16 %v454_v51, %v452_v14 }
 0x259   :  { %521 = vmatprep.subr.bf16.mxu0 %v464_v52 }
 0x25a   :  { %522 = vmatpush1.bf16.msra.mxu0 %v463_v17  ;;  %v479_v44 = vpop.permute.xlu1 %478 }
 0x25d   :  { %1536 = vmatmul.mubr.msk.bf16.vlgmr.msra.gmra.mxu0 %vm197_vm1, %v1645_v53 }
 0x25e   :  { %549 = vmatprep.mubr.bf16.mxu0 %v1664_v1 }
 0x265   :  { %1537 = vmatmul.mubr.msk.bf16.gmra.mxu0 %vm197_vm1, %v1646_v54 }
 0x266   :  { %684 = vmatprep.mubr.bf16.mxu0 %v1664_v1 }
 0x31d   :  { %v541_v18 = vpop.f32.mrf.mxu0 }
 0x31e   :  { %v542_v38 = vadd.f32 %v541_v18, %v474_v46 }
 0x31f   :  { %v543_v19 = vpop.f32.mrf.mxu0 }
 0x320   :  { %v544_v48 = vadd.f32 %v543_v19, %v474_v46 }
 0x321   :  { %v545_v23 = vpop.f32.mrf.mxu0 }
 0x322   :  { %v546_v58 = vadd.f32 %v545_v23, %v479_v44  ;;  %v561_v2 = vadd.f32 %v544_v48, %v1780_v28  ;;  %v560_v28 = vadd.f32 %v542_v38, %v1790_v33  ;;  %v2062_v38 = vpop.permute.xlu0 %870 }
 0x323   :  { %v547_v39 = vpop.f32.mrf.mxu0 }
 0x324   :  { %v548_v15 = vadd.f32 %v547_v39, %v479_v44  ;;  %v1988_v33 = vmul.f32 %v1950_v43, %v560_v28 }
 0x325   :  { %v551_v40 = vpop.f32.mrf.mxu0 }
 0x326   :  { %v552_v55 = vadd.f32 %v551_v40, %v484_v36  ;;  %v563_v29 = vadd.f32 %v548_v15, %v1772_v24  ;;  %v562_v24 = vadd.f32 %v546_v58, %v1784_v30  ;;  %v1563_v58 = vld [vmem:[%s2342_s6 + $0x28] sm:$0xff] }
 0x327   :  { %v553_v13 = vpop.f32.mrf.mxu0 }
 0x328   :  { %v554_v45 = vadd.f32 %v553_v13, %v484_v36  ;;  %v564_v0 = vadd.f32 %v552_v55, %v1778_v27  ;;  %v1981_v4 = vmul.f32 %v1950_v43, %v562_v24 }
 0x329   :  { %v555_v56 = vpop.f32.mrf.mxu0 }
 0x32a   :  { %v556_v57 = vadd.f32 %v555_v56, %v489_v21  ;;  %v565_v37 = vadd.f32 %v554_v45, %v1774_v25  ;;  %v1973_v42 = vmul.f32 %v1950_v43, %v564_v0  ;;  %v587_v7 = vpack.c.bf16 %v1981_v4, %v1988_v33  ;;  %v2064_v0 = vpop.permute.xlu1 %875 }
 0x32b   :  { %v557_v59 = vpop.f32.mrf.mxu0 }
 0x32c   :  { %v566_v62 = vadd.f32 %v556_v57, %v1770_v22  ;;  %v558_v63 = vadd.f32 %v557_v59, %v489_v21  ;;  %v1963_v22 = vmul.f32 %v1955_v3, %v563_v29  ;;  %v1966_v41 = vmul.f32 %v1955_v3, %v565_v37  ;;  %v1572_v57 = vld [vmem:[%s2344_s8 + $0x30] sm:$0xff]  ;;  %v1570_v59 = vld [vmem:[%s2344_s8 + $0x20] sm:$0xff]  ;;  %v1573_v29 = vld [vmem:[%s2344_s8 + $0x38] sm:$0xff] }
 0x32d   :  { %v1604_v37 = vld [vmem:[%s2342_s6 + $0x50] sm:$0xff] }
 0x32e   :  { %v567_v10 = vadd.f32 %v558_v63, %v1776_v26  ;;  %v1960_v25 = vmul.f32 %v1950_v43, %v566_v62  ;;  %v1976_v26 = vmul.f32 %v1955_v3, %v561_v2  ;;  %v1571_v62 = vld [vmem:[%s2344_s8 + $0x28] sm:$0xff]  ;;  %v1605_v63 = vld [vmem:[%s2342_s6 + $0x58] sm:$0xff] }
 0x330   :  { %v1969_v27 = vmul.f32 %v1955_v3, %v567_v10  ;;  %v589_v5 = vpack.c.bf16 %v1960_v25, %v1973_v42  ;;  %v588_v6 = vpack.c.bf16 %v1963_v22, %v1976_v26 }
 0x332   :  { %v590_v30 = vpack.c.bf16 %v1969_v27, %v1966_v41 }
 0x334   :  { %664 = vmatprep.subr.bf16.mxu0 %v590_v30 }
 0x335   :  { %665 = vmatpush1.bf16.msra.mxu0 %v589_v5 }
 0x336   :  { %666 = vmatprep.subr.bf16.mxu0 %v588_v6 }
 0x339   :  { %667 = vmatpush1.bf16.msra.mxu0 %v587_v7 }
 0x33c   :  { %1556 = vmatmul.mubr.msk.bf16.vlgmr.msra.gmra.mxu0 %vm197_vm1, %v1647_v11 }
 0x33d   :  { %694 = vmatprep.mubr.bf16.mxu0 %v1664_v1 }
 0x344   :  { %1557 = vmatmul.mubr.msk.bf16.gmra.mxu0 %vm197_vm1, %v1648_v8  ;;  %v746_v8 = vsel %vm745_vm6, 1.0, %v1667_v35 }
 0x345   :  { %704 = vmatprep.mubr.bf16.mxu0 %v1664_v1 }
 0x34c   :  { %1558 = vmatmul.mubr.msk.bf16.gmra.mxu0 %vm197_vm1, %v1649_v49 }
 0x34d   :  { %714 = vmatprep.mubr.bf16.mxu0 %v1664_v1 }
 0x354   :  { %1559 = vmatmul.mubr.msk.bf16.gmra.mxu0 %vm197_vm1, %v1650_v50 }
 0x355   :  { %724 = vmatprep.mubr.bf16.mxu0 %v1664_v1 }
 0x35c   :  { %1560 = vmatmul.mubr.msk.bf16.gmra.mxu0 %vm197_vm1, %v1651_v60 }
 0x35d   :  { %734 = vmatprep.mubr.bf16.mxu0 %v1664_v1 }
 0x364   :  { %1561 = vmatmul.mubr.msk.bf16.gmra.mxu0 %vm197_vm1, %v1652_v61 }
 0x365   :  { %976 = vmatprep.mubr.bf16.mxu0 %v1664_v1 }
 0x3fc   :  { %v686_v9 = vpop.f32.mrf.mxu0 }
 0x3fd   :  { %749 = vrot.lane.b32.xlu0 %v686_v9, %s1668_s19  ;;  %v778_v9 = vrot.slane %v746_v8, %v1876_v32 }
 0x3fe   :  { %v688_v12 = vpop.f32.mrf.mxu0 }
 0x400   :  { %v690_v14 = vpop.f32.mrf.mxu0 }
 0x401   :  { %757 = vrot.lane.b32.xlu0 %v688_v12, %s1668_s19  ;;  %751 = vrot.lane.b32.xlu1 %v690_v14, %s1668_s19  ;;  %v782_v12 = vrot.slane %v746_v8, %v1878_v34 }
 0x402   :  { %v692_v16 = vpop.f32.mrf.mxu0 }
 0x404   :  { %v696_v51 = vpop.f32.mrf.mxu0 }
 0x405   :  { %759 = vrot.lane.b32.xlu1 %v692_v16, %s1668_s19  ;;  %753 = vrot.lane.b32.xlu0 %v696_v51, %s1668_s19 }
 0x406   :  { %v698_v17 = vpop.f32.mrf.mxu0 }
 0x408   :  { %v700_v52 = vpop.f32.mrf.mxu0 }
 0x409   :  { %761 = vrot.lane.b32.xlu0 %v698_v17, %s1668_s19  ;;  %755 = vrot.lane.b32.xlu1 %v700_v52, %s1668_s19  ;;  %v748_v52 = vsel %vm747_vm8, 1.0, %v1667_v35 }
 0x40a   :  { %v702_v53 = vpop.f32.mrf.mxu0 }
 0x40c   :  { %v2022_v54 = vpop.f32.mrf.mxu0 }
 0x40d   :  { %763 = vrot.lane.b32.xlu1 %v702_v53, %s1668_s19 }
 0x40e   :  { %v2024_v18 = vpop.f32.mrf.mxu0 }
 0x410   :  { %v2026_v19 = vpop.f32.mrf.mxu0 }
 0x412   :  { %v2028_v21 = vpop.f32.mrf.mxu0 }
 0x414   :  { %v2030_v23 = vpop.f32.mrf.mxu0 }
 0x416   :  { %v2032_v36 = vpop.f32.mrf.mxu0 }
 0x418   :  { %v2034_v39 = vpop.f32.mrf.mxu0 }
 0x41a   :  { %v2036_v40 = vpop.f32.mrf.mxu0 }
 0x41c   :  { %v726_v44 = vpop.f32.mrf.mxu0 }
 0x41d   :  { %801 = vrot.lane.b32.xlu0 %v726_v44, %s1669_s20 }
 0x41e   :  { %v728_v13 = vpop.f32.mrf.mxu0 }
 0x420   :  { %v730_v15 = vpop.f32.mrf.mxu0 }
 0x421   :  { %809 = vrot.lane.b32.xlu0 %v728_v13, %s1669_s20  ;;  %803 = vrot.lane.b32.xlu1 %v730_v15, %s1669_s20 }
 0x422   :  { %v732_v45 = vpop.f32.mrf.mxu0 }
 0x424   :  { %v736_v46 = vpop.f32.mrf.mxu0 }
 0x425   :  { %811 = vrot.lane.b32.xlu1 %v732_v45, %s1669_s20  ;;  %805 = vrot.lane.b32.xlu0 %v736_v46, %s1669_s20  ;;  %v830_v45 = vrot.slane %v748_v52, %v1876_v32  ;;  %v834_v46 = vrot.slane %v748_v52, %v1878_v34 }
 0x426   :  { %v738_v55 = vpop.f32.mrf.mxu0 }
 0x428   :  { %v740_v56 = vpop.f32.mrf.mxu0 }
 0x429   :  { %813 = vrot.lane.b32.xlu0 %v738_v55, %s1669_s20  ;;  %807 = vrot.lane.b32.xlu1 %v740_v56, %s1669_s20 }
 0x42a   :  { %v742_v48 = vpop.f32.mrf.mxu0 }
 0x42d   :  { %860 = vperm.xlu0 %1632, %v1562_v47   ;;  %815 = vrot.lane.b32.xlu1 %v742_v48, %s1669_s20 }
 0x431   :  { %920 = vperm.xlu0 %1632, %v1572_v57   ;;  %865 = vperm.xlu1 %1633, %v1563_v58  }
 0x435   :  { %910 = vperm.xlu0 %1632, %v1570_v59   ;;  %925 = vperm.xlu1 %1633, %v1573_v29  }
 0x439   :  { %1296 = vperm.xlu0 %1632, %v1604_v37   ;;  %915 = vperm.xlu1 %1633, %v1571_v62  }
 0x43d   :  { %1301 = vperm.xlu1 %1633, %v1605_v63  }
 0x46f   :  { %v750_v2 = vpop.permute.xlu0 %749 }
 0x473   :  { %v752_v10 = vpop.permute.xlu1 %751  ;;  %v758_v24 = vpop.permute.xlu0 %757 }
 0x474   :  { %v766_v13 = vsel %vm765_vm7, %v750_v2, %v758_v24  ;;  %v770_v15 = vsel %vm765_vm7, %v758_v24, %v750_v2 }
 0x475   :  { %v785_v63 = vmul.f32 %v778_v9, %v770_v15  ;;  %v786_v2 = vmul.f32 %v782_v12, %v766_v13 }
 0x477   :  { %v760_v28 = vpop.permute.xlu1 %759  ;;  %v754_v30 = vpop.permute.xlu0 %753 }
 0x47b   :  { %v756_v5 = vpop.permute.xlu1 %755  ;;  %v762_v6 = vpop.permute.xlu0 %761 }
 0x47c   :  { %v768_v60 = vsel %vm765_vm7, %v754_v30, %v762_v6  ;;  %v772_v61 = vsel %vm765_vm7, %v762_v6, %v754_v30 }
 0x47d   :  { %v789_v51 = vmul.f32 %v778_v9, %v772_v61  ;;  %v790_v17 = vmul.f32 %v782_v12, %v768_v60 }
 0x47f   :  { %v764_v7 = vpop.permute.xlu1 %763  ;;  %v797_v47 = vadd.f32 %v789_v51, %v2030_v23  ;;  %v798_v48 = vadd.f32 %v790_v17, %v2032_v36  ;;  %v767_v23 = vsel %vm765_vm7, %v752_v10, %v760_v28  ;;  %v771_v36 = vsel %vm765_vm7, %v760_v28, %v752_v10 }
 0x480   :  { %v769_v53 = vsel %vm765_vm7, %v756_v5, %v764_v7  ;;  %v773_v44 = vsel %vm765_vm7, %v764_v7, %v756_v5  ;;  %v788_v13 = vmul.f32 %v782_v12, %v767_v23 }
 0x481   :  { %v791_v59 = vmul.f32 %v778_v9, %v773_v44  ;;  %v792_v29 = vmul.f32 %v782_v12, %v769_v53  ;;  %v787_v44 = vmul.f32 %v778_v9, %v771_v36 }
 0x482   :  { %v796_v9 = vadd.f32 %v788_v13, %v2028_v21 }
 0x483   :  { %v799_v8 = vadd.f32 %v791_v59, %v2034_v39  ;;  %v800_v60 = vadd.f32 %v792_v29, %v2036_v40 }
 0x48f   :  { %v802_v11 = vpop.permute.xlu0 %801 }
 0x493   :  { %v810_v49 = vpop.permute.xlu0 %809  ;;  %v804_v50 = vpop.permute.xlu1 %803 }
 0x494   :  { %v818_v51 = vsel %vm817_vm9, %v802_v11, %v810_v49  ;;  %v822_v17 = vsel %vm817_vm9, %v810_v49, %v802_v11  ;;  %v793_v49 = vadd.f32 %v785_v63, %v2022_v54 }
 0x495   :  { %v837_v15 = vmul.f32 %v830_v45, %v818_v51 }
 0x497   :  { %v806_v14 = vpop.permute.xlu0 %805  ;;  %v812_v16 = vpop.permute.xlu1 %811  ;;  %v845_v29 = vadd.f32 %v837_v15, %v793_v49 }
 0x498   :  { %v819_v10 = vsel %vm817_vm9, %v804_v50, %v812_v16  ;;  %v823_v28 = vsel %vm817_vm9, %v812_v16, %v804_v50 }
 0x499   :  { %v840_v50 = vmul.f32 %v834_v46, %v823_v28 }
 0x49b   :  { %v814_v55 = vpop.permute.xlu0 %813  ;;  %v808_v56 = vpop.permute.xlu1 %807 }
 0x49c   :  { %v820_v57 = vsel %vm817_vm9, %v806_v14, %v814_v55  ;;  %v824_v58 = vsel %vm817_vm9, %v814_v55, %v806_v14  ;;  %v838_v55 = vmul.f32 %v834_v46, %v822_v17 }
 0x49d   :  { %v841_v37 = vmul.f32 %v830_v45, %v820_v57  ;;  %v842_v62 = vmul.f32 %v834_v46, %v824_v58 }
 0x49f   :  { %v849_v24 = vadd.f32 %v841_v37, %v797_v47  ;;  %v850_v30 = vadd.f32 %v842_v62, %v798_v48  ;;  %v816_v5 = vpop.permute.xlu1 %815  ;;  %v794_v47 = vadd.f32 %v786_v2, %v2024_v18  ;;  %v839_v48 = vmul.f32 %v830_v45, %v819_v10 }
 0x4a0   :  { %v821_v6 = vsel %vm817_vm9, %v808_v56, %v816_v5  ;;  %v825_v7 = vsel %vm817_vm9, %v816_v5, %v808_v56  ;;  %v848_v18 = vadd.f32 %v840_v50, %v796_v9 }
 0x4a1   :  { %v843_v61 = vmul.f32 %v830_v45, %v821_v6  ;;  %v844_v14 = vmul.f32 %v834_v46, %v825_v7  ;;  %v882_v52 = vadd.f32 %v2062_v38, %v849_v24  ;;  %v883_v40 = vadd.f32 %v2062_v38, %v850_v30  ;;  %v1653_v6 = vld [vmem:[%s2345_s7 + $0x10] sm:$0xff]   ;;  %v1654_v7 = vld [vmem:[%s2345_s7 + $0x18] sm:$0xff]  }
 0x4a2   :  { %v795_v38 = vadd.f32 %v787_v44, %v2026_v19  ;;  %v846_v37 = vadd.f32 %v838_v55, %v794_v47 }
 0x4a3   :  { %v851_v53 = vadd.f32 %v843_v61, %v799_v8  ;;  %v852_v39 = vadd.f32 %v844_v14, %v800_v60  ;;  %v890_v16 = vmax.f32 %v882_v52, 0.0  ;;  %v891_v58 = vmax.f32 %v883_v40, 0.0 }
 0x4a5   :  { %v884_v56 = vadd.f32 %v2064_v0, %v851_v53  ;;  %v885_v11 = vadd.f32 %v2064_v0, %v852_v39  ;;  %v847_v0 = vadd.f32 %v839_v48, %v795_v38 }
 0x4a7   :  { %v892_v57 = vmax.f32 %v884_v56, 0.0  ;;  %v893_v59 = vmax.f32 %v885_v11, 0.0 }
 0x4a8   :  { %v861_v12 = vpop.permute.xlu0 %860 }
 0x4a9   :  { %v902_v62 = vpack.c.bf16 %v893_v59, %v891_v58  ;;  %v901_v24 = vpack.c.bf16 %v892_v57, %v890_v16  ;;  %v878_v30 = vadd.f32 %v861_v12, %v845_v29  ;;  %v879_v54 = vadd.f32 %v861_v12, %v846_v37 }
 0x4ab   :  { %956 = vmatprep.subr.bf16.mxu0 %v902_v62  ;;  %1620 = vmatprep.subr.bf16.mxu1 %v902_v62  ;;  %v886_v2 = vmax.f32 %v878_v30, 0.0  ;;  %v887_v19 = vmax.f32 %v879_v54, 0.0  ;;  %v1657_v30 = vld [vmem:[%s2343_s5 + $0x70] sm:$0xff]   ;;  %v1658_v54 = vld [vmem:[%s2343_s5 + $0x78] sm:$0xff]  }
 0x4ac   :  { %957 = vmatpush1.bf16.msra.mxu0 %v901_v24  ;;  %1622 = vmatpush1.bf16.msra.mxu1 %v901_v24  ;;  %v866_v45 = vpop.permute.xlu1 %865  ;;  %v921_v8 = vpop.permute.xlu0 %920  ;;  %v1655_v24 = vld [vmem:[%s2343_s5 + $0x60] sm:$0xff]  }
 0x4ad   :  { %v880_v46 = vadd.f32 %v866_v45, %v847_v0  ;;  %v881_v63 = vadd.f32 %v866_v45, %v848_v18  ;;  %v1656_v0 = vld [vmem:[%s2343_s5 + $0x68] sm:$0xff]   ;;  %v1659_v18 = vld [vmem:[%s2343_s5 + $0x80] sm:$0xff]  }
 0x4ae   :  { %v1660_v45 = vld [vmem:[%s2343_s5 + $0x88] sm:$0xff]   ;;  %s1671_s5 = smov 125  }
 0x4af   :  { %v888_v5 = vmax.f32 %v880_v46, 0.0  ;;  %v889_v21 = vmax.f32 %v881_v63, 0.0 }
 0x4b0   :  { %v926_v60 = vpop.permute.xlu1 %925  ;;  %v911_v10 = vpop.permute.xlu0 %910 }
 0x4b1   :  { %v899_v23 = vpack.c.bf16 %v888_v5, %v886_v2  ;;  %v900_v36 = vpack.c.bf16 %v889_v21, %v887_v19 }
 0x4b3   :  { %958 = vmatprep.subr.bf16.mxu0 %v900_v36  ;;  %1621 = vmatprep.subr.bf16.mxu1 %v900_v36 }
 0x4b4   :  { %959 = vmatpush1.bf16.msra.mxu0 %v899_v23  ;;  %1623 = vmatpush1.bf16.msra.mxu1 %v899_v23  ;;  %v916_v40 = vpop.permute.xlu1 %915 }
 0x4b7   :  { %1576 = vmatmul.mubr.msk.bf16.vlgmr.msra.gmra.mxu0 %vm197_vm1, %v1653_v6  ;;  %1577 = vmatmul.mubr.msk.bf16.vlgmr.msra.gmra.mxu1 %vm197_vm1, %v1654_v7 }
 0x4b8   :  { %1110 = vmatprep.mubr.bf16.mxu1 %v1664_v1  ;;  %1402 = vmatprep.mubr.bf16.mxu0 %v1664_v1 }
 0x577   :  { %v978_v61 = vpop.f32.mrf.mxu0  ;;  %v988_v14 = vpop.f32.mrf.mxu1 }
 0x578   :  { %v989_v52 = vadd.f32 %v988_v14, %v921_v8  ;;  %v979_v48 = vadd.f32 %v978_v61, %v911_v10 }
 0x579   :  { %v980_v51 = vpop.f32.mrf.mxu0  ;;  %v990_v17 = vpop.f32.mrf.mxu1 }
 0x57a   :  { %v991_v28 = vadd.f32 %v990_v17, %v921_v8  ;;  %v981_v44 = vadd.f32 %v980_v51, %v911_v10  ;;  %v1001_v50 = vadd.f32 %v989_v52, %v1973_v42 }
 0x57b   :  { %v982_v53 = vpop.f32.mrf.mxu0  ;;  %v992_v39 = vpop.f32.mrf.mxu1 }
 0x57c   :  { %v983_v13 = vadd.f32 %v982_v53, %v916_v40  ;;  %v993_v15 = vadd.f32 %v992_v39, %v926_v60  ;;  %v1002_v11 = vadd.f32 %v991_v28, %v1966_v41  ;;  %v998_v57 = vadd.f32 %v981_v44, %v1976_v26 }
 0x57d   :  { %v984_v55 = vpop.f32.mrf.mxu0  ;;  %v994_v56 = vpop.f32.mrf.mxu1 }
 0x57e   :  { %v985_v49 = vadd.f32 %v984_v55, %v916_v40  ;;  %v995_v47 = vadd.f32 %v994_v56, %v926_v60  ;;  %v1003_v16 = vadd.f32 %v993_v15, %v1960_v25  ;;  %v999_v38 = vadd.f32 %v983_v13, %v1981_v4  ;;  %v1602_v13 = vld [vmem:[%s2342_s6 + $0x40] sm:$0xff]  ;;  %v1612_v55 = vld [vmem:[%s2344_s8 + $0x50] sm:$0xff]  ;;  %v1603_v56 = vld [vmem:[%s2342_s6 + $0x48] sm:$0xff] }
 0x57f   :  { %v2141_v41 = vmul.f32 %v1002_v11, %v1955_v3  ;;  %v997_v25 = vadd.f32 %v979_v48, %v1988_v33  ;;  %v1610_v11 = vld [vmem:[%s2344_s8 + $0x40] sm:$0xff]  ;;  %v1611_v48 = vld [vmem:[%s2344_s8 + $0x48] sm:$0xff] }
 0x580   :  { %v1000_v58 = vadd.f32 %v985_v49, %v1963_v22  ;;  %v1004_v59 = vadd.f32 %v995_v47, %v1969_v27  ;;  %v2138_v9 = vmul.f32 %v1003_v16, %v1950_v43  ;;  %v2151_v22 = vmul.f32 %v1001_v50, %v1950_v43  ;;  %v1613_v49 = vld [vmem:[%s2344_s8 + $0x58] sm:$0xff]  ;;  %v1445_v47 = vld [vmem:[%s2348_s10] sm:$0xff]  ;;  %v1446_v50 = vld [vmem:[%s2348_s10 + $0x8] sm:$0xff]  ;;  %v2239_v16 = vpop.permute.xlu0 %1296 }
 0x581   :  { %v2154_v27 = vmul.f32 %v998_v57, %v1955_v3  ;;  %v2159_v4 = vmul.f32 %v999_v38, %v1950_v43  ;;  %v2166_v33 = vmul.f32 %v997_v25, %v1950_v43  ;;  %v2241_v57 = vpop.permute.xlu1 %1301 }
 0x582   :  { %v2144_v12 = vmul.f32 %v1000_v58, %v1955_v3  ;;  %v2147_v42 = vmul.f32 %v1004_v59, %v1955_v3  ;;  %v1015_v29 = vpack.c.bf16 %v2138_v9, %v2151_v22 }
 0x583   :  { %v1013_v62 = vpack.c.bf16 %v2159_v4, %v2166_v33 }
 0x584   :  { %v1016_v26 = vpack.c.bf16 %v2147_v42, %v2141_v41  ;;  %v1014_v37 = vpack.c.bf16 %v2144_v12, %v2154_v27 }
 0x586   :  { %1090 = vmatprep.subr.bf16.mxu1 %v1016_v26 }
 0x587   :  { %1091 = vmatpush1.bf16.msra.mxu1 %v1015_v29 }
 0x588   :  { %1092 = vmatprep.subr.bf16.mxu1 %v1014_v37 }
 0x58b   :  { %1093 = vmatpush1.bf16.msra.mxu1 %v1013_v62 }
 0x58e   :  { %1596 = vmatmul.mubr.msk.bf16.vlgmr.msra.gmra.mxu1 %vm197_vm1, %v1655_v24 }
 0x58f   :  { %1120 = vmatprep.mubr.bf16.mxu1 %v1664_v1 }
 0x596   :  { %1597 = vmatmul.mubr.msk.bf16.gmra.mxu1 %vm197_vm1, %v1656_v0  ;;  %v1172_v0 = vsel %vm1171_vm10, 1.0, %v1667_v35 }
 0x597   :  { %1130 = vmatprep.mubr.bf16.mxu1 %v1664_v1 }
 0x59e   :  { %1598 = vmatmul.mubr.msk.bf16.gmra.mxu1 %vm197_vm1, %v1657_v30 }
 0x59f   :  { %1140 = vmatprep.mubr.bf16.mxu1 %v1664_v1 }
 0x5a6   :  { %1599 = vmatmul.mubr.msk.bf16.gmra.mxu1 %vm197_vm1, %v1658_v54 }
 0x5a7   :  { %1150 = vmatprep.mubr.bf16.mxu1 %v1664_v1 }
 0x5ae   :  { %1600 = vmatmul.mubr.msk.bf16.gmra.mxu1 %vm197_vm1, %v1659_v18 }
 0x5af   :  { %1160 = vmatprep.mubr.bf16.mxu1 %v1664_v1 }
 0x5b6   :  { %1601 = vmatmul.mubr.msk.bf16.gmra.mxu1 %vm197_vm1, %v1660_v45 }
 0x64e   :  { %v1112_v46 = vpop.f32.mrf.mxu1 }
 0x64f   :  { %1175 = vrot.lane.b32.xlu0 %v1112_v46, %s1670_s27  ;;  %v1204_v46 = vrot.slane %v1172_v0, %v1876_v32 }
 0x650   :  { %v1114_v63 = vpop.f32.mrf.mxu1 }
 0x652   :  { %v1116_v2 = vpop.f32.mrf.mxu1 }
 0x653   :  { %1183 = vrot.lane.b32.xlu0 %v1114_v63, %s1670_s27  ;;  %1177 = vrot.lane.b32.xlu1 %v1116_v2, %s1670_s27  ;;  %v1208_v63 = vrot.slane %v1172_v0, %v1878_v34 }
 0x654   :  { %v1118_v19 = vpop.f32.mrf.mxu1 }
 0x656   :  { %v1122_v5 = vpop.f32.mrf.mxu1 }
 0x657   :  { %1185 = vrot.lane.b32.xlu1 %v1118_v19, %s1670_s27  ;;  %1179 = vrot.lane.b32.xlu0 %v1122_v5, %s1670_s27 }
 0x658   :  { %v1124_v21 = vpop.f32.mrf.mxu1 }
 0x65a   :  { %v1126_v23 = vpop.f32.mrf.mxu1 }
 0x65b   :  { %1187 = vrot.lane.b32.xlu0 %v1124_v21, %s1670_s27  ;;  %1181 = vrot.lane.b32.xlu1 %v1126_v23, %s1670_s27  ;;  %v1174_v23 = vsel %vm1173_vm12, 1.0, %v1667_v35 }
 0x65c   :  { %v1128_v36 = vpop.f32.mrf.mxu1 }
 0x65e   :  { %v2199_v6 = vpop.f32.mrf.mxu1 }
 0x65f   :  { %1189 = vrot.lane.b32.xlu1 %v1128_v36, %s1670_s27 }
 0x660   :  { %v2201_v7 = vpop.f32.mrf.mxu1 }
 0x662   :  { %v2203_v8 = vpop.f32.mrf.mxu1 }
 0x664   :  { %v2205_v60 = vpop.f32.mrf.mxu1 }
 0x666   :  { %v2207_v61 = vpop.f32.mrf.mxu1 }
 0x668   :  { %v2209_v14 = vpop.f32.mrf.mxu1 }
 0x66a   :  { %v2211_v51 = vpop.f32.mrf.mxu1 }
 0x66c   :  { %v2213_v17 = vpop.f32.mrf.mxu1 }
 0x66e   :  { %v1152_v10 = vpop.f32.mrf.mxu1 }
 0x66f   :  { %1227 = vrot.lane.b32.xlu0 %v1152_v10, %s1671_s5 }
 0x670   :  { %v1154_v28 = vpop.f32.mrf.mxu1 }
 0x672   :  { %v1156_v52 = vpop.f32.mrf.mxu1 }
 0x673   :  { %1235 = vrot.lane.b32.xlu0 %v1154_v28, %s1671_s5  ;;  %1229 = vrot.lane.b32.xlu1 %v1156_v52, %s1671_s5  ;;  %v1256_v52 = vrot.slane %v1174_v23, %v1876_v32 }
 0x674   :  { %v1158_v53 = vpop.f32.mrf.mxu1 }
 0x676   :  { %v1162_v39 = vpop.f32.mrf.mxu1 }
 0x677   :  { %1237 = vrot.lane.b32.xlu1 %v1158_v53, %s1671_s5  ;;  %1231 = vrot.lane.b32.xlu0 %v1162_v39, %s1671_s5  ;;  %v1260_v53 = vrot.slane %v1174_v23, %v1878_v34 }
 0x678   :  { %v1164_v40 = vpop.f32.mrf.mxu1 }
 0x67a   :  { %v1166_v44 = vpop.f32.mrf.mxu1 }
 0x67b   :  { %1239 = vrot.lane.b32.xlu0 %v1164_v40, %s1671_s5  ;;  %1233 = vrot.lane.b32.xlu1 %v1166_v44, %s1671_s5 }
 0x67c   :  { %v1168_v15 = vpop.f32.mrf.mxu1 }
 0x67f   :  { %1286 = vperm.xlu0 %1632, %v1602_v13   ;;  %1241 = vrot.lane.b32.xlu1 %v1168_v15, %s1671_s5 }
 0x683   :  { %1346 = vperm.xlu0 %1632, %v1612_v55   ;;  %1291 = vperm.xlu1 %1633, %v1603_v56  }
 0x687   :  { %1336 = vperm.xlu0 %1632, %v1610_v11   ;;  %1351 = vperm.xlu1 %1633, %v1613_v49  }
 0x68b   :  { %1449 = vperm.xlu0 %1632, %v1445_v47   ;;  %1341 = vperm.xlu1 %1633, %v1611_v48  }
 0x68f   :  { %1454 = vperm.xlu1 %1633, %v1446_v50  }
 0x6c1   :  { %v1176_v58 = vpop.permute.xlu0 %1175 }
 0x6c5   :  { %v1178_v59 = vpop.permute.xlu1 %1177  ;;  %v1184_v38 = vpop.permute.xlu0 %1183 }
 0x6c6   :  { %v1192_v20 = vsel %vm1191_vm11, %v1176_v58, %v1184_v38  ;;  %v1196_v28 = vsel %vm1191_vm11, %v1184_v38, %v1176_v58 }
 0x6c7   :  { %v1211_v47 = vmul.f32 %v1204_v46, %v1196_v28  ;;  %v1212_v32 = vmul.f32 %v1208_v63, %v1192_v20 }
 0x6c9   :  { %v1186_v25 = vpop.permute.xlu1 %1185  ;;  %v1180_v26 = vpop.permute.xlu0 %1179  ;;  %v1220_v20 = vadd.f32 %v1212_v32, %v2201_v7 }
 0x6cd   :  { %v1182_v29 = vpop.permute.xlu1 %1181  ;;  %v1188_v37 = vpop.permute.xlu0 %1187 }
 0x6ce   :  { %v1194_v18 = vsel %vm1191_vm11, %v1180_v26, %v1188_v37  ;;  %v1198_v45 = vsel %vm1191_vm11, %v1188_v37, %v1180_v26 }
 0x6cf   :  { %v1215_v5 = vmul.f32 %v1204_v46, %v1198_v45  ;;  %v1216_v21 = vmul.f32 %v1208_v63, %v1194_v18 }
 0x6d1   :  { %v1190_v62 = vpop.permute.xlu1 %1189  ;;  %v1223_v40 = vadd.f32 %v1215_v5, %v2207_v61  ;;  %v1224_v44 = vadd.f32 %v1216_v21, %v2209_v14  ;;  %v1193_v61 = vsel %vm1191_vm11, %v1178_v59, %v1186_v25  ;;  %v1197_v14 = vsel %vm1191_vm11, %v1186_v25, %v1178_v59 }
 0x6d2   :  { %v1195_v36 = vsel %vm1191_vm11, %v1182_v29, %v1190_v62  ;;  %v1199_v10 = vsel %vm1191_vm11, %v1190_v62, %v1182_v29  ;;  %v1213_v5 = vmul.f32 %v1204_v46, %v1197_v14  ;;  %v1214_v21 = vmul.f32 %v1208_v63, %v1193_v61 }
 0x6d3   :  { %v1217_v55 = vmul.f32 %v1204_v46, %v1199_v10  ;;  %v1218_v56 = vmul.f32 %v1208_v63, %v1195_v36 }
 0x6d4   :  { %v1222_v46 = vadd.f32 %v1214_v21, %v2205_v60 }
 0x6d5   :  { %v1225_v26 = vadd.f32 %v1217_v55, %v2211_v51  ;;  %v1226_v29 = vadd.f32 %v1218_v56, %v2213_v17 }
 0x6e1   :  { %v1228_v24 = vpop.permute.xlu0 %1227 }
 0x6e5   :  { %v1236_v30 = vpop.permute.xlu0 %1235  ;;  %v1230_v54 = vpop.permute.xlu1 %1229 }
 0x6e6   :  { %v1244_v0 = vsel %vm1243_vm13, %v1228_v24, %v1236_v30  ;;  %v1248_v18 = vsel %vm1243_vm13, %v1236_v30, %v1228_v24  ;;  %v1219_v30 = vadd.f32 %v1211_v47, %v2199_v6 }
 0x6e7   :  { %v1263_v23 = vmul.f32 %v1256_v52, %v1244_v0  ;;  %v1264_v36 = vmul.f32 %v1260_v53, %v1248_v18 }
 0x6e9   :  { %v1232_v2 = vpop.permute.xlu0 %1231  ;;  %v1238_v19 = vpop.permute.xlu1 %1237 }
 0x6ea   :  { %v1245_v59 = vsel %vm1243_vm13, %v1230_v54, %v1238_v19  ;;  %v1249_v25 = vsel %vm1243_vm13, %v1238_v19, %v1230_v54 }
 0x6eb   :  { %v1265_v31 = vmul.f32 %v1256_v52, %v1245_v59  ;;  %v1266_v54 = vmul.f32 %v1260_v53, %v1249_v25 }
 0x6ed   :  { %v1240_v39 = vpop.permute.xlu0 %1239  ;;  %v1234_v35 = vpop.permute.xlu1 %1233  ;;  %v1274_v7 = vadd.f32 %v1266_v54, %v1222_v46  ;;  %v1663_v46 = vld [vmem:[%s2349_s9] sm:$0xff]  }
 0x6ee   :  { %v1246_v13 = vsel %vm1243_vm13, %v1232_v2, %v1240_v39  ;;  %v1250_v15 = vsel %vm1243_vm13, %v1240_v39, %v1232_v2 }
 0x6ef   :  { %v1267_v11 = vmul.f32 %v1256_v52, %v1246_v13  ;;  %v1268_v49 = vmul.f32 %v1260_v53, %v1250_v15 }
 0x6f1   :  { %v1275_v48 = vadd.f32 %v1267_v11, %v1223_v40  ;;  %v1276_v34 = vadd.f32 %v1268_v49, %v1224_v44  ;;  %v1242_v50 = vpop.permute.xlu1 %1241  ;;  %v1271_v40 = vadd.f32 %v1263_v23, %v1219_v30  ;;  %v1272_v44 = vadd.f32 %v1264_v36, %v1220_v20 }
 0x6f2   :  { %v1247_v58 = vsel %vm1243_vm13, %v1234_v35, %v1242_v50  ;;  %v1251_v38 = vsel %vm1243_vm13, %v1242_v50, %v1234_v35 }
 0x6f3   :  { %v1269_v37 = vmul.f32 %v1256_v52, %v1247_v58  ;;  %v1270_v62 = vmul.f32 %v1260_v53, %v1251_v38  ;;  %v1308_v45 = vadd.f32 %v2239_v16, %v1275_v48  ;;  %v1309_v17 = vadd.f32 %v2239_v16, %v1276_v34  ;;  %v1661_v48 = vld [vmem:[%s2345_s7 + $0x20] sm:$0xff]   ;;  %v1662_v34 = vld [vmem:[%s2345_s7 + $0x28] sm:$0xff]  }
 0x6f4   :  { %v1221_v16 = vadd.f32 %v1213_v5, %v2203_v8 }
 0x6f5   :  { %v1277_v2 = vadd.f32 %v1269_v37, %v1225_v26  ;;  %v1278_v51 = vadd.f32 %v1270_v62, %v1226_v29  ;;  %v1316_v19 = vmax.f32 %v1308_v45, 0.0  ;;  %v1317_v39 = vmax.f32 %v1309_v17, 0.0 }
 0x6f6   :  { %v1273_v6 = vadd.f32 %v1265_v31, %v1221_v16 }
 0x6f7   :  { %v1310_v10 = vadd.f32 %v2241_v57, %v1277_v2  ;;  %v1311_v24 = vadd.f32 %v2241_v57, %v1278_v51 }
 0x6f9   :  { %v1318_v28 = vmax.f32 %v1310_v10, 0.0  ;;  %v1319_v35 = vmax.f32 %v1311_v24, 0.0 }
 0x6fa   :  { %v1287_v63 = vpop.permute.xlu0 %1286 }
 0x6fb   :  { %v1328_v13 = vpack.c.bf16 %v1319_v35, %v1317_v39  ;;  %v1327_v15 = vpack.c.bf16 %v1318_v28, %v1316_v19  ;;  %v1304_v57 = vadd.f32 %v1287_v63, %v1271_v40  ;;  %v1305_v55 = vadd.f32 %v1287_v63, %v1272_v44 }
 0x6fd   :  { %1382 = vmatprep.subr.bf16.mxu0 %v1328_v13  ;;  %v1312_v11 = vmax.f32 %v1304_v57, 0.0  ;;  %v1313_v49 = vmax.f32 %v1305_v55, 0.0 }
 0x6fe   :  { %1383 = vmatpush1.bf16.msra.mxu0 %v1327_v15  ;;  %v1292_v52 = vpop.permute.xlu1 %1291  ;;  %v1347_v38 = vpop.permute.xlu0 %1346 }
 0x6ff   :  { %v1306_v53 = vadd.f32 %v1292_v52, %v1273_v6  ;;  %v1307_v56 = vadd.f32 %v1292_v52, %v1274_v7 }
 0x701   :  { %v1314_v47 = vmax.f32 %v1306_v53, 0.0  ;;  %v1315_v8 = vmax.f32 %v1307_v56, 0.0 }
 0x702   :  { %v1352_v14 = vpop.permute.xlu1 %1351  ;;  %v1337_v59 = vpop.permute.xlu0 %1336 }
 0x703   :  { %v1325_v32 = vpack.c.bf16 %v1314_v47, %v1312_v11  ;;  %v1326_v60 = vpack.c.bf16 %v1315_v8, %v1313_v49 }
 0x705   :  { %1384 = vmatprep.subr.bf16.mxu0 %v1326_v60 }
 0x706   :  { %1385 = vmatpush1.bf16.msra.mxu0 %v1325_v32  ;;  %v1342_v37 = vpop.permute.xlu1 %1341 }
 0x709   :  { %1616 = vmatmul.mubr.msk.bf16.vlgmr.msra.gmra.mxu0 %vm197_vm1, %v1661_v48 }
 0x70a   :  { %1412 = vmatprep.mubr.bf16.mxu0 %v1664_v1 }
 0x711   :  { %1617 = vmatmul.mubr.msk.bf16.gmra.mxu0 %vm197_vm1, %v1662_v34 }
 0x712   :  { %1497 = vmatprep.mubr.bf16.mxu0 %v1664_v1 }
 0x7c9   :  { %v1404_v50 = vpop.f32.mrf.mxu0 }
 0x7ca   :  { %v1405_v10 = vadd.f32 %v1404_v50, %v1337_v59 }
 0x7cb   :  { %v1406_v61 = vpop.f32.mrf.mxu0 }
 0x7cc   :  { %v1407_v2 = vadd.f32 %v1406_v61, %v1337_v59 }
 0x7cd   :  { %v1408_v58 = vpop.f32.mrf.mxu0 }
 0x7ce   :  { %v1409_v17 = vadd.f32 %v1408_v58, %v1342_v37  ;;  %v1424_v30 = vadd.f32 %v1407_v2, %v2154_v27 }
 0x7cf   :  { %v1410_v26 = vpop.f32.mrf.mxu0 }
 0x7d0   :  { %v1411_v0 = vadd.f32 %v1410_v26, %v1342_v37  ;;  %v1425_v31 = vadd.f32 %v1409_v17, %v2159_v4 }
 0x7d1   :  { %v1414_v29 = vpop.f32.mrf.mxu0 }
 0x7d2   :  { %v1415_v25 = vadd.f32 %v1414_v29, %v1347_v38  ;;  %v1426_v1 = vadd.f32 %v1411_v0, %v2144_v12  ;;  %v1433_v27 = vmul.f32 %v1425_v31, %v1950_v43 }
 0x7d3   :  { %v1416_v62 = vpop.f32.mrf.mxu0 }
 0x7d4   :  { %v1417_v18 = vadd.f32 %v1416_v62, %v1347_v38  ;;  %v1427_v24 = vadd.f32 %v1415_v25, %v2151_v22  ;;  %v1434_v19 = vmul.f32 %v1426_v1, %v1955_v3  ;;  %v1432_v22 = vmul.f32 %v1424_v30, %v1955_v3 }
 0x7d5   :  { %v1418_v45 = vpop.f32.mrf.mxu0 }
 0x7d6   :  { %v1419_v51 = vadd.f32 %v1418_v45, %v1352_v14  ;;  %v1428_v21 = vadd.f32 %v1417_v18, %v2141_v41  ;;  %v1435_v28 = vmul.f32 %v1427_v24, %v1950_v43  ;;  %v1442_v4 = vpack.c.bf16 %v1434_v19, %v1432_v22 }
 0x7d7   :  { %v1420_v5 = vpop.f32.mrf.mxu0 }
 0x7d8   :  { %v1429_v23 = vadd.f32 %v1419_v51, %v2138_v9  ;;  %v1421_v36 = vadd.f32 %v1420_v5, %v1352_v14  ;;  %v1436_v12 = vmul.f32 %v1428_v21, %v1955_v3  ;;  %v1423_v9 = vadd.f32 %v1405_v10, %v2166_v33  ;;  %v1450_v33 = vpop.permute.xlu0 %1449 }
 0x7da   :  { %v1430_v20 = vadd.f32 %v1421_v36, %v2147_v42  ;;  %v1437_v54 = vmul.f32 %v1429_v23, %v1950_v43  ;;  %v1431_v35 = vmul.f32 %v1423_v9, %v1950_v43  ;;  %v1455_v43 = vpop.permute.xlu1 %1454 }
 0x7dc   :  { %v1438_v41 = vmul.f32 %v1430_v20, %v1955_v3  ;;  %v1443_v42 = vpack.c.bf16 %v1437_v54, %v1435_v28  ;;  %v1441_v16 = vpack.c.bf16 %v1433_v27, %v1431_v35 }
 0x7de   :  { %v1444_v39 = vpack.c.bf16 %v1438_v41, %v1436_v12 }
 0x7e0   :  { %1477 = vmatprep.subr.bf16.mxu0 %v1444_v39 }
 0x7e1   :  { %1478 = vmatpush1.bf16.msra.mxu0 %v1443_v42 }
 0x7e2   :  { %1479 = vmatprep.subr.bf16.mxu0 %v1442_v4 }
 0x7e5   :  { %1480 = vmatpush1.bf16.msra.mxu0 %v1441_v16 }
 0x7e8   :  { %1619 = vmatmul.mubr.msk.bf16.vlgmr.msra.gmra.mxu0 %vm197_vm1, %v1663_v46 }
 0x8a8   :  { %v1499_v3 = vpop.f32.mrf.mxu0 }
 0x8a9   :  { %v1500_v63 = vadd.f32 %v1499_v3, %v1450_v33 }
 0x8aa   :  { %v1501_v40 = vpop.f32.mrf.mxu0 }
 0x8ab   :  { %1508 = vst [vmem:[%s2350_s11] sm:$0xff] %v1500_v63  ;;  %v1502_v44 = vadd.f32 %v1501_v40, %v1450_v33 }
 0x8ac   :  { %v1503_v13 = vpop.f32.mrf.mxu0 }
 0x8ad   :  { %1509 = vst [vmem:[%s2350_s11 + $0x8] sm:$0xff] %v1502_v44  ;;  %v1504_v15 = vadd.f32 %v1503_v13, %v1455_v43 }
 0x8ae   :  { %v1505_v57 = vpop.f32.mrf.mxu0 }
 0x8af   :  { %1510 = vst [vmem:[%s2350_s11 + $0x10] sm:$0xff] %v1504_v15  ;;  %v1506_v55 = vadd.f32 %v1505_v57, %v1455_v43 }
 0x8b1   :  { %1511 = vst [vmem:[%s2350_s11 + $0x18] sm:$0xff] %v1506_v55 }

// kernel: multiscale_tcn_forward.2
= control target key start
LH: loop header
LB: loop body
LE: loop exit
PB: predicated region body
PF: predicated region fallthrough
CT: control target
= control target key end

     0   :  { %v4127_v1 = vmov 0   ;;  %vm103_vm0 = vcmask 130048   ;;  %vm266_vm1 = vcmask 261120   ;;  %s2678_s12 = smov 1   ;;  %s2681_s24 = smov 2   ;;  %s4115_s0 = inlined_call_operand.vmem [shape: bf16[16,512], index: 0, kind: input, shape index: {}]   ;;  %s4116_s3 = inlined_call_operand.vmem [shape: bf16[32,16], index: 3, kind: input, shape index: {}]   ;;  %s4117_s4 = inlined_call_operand.vmem [shape: f32[32,1], index: 4, kind: input, shape index: {}]   ;;  %s4118_s6 = inlined_call_operand.vmem [shape: f32[3,32,1], index: 6, kind: input, shape index: {}]   ;;  %s4119_s5 = inlined_call_operand.vmem [shape: bf16[3,96,32], index: 5, kind: input, shape index: {}]   ;;  %s4120_s8 = inlined_call_operand.vmem [shape: f32[3,32,1], index: 8, kind: input, shape index: {}]   ;;  %s4121_s7 = inlined_call_operand.vmem [shape: bf16[3,32,32], index: 7, kind: input, shape index: {}]   ;;  %s4122_s2 = inlined_call_operand.vmem [shape: s32[1,512], index: 2, kind: input, shape index: {}]   ;;  %s4123_s1 = inlined_call_operand.vmem [shape: f32[1,512], index: 1, kind: input, shape index: {}]   ;;  %s4124_s10 = inlined_call_operand.vmem [shape: f32[16,1], index: 10, kind: input, shape index: {}]   ;;  %s4125_s9 = inlined_call_operand.vmem [shape: bf16[16,32], index: 9, kind: input, shape index: {}]   ;;  %s4126_s11 = inlined_call_operand.vmem [shape: f32[16,512], index: 11, kind: output, shape index: {}]  }
   0x1   :  { %v2643_v0 = vld [vmem:[%s4115_s0 + $0x4] ss:$16 sps:$4 sm:$0xff]   ;;  %142 = vmatprep.mubr.bf16.mxu0 %v4127_v1  ;;  %195 = vmatprep.mubr.bf16.mxu1 %v4127_v1  ;;  %v2645_v2 = vld [vmem:[%s4115_s0 + $0xc] ss:$16 sps:$4 sm:$0xff]   ;;  %v2647_v3 = vld [vmem:[%s4115_s0] ss:$16 sps:$4 sm:$0xff]  }
   0x2   :  { %2642 = vset.pattern.permute.xlu1 %v4127_v1  ;;  %2641 = vset.pattern.permute.xlu0 %v4127_v1  ;;  %v2648_v4 = vld [vmem:[%s4115_s0 + $0x8] ss:$16 sps:$4 sm:$0xff]   ;;  %v2649_v5 = vld [vmem:[%s4116_s3] sm:$0xff]   ;;  %v51_v7 = vld [vmem:[%s4117_s4 + $0x10] sm:$0xff]  ;;  %s2679_s0 = smov 127   ;;  %s2682_s25 = smov 126  }
   0x3   :  { %124 = vmatprep.subr.bf16.mxu0 %v2643_v0  ;;  %177 = vmatprep.subr.bf16.mxu1 %v2645_v2  ;;  %v49_v6 = vld [vmem:[%s4117_s4] sm:$0xff]  ;;  %v50_v8 = vld [vmem:[%s4117_s4 + $0x8] sm:$0xff]  ;;  %v52_v9 = vld [vmem:[%s4117_s4 + $0x18] sm:$0xff] }
   0x4   :  { %125 = vmatpush1.bf16.msra.mxu0 %v2647_v3  ;;  %178 = vmatpush1.bf16.msra.mxu1 %v2648_v4  ;;  %v684_v10 = vld [vmem:[%s4118_s6 + $0x18] sm:$0xff]  ;;  %v2650_v11 = vld [vmem:[%s4116_s3 + $0x8] sm:$0xff]   ;;  %v683_v12 = vld [vmem:[%s4118_s6 + $0x10] sm:$0xff] }
   0x5   :  { %55 = vperm.xlu1 %2642, %v49_v6   ;;  %65 = vperm.xlu0 %2641, %v51_v7   ;;  %v2651_v57 = vld [vmem:[%s4119_s5] sm:$0xff]   ;;  %v2652_v58 = vld [vmem:[%s4119_s5 + $0x8] sm:$0xff]   ;;  %v2653_v59 = vld [vmem:[%s4119_s5 + $0x10] sm:$0xff]  }
   0x6   :  { %v2654_v60 = vld [vmem:[%s4119_s5 + $0x18] sm:$0xff]   ;;  %v2655_v61 = vld [vmem:[%s4119_s5 + $0x20] sm:$0xff]   ;;  %v2656_v62 = vld [vmem:[%s4119_s5 + $0x28] sm:$0xff]  }
   0x7   :  { %2506 = vmatmul.mubr.msk.bf16.vlgmr.msra.gmra.mxu0 %vm103_vm0, %v2649_v5  ;;  %2508 = vmatmul.mubr.msk.bf16.vlgmr.msra.gmra.mxu1 %vm103_vm0, %v2649_v5 }
   0x8   :  { %152 = vmatprep.mubr.bf16.mxu0 %v4127_v1  ;;  %205 = vmatprep.mubr.bf16.mxu1 %v4127_v1 }
   0x9   :  { %60 = vperm.xlu1 %2642, %v50_v8   ;;  %70 = vperm.xlu0 %2641, %v52_v9  }
   0xd   :  { %702 = vperm.xlu1 %2642, %v684_v10   ;;  %697 = vperm.xlu0 %2641, %v683_v12  }
   0xf   :  { %2507 = vmatmul.mubr.msk.bf16.gmra.mxu0 %vm103_vm0, %v2650_v11  ;;  %2509 = vmatmul.mubr.msk.bf16.gmra.mxu1 %vm103_vm0, %v2650_v11 }
  0x10   :  { %317 = vmatprep.mubr.bf16.mxu0 %v4127_v1  ;;  %410 = vmatprep.mubr.bf16.mxu1 %v4127_v1 }
  0x80   :  { %v56_v21 = vpop.permute.xlu1 %55  ;;  %v66_v22 = vpop.permute.xlu0 %65 }
  0x84   :  { %v61_v29 = vpop.permute.xlu1 %60  ;;  %v71_v30 = vpop.permute.xlu0 %70 }
  0xc7   :  { %v144_v13 = vpop.f32.mrf.mxu0  ;;  %v197_v14 = vpop.f32.mrf.mxu1 }
  0xc8   :  { %v2809_v41 = vadd.f32 %v197_v14, %v56_v21  ;;  %v2835_v54 = vadd.f32 %v144_v13, %v56_v21 }
  0xc9   :  { %v146_v15 = vpop.f32.mrf.mxu0  ;;  %v199_v16 = vpop.f32.mrf.mxu1 }
  0xca   :  { %4210 = vst [vmem:[#allocation10_spill] sm:$0xff] %v2809_v41  ;;  %v2815_v44 = vadd.f32 %v146_v15, %v56_v21  ;;  %v2817_v45 = vadd.f32 %v199_v16, %v56_v21  ;;  %4217 = vst [vmem:[#allocation17_spill] sm:$0xff] %v2835_v54 }
  0xcb   :  { %v148_v17 = vpop.f32.mrf.mxu0  ;;  %v201_v18 = vpop.f32.mrf.mxu1 }
  0xcc   :  { %4213 = vst [vmem:[#allocation13_spill] sm:$0xff] %v2815_v44  ;;  %4214 = vst [vmem:[#allocation14_spill] sm:$0xff] %v2817_v45  ;;  %v2823_v48 = vadd.f32 %v148_v17, %v61_v29  ;;  %v2825_v49 = vadd.f32 %v201_v18, %v61_v29 }
  0xcd   :  { %v150_v19 = vpop.f32.mrf.mxu0  ;;  %v203_v20 = vpop.f32.mrf.mxu1 }
  0xce   :  { %v2793_v31 = vadd.f32 %v150_v19, %v61_v29  ;;  %v2795_v32 = vadd.f32 %v203_v20, %v61_v29  ;;  %4215 = vst [vmem:[#allocation15_spill] sm:$0xff] %v2823_v48  ;;  %4216 = vst [vmem:[#allocation16_spill] sm:$0xff] %v2825_v49  ;;  %v216_v55 = vpack.c.bf16 %v2823_v48, %v2835_v54 }
  0xcf   :  { %v154_v23 = vpop.f32.mrf.mxu0  ;;  %v207_v24 = vpop.f32.mrf.mxu1  ;;  %v218_v56 = vpack.c.bf16 %v2825_v49, %v2809_v41 }
  0xd0   :  { %4202 = vst [vmem:[#allocation2_spill] sm:$0xff] %v2793_v31  ;;  %4203 = vst [vmem:[#allocation3_spill] sm:$0xff] %v2795_v32  ;;  %v2811_v42 = vadd.f32 %v154_v23, %v66_v22  ;;  %v2813_v43 = vadd.f32 %v207_v24, %v66_v22  ;;  %v217_v52 = vpack.c.bf16 %v2793_v31, %v2815_v44 }
  0xd1   :  { %v156_v25 = vpop.f32.mrf.mxu0  ;;  %v209_v26 = vpop.f32.mrf.mxu1  ;;  %v219_v53 = vpack.c.bf16 %v2795_v32, %v2817_v45 }
  0xd2   :  { %v2801_v37 = vadd.f32 %v156_v25, %v66_v22  ;;  %v2803_v38 = vadd.f32 %v209_v26, %v66_v22  ;;  %4211 = vst [vmem:[#allocation11_spill] sm:$0xff] %v2811_v42  ;;  %4212 = vst [vmem:[#allocation12_spill] sm:$0xff] %v2813_v43 }
  0xd3   :  { %v158_v27 = vpop.f32.mrf.mxu0  ;;  %v211_v28 = vpop.f32.mrf.mxu1 }
  0xd4   :  { %v2797_v33 = vadd.f32 %v158_v27, %v71_v30  ;;  %v2799_v34 = vadd.f32 %v211_v28, %v71_v30  ;;  %4206 = vst [vmem:[#allocation6_spill] sm:$0xff] %v2801_v37  ;;  %4207 = vst [vmem:[#allocation7_spill] sm:$0xff] %v2803_v38 }
  0xd5   :  { %v160_v35 = vpop.f32.mrf.mxu0  ;;  %v213_v36 = vpop.f32.mrf.mxu1 }
  0xd6   :  { %4204 = vst [vmem:[#allocation4_spill] sm:$0xff] %v2797_v33  ;;  %4205 = vst [vmem:[#allocation5_spill] sm:$0xff] %v2799_v34  ;;  %v2805_v39 = vadd.f32 %v160_v35, %v71_v30  ;;  %v2807_v40 = vadd.f32 %v213_v36, %v71_v30  ;;  %v220_v50 = vpack.c.bf16 %v2797_v33, %v2811_v42 }
  0xd7   :  { %v222_v51 = vpack.c.bf16 %v2799_v34, %v2813_v43  ;;  %v4222_v43 = vmov 0.0  }
  0xd8   :  { %4208 = vst [vmem:[#allocation8_spill] sm:$0xff] %v2805_v39  ;;  %4209 = vst [vmem:[#allocation9_spill] sm:$0xff] %v2807_v40  ;;  %v221_v46 = vpack.c.bf16 %v2805_v39, %v2801_v37  ;;  %v223_v47 = vpack.c.bf16 %v2807_v40, %v2803_v38 }
  0xda   :  { %297 = vmatprep.subr.bf16.mxu0 %v221_v46  ;;  %390 = vmatprep.subr.bf16.mxu1 %v223_v47 }
  0xdb   :  { %298 = vmatpush1.bf16.msra.mxu0 %v220_v50  ;;  %391 = vmatpush1.bf16.msra.mxu1 %v222_v51 }
  0xdc   :  { %299 = vmatprep.subr.bf16.mxu0 %v217_v52  ;;  %392 = vmatprep.subr.bf16.mxu1 %v219_v53 }
  0xdf   :  { %300 = vmatpush1.bf16.msra.mxu0 %v216_v55  ;;  %393 = vmatpush1.bf16.msra.mxu1 %v218_v56 }
  0xe2   :  { %2516 = vmatmul.mubr.msk.bf16.vlgmr.msra.gmra.mxu0 %vm266_vm1, %v2651_v57  ;;  %2522 = vmatmul.mubr.msk.bf16.vlgmr.msra.gmra.mxu1 %vm266_vm1, %v2651_v57 }
  0xe3   :  { %327 = vmatprep.mubr.bf16.mxu0 %v4127_v1  ;;  %420 = vmatprep.mubr.bf16.mxu1 %v4127_v1 }
  0xea   :  { %2517 = vmatmul.mubr.msk.bf16.gmra.mxu0 %vm266_vm1, %v2652_v58  ;;  %2523 = vmatmul.mubr.msk.bf16.gmra.mxu1 %vm266_vm1, %v2652_v58 }
  0xeb   :  { %337 = vmatprep.mubr.bf16.mxu0 %v4127_v1  ;;  %430 = vmatprep.mubr.bf16.mxu1 %v4127_v1 }
  0xf2   :  { %2518 = vmatmul.mubr.msk.bf16.gmra.mxu0 %vm266_vm1, %v2653_v59  ;;  %2524 = vmatmul.mubr.msk.bf16.gmra.mxu1 %vm266_vm1, %v2653_v59 }
  0xf3   :  { %347 = vmatprep.mubr.bf16.mxu0 %v4127_v1  ;;  %440 = vmatprep.mubr.bf16.mxu1 %v4127_v1 }
  0xfa   :  { %2519 = vmatmul.mubr.msk.bf16.gmra.mxu0 %vm266_vm1, %v2654_v60  ;;  %2525 = vmatmul.mubr.msk.bf16.gmra.mxu1 %vm266_vm1, %v2654_v60 }
  0xfb   :  { %357 = vmatprep.mubr.bf16.mxu0 %v4127_v1  ;;  %450 = vmatprep.mubr.bf16.mxu1 %v4127_v1 }
 0x102   :  { %2520 = vmatmul.mubr.msk.bf16.gmra.mxu0 %vm266_vm1, %v2655_v61  ;;  %2526 = vmatmul.mubr.msk.bf16.gmra.mxu1 %vm266_vm1, %v2655_v61 }
 0x103   :  { %367 = vmatprep.mubr.bf16.mxu0 %v4127_v1  ;;  %460 = vmatprep.mubr.bf16.mxu1 %v4127_v1 }
 0x10a   :  { %2521 = vmatmul.mubr.msk.bf16.gmra.mxu0 %vm266_vm1, %v2656_v62  ;;  %2527 = vmatmul.mubr.msk.bf16.gmra.mxu1 %vm266_vm1, %v2656_v62 }
 0x10b   :  { %821 = vmatprep.mubr.bf16.mxu0 %v4127_v1  ;;  %874 = vmatprep.mubr.bf16.mxu1 %v4127_v1 }
 0x1a2   :  { %v319_v63 = vpop.f32.mrf.mxu0  ;;  %v412_v0 = vpop.f32.mrf.mxu1 }
 0x1a3   :  { %475 = vrot.lane.b32.xlu0 %v319_v63, %s2678_s12  ;;  %v681_v63 = vld [vmem:[%s4118_s6] sm:$0xff] }
 0x1a4   :  { %v321_v2 = vpop.f32.mrf.mxu0  ;;  %v414_v3 = vpop.f32.mrf.mxu1 }
 0x1a6   :  { %v323_v4 = vpop.f32.mrf.mxu0  ;;  %v416_v5 = vpop.f32.mrf.mxu1 }
 0x1a7   :  { %491 = vrot.lane.b32.xlu0 %v412_v0, %s2678_s12  ;;  %477 = vrot.lane.b32.xlu1 %v323_v4, %s2678_s12  ;;  %v749_v4 = vld [vmem:[%s4120_s8] sm:$0xff] }
 0x1a8   :  { %v325_v6 = vpop.f32.mrf.mxu0  ;;  %v418_v7 = vpop.f32.mrf.mxu1 }
 0x1aa   :  { %v329_v8 = vpop.f32.mrf.mxu0  ;;  %v422_v9 = vpop.f32.mrf.mxu1 }
 0x1ab   :  { %483 = vrot.lane.b32.xlu0 %v321_v2, %s2678_s12  ;;  %493 = vrot.lane.b32.xlu1 %v416_v5, %s2678_s12  ;;  %v751_v2 = vld [vmem:[%s4120_s8 + $0x10] sm:$0xff]  ;;  %v752_v5 = vld [vmem:[%s4120_s8 + $0x18] sm:$0xff] }
 0x1ac   :  { %v331_v10 = vpop.f32.mrf.mxu0  ;;  %v424_v11 = vpop.f32.mrf.mxu1 }
 0x1ae   :  { %v333_v12 = vpop.f32.mrf.mxu0  ;;  %v426_v13 = vpop.f32.mrf.mxu1 }
 0x1af   :  { %499 = vrot.lane.b32.xlu0 %v414_v3, %s2678_s12  ;;  %485 = vrot.lane.b32.xlu1 %v325_v6, %s2678_s12  ;;  %v682_v3 = vld [vmem:[%s4118_s6 + $0x8] sm:$0xff]  ;;  %v2566_v6 = vld [vmem:[%s4118_s6 + $0x30] sm:$0xff] }
 0x1b0   :  { %v335_v14 = vpop.f32.mrf.mxu0  ;;  %v428_v15 = vpop.f32.mrf.mxu1 }
 0x1b2   :  { %v2890_v16 = vpop.f32.mrf.mxu0  ;;  %v2892_v17 = vpop.f32.mrf.mxu1 }
 0x1b3   :  { %501 = vrot.lane.b32.xlu1 %v418_v7, %s2678_s12  ;;  %479 = vrot.lane.b32.xlu0 %v329_v8, %s2678_s12  ;;  %v750_v7 = vld [vmem:[%s4120_s8 + $0x8] sm:$0xff]  ;;  %v2567_v8 = vld [vmem:[%s4118_s6 + $0x38] sm:$0xff] }
 0x1b4   :  { %v2896_v18 = vpop.f32.mrf.mxu0  ;;  %v2898_v19 = vpop.f32.mrf.mxu1 }
 0x1b6   :  { %v2900_v20 = vpop.f32.mrf.mxu0  ;;  %v2902_v21 = vpop.f32.mrf.mxu1 }
 0x1b7   :  { %495 = vrot.lane.b32.xlu0 %v422_v9, %s2678_s12  ;;  %481 = vrot.lane.b32.xlu1 %v333_v12, %s2678_s12  ;;  %v2971_v9 = vpop.permute.xlu0 %697 }
 0x1b8   :  { %v2906_v22 = vpop.f32.mrf.mxu0  ;;  %v2908_v23 = vpop.f32.mrf.mxu1 }
 0x1b9   :  { %4218 = vst [vmem:[#allocation18_spill] sm:$0xff] %v2908_v23 }
 0x1ba   :  { %v2910_v24 = vpop.f32.mrf.mxu0  ;;  %v2912_v25 = vpop.f32.mrf.mxu1 }
 0x1bb   :  { %487 = vrot.lane.b32.xlu0 %v331_v10, %s2678_s12  ;;  %497 = vrot.lane.b32.xlu1 %v426_v13, %s2678_s12  ;;  %v2973_v10 = vpop.permute.xlu1 %702 }
 0x1bc   :  { %v2916_v26 = vpop.f32.mrf.mxu0  ;;  %v2918_v27 = vpop.f32.mrf.mxu1 }
 0x1be   :  { %v2920_v28 = vpop.f32.mrf.mxu0  ;;  %v2922_v29 = vpop.f32.mrf.mxu1 }
 0x1bf   :  { %503 = vrot.lane.b32.xlu0 %v424_v11, %s2678_s12  ;;  %489 = vrot.lane.b32.xlu1 %v335_v14, %s2678_s12 }
 0x1c0   :  { %v2926_v30 = vpop.f32.mrf.mxu0  ;;  %v2928_v35 = vpop.f32.mrf.mxu1 }
 0x1c2   :  { %v359_v36 = vpop.f32.mrf.mxu0  ;;  %v452_v46 = vpop.f32.mrf.mxu1 }
 0x1c3   :  { %505 = vrot.lane.b32.xlu1 %v428_v15, %s2678_s12  ;;  %579 = vrot.lane.b32.xlu0 %v359_v36, %s2679_s0 }
 0x1c4   :  { %v361_v47 = vpop.f32.mrf.mxu0  ;;  %v454_v50 = vpop.f32.mrf.mxu1 }
 0x1c6   :  { %v363_v51 = vpop.f32.mrf.mxu0  ;;  %v456_v52 = vpop.f32.mrf.mxu1 }
 0x1c7   :  { %595 = vrot.lane.b32.xlu0 %v452_v46, %s2679_s0  ;;  %581 = vrot.lane.b32.xlu1 %v363_v51, %s2679_s0 }
 0x1c8   :  { %v365_v53 = vpop.f32.mrf.mxu0  ;;  %v458_v56 = vpop.f32.mrf.mxu1 }
 0x1ca   :  { %v369_v55 = vpop.f32.mrf.mxu0  ;;  %v462_v58 = vpop.f32.mrf.mxu1 }
 0x1cb   :  { %587 = vrot.lane.b32.xlu0 %v361_v47, %s2679_s0  ;;  %597 = vrot.lane.b32.xlu1 %v456_v52, %s2679_s0 }
 0x1cc   :  { %v371_v57 = vpop.f32.mrf.mxu0  ;;  %v464_v60 = vpop.f32.mrf.mxu1 }
 0x1ce   :  { %v373_v59 = vpop.f32.mrf.mxu0  ;;  %v466_v61 = vpop.f32.mrf.mxu1 }
 0x1cf   :  { %603 = vrot.lane.b32.xlu0 %v454_v50, %s2679_s0  ;;  %589 = vrot.lane.b32.xlu1 %v365_v53, %s2679_s0 }
 0x1d0   :  { %v375_v62 = vpop.f32.mrf.mxu0  ;;  %v468_v0 = vpop.f32.mrf.mxu1 }
 0x1d3   :  { %605 = vrot.lane.b32.xlu1 %v458_v56, %s2679_s0  ;;  %583 = vrot.lane.b32.xlu0 %v369_v55, %s2679_s0 }
 0x1d7   :  { %599 = vrot.lane.b32.xlu0 %v462_v58, %s2679_s0  ;;  %585 = vrot.lane.b32.xlu1 %v373_v59, %s2679_s0  ;;  %v507_v58 = vlaneseq }
 0x1db   :  { %591 = vrot.lane.b32.xlu0 %v371_v57, %s2679_s0  ;;  %601 = vrot.lane.b32.xlu1 %v466_v61, %s2679_s0  ;;  %v2988_v61 = vld [vmem:[%s4122_s2] sm:$0xf] }
 0x1dc   :  { %4219 = vst [vmem:[#allocation19_spill] sm:$0xff] %v2988_v61  ;;  %vm471_vm2 = vcmp.ge.s32.totalorder %v2988_v61, 1  ;;  %vm473_vm4 = vcmp.lt.s32.totalorder %v2988_v61, 255 }
 0x1dd   :  { %v474_v42 = vsel %vm473_vm4, 1.0, %v4222_v43 }
 0x1df   :  { %607 = vrot.lane.b32.xlu0 %v464_v60, %s2679_s0  ;;  %593 = vrot.lane.b32.xlu1 %v375_v62, %s2679_s0  ;;  %v528_v62 = vshrl.u32 %v507_v58, 7 }
 0x1e1   :  { %v3007_v1 = vsub.s32 0, %v528_v62 }
 0x1e3   :  { %687 = vperm.xlu0 %2641, %v681_v63   ;;  %609 = vrot.lane.b32.xlu1 %v468_v0, %s2679_s0  ;;  %v2991_v63 = vand.u32 127, %v507_v58  ;;  %4221 = vst [vmem:[#allocation21_spill] sm:$0xff] %v3007_v1  ;;  %v3009_v58 = vsub.s32 3, %v528_v62 }
 0x1e5   :  { %vm509_vm3 = vcmp.lt.s32.totalorder %v2991_v63, 1  ;;  %vm611_vm5 = vcmp.lt.s32.totalorder %v2991_v63, 127  ;;  %v3052_v37 = vrot.slane %v474_v42, %v3009_v58  ;;  %vm1239_vm7 = vcmp.lt.s32.totalorder %v2991_v63, 2 }
 0x1e6   :  { %vm1341_vm9 = vcmp.lt.s32.totalorder %v2991_v63, 126  ;;  %vm1951_vm11 = vcmp.lt.s32.totalorder %v2991_v63, 3  ;;  %vm2053_vm13 = vcmp.lt.s32.totalorder %v2991_v63, 125 }
 0x1e7   :  { %765 = vperm.xlu0 %2641, %v751_v2   ;;  %692 = vperm.xlu1 %2642, %v682_v3   ;;  %v2997_v3 = vsub.s32 1, %v528_v62 }
 0x1e9   :  { %4220 = vst [vmem:[#allocation20_spill] sm:$0xff] %v2997_v3 }
 0x1eb   :  { %755 = vperm.xlu0 %2641, %v749_v4   ;;  %770 = vperm.xlu1 %2642, %v752_v5   ;;  %v2999_v4 = vsub.s32 2, %v528_v62  ;;  %v4132_v5 = vmov 0.0  }
 0x1ef   :  { %1428 = vperm.xlu0 %2641, %v2566_v6   ;;  %760 = vperm.xlu1 %2642, %v750_v7   ;;  %v472_v6 = vsel %vm471_vm2, 1.0, %v4132_v5 }
 0x1f0   :  { %v534_v41 = vrot.slane %v472_v6, %v2997_v3  ;;  %v538_v54 = vrot.slane %v472_v6, %v2999_v4  ;;  %v530_v48 = vrot.slane %v472_v6, %v3007_v1  ;;  %v542_v62 = vrot.slane %v472_v6, %v3009_v58 }
 0x1f3   :  { %1433 = vperm.xlu1 %2642, %v2567_v8  }
 0x215   :  { %v476_v11 = vpop.permute.xlu0 %475 }
 0x219   :  { %v492_v12 = vpop.permute.xlu0 %491  ;;  %v2975_v13 = vpop.permute.xlu1 %477 }
 0x21d   :  { %v484_v14 = vpop.permute.xlu0 %483  ;;  %v2977_v15 = vpop.permute.xlu1 %493 }
 0x21e   :  { %v514_v40 = vsel %vm509_vm3, %v484_v14, %v492_v12  ;;  %v518_v5 = vsel %vm509_vm3, %v476_v11, %v484_v14 }
 0x21f   :  { %v548_v45 = vmul.f32 %v534_v41, %v518_v5  ;;  %v549_v44 = vmul.f32 %v538_v54, %v514_v40 }
 0x221   :  { %v500_v36 = vpop.permute.xlu0 %499  ;;  %v486_v46 = vpop.permute.xlu1 %485  ;;  %v3055_v32 = vadd.f32 %v548_v45, %v2896_v18 }
 0x222   :  { %v510_v61 = vsel %vm509_vm3, %v492_v12, %v500_v36  ;;  %v522_v34 = vsel %vm509_vm3, %v500_v36, %v476_v11  ;;  %v515_v14 = vsel %vm509_vm3, %v486_v46, %v2977_v15  ;;  %v519_v33 = vsel %vm509_vm3, %v2975_v13, %v486_v46 }
 0x223   :  { %v3041_v12 = vrot.slane %v474_v42, %v3007_v1  ;;  %v3044_v11 = vrot.slane %v474_v42, %v2997_v3  ;;  %v547_v43 = vmul.f32 %v530_v48, %v522_v34  ;;  %v550_v38 = vmul.f32 %v542_v62, %v510_v61 }
 0x224   :  { %v3049_v46 = vrot.slane %v474_v42, %v2999_v4  ;;  %v552_v31 = vmul.f32 %v534_v41, %v519_v33  ;;  %v553_v3 = vmul.f32 %v538_v54, %v515_v14 }
 0x225   :  { %v2979_v47 = vpop.permute.xlu1 %501  ;;  %v480_v50 = vpop.permute.xlu0 %479 }
 0x229   :  { %v496_v51 = vpop.permute.xlu0 %495  ;;  %v2981_v52 = vpop.permute.xlu1 %481 }
 0x22d   :  { %v488_v53 = vpop.permute.xlu0 %487  ;;  %v498_v55 = vpop.permute.xlu1 %497 }
 0x22e   :  { %v516_v5 = vsel %vm509_vm3, %v488_v53, %v496_v51  ;;  %v520_v40 = vsel %vm509_vm3, %v480_v50, %v488_v53  ;;  %v3058_v53 = vadd.f32 %v549_v44, %v2892_v17 }
 0x22f   :  { %v556_v1 = vmul.f32 %v534_v41, %v520_v40  ;;  %v557_v23 = vmul.f32 %v538_v54, %v516_v5 }
 0x231   :  { %v504_v56 = vpop.permute.xlu0 %503  ;;  %v490_v57 = vpop.permute.xlu1 %489  ;;  %v572_v40 = vadd.f32 %v556_v1, %v2916_v26 }
 0x232   :  { %v512_v34 = vsel %vm509_vm3, %v496_v51, %v504_v56  ;;  %v524_v61 = vsel %vm509_vm3, %v504_v56, %v480_v50  ;;  %v517_v42 = vsel %vm509_vm3, %v490_v57, %v498_v55  ;;  %v521_v45 = vsel %vm509_vm3, %v2981_v52, %v490_v57 }
 0x233   :  { %v3075_v51 = vadd.f32 %v547_v43, %v2890_v16  ;;  %v3078_v50 = vadd.f32 %v550_v38, %v2898_v19  ;;  %v511_v56 = vsel %vm509_vm3, %v2977_v15, %v2979_v47  ;;  %v3092_v57 = vadd.f32 %v553_v3, %v2902_v21 }
 0x234   :  { %v555_v43 = vmul.f32 %v530_v48, %v524_v61  ;;  %v558_v16 = vmul.f32 %v542_v62, %v512_v34  ;;  %v560_v38 = vmul.f32 %v534_v41, %v521_v45  ;;  %v561_v19 = vmul.f32 %v538_v54, %v517_v42 }
 0x235   :  { %v506_v59 = vpop.permute.xlu1 %505  ;;  %v2983_v60 = vpop.permute.xlu0 %579  ;;  %v3096_v15 = vmul.f32 %v542_v62, %v511_v56 }
 0x236   :  { %v513_v44 = vsel %vm509_vm3, %v498_v55, %v506_v59  ;;  %v525_v33 = vsel %vm509_vm3, %v506_v59, %v2981_v52  ;;  %v523_v55 = vsel %vm509_vm3, %v2979_v47, %v2975_v13  ;;  %v3089_v52 = vadd.f32 %v552_v31, %v2906_v22 }
 0x237   :  { %v559_v59 = vmul.f32 %v530_v48, %v525_v33  ;;  %v562_v14 = vmul.f32 %v542_v62, %v513_v44  ;;  %v3094_v5 = vmul.f32 %v530_v48, %v523_v55  ;;  %v573_v13 = vadd.f32 %v557_v23, %v2912_v25 }
 0x238   :  { %v571_v54 = vadd.f32 %v555_v43, %v2910_v24  ;;  %v574_v22 = vadd.f32 %v558_v16, %v2918_v27  ;;  %v576_v26 = vadd.f32 %v560_v38, %v2926_v30  ;;  %v577_v3 = vadd.f32 %v561_v19, %v2922_v29 }
 0x239   :  { %v2993_v0 = vpop.permute.xlu0 %595  ;;  %v2995_v2 = vpop.permute.xlu1 %581  ;;  %v578_v62 = vadd.f32 %v562_v14, %v2928_v35 }
 0x23d   :  { %v3003_v7 = vpop.permute.xlu0 %587  ;;  %v3005_v8 = vpop.permute.xlu1 %597 }
 0x23e   :  { %v616_v21 = vsel %vm611_vm5, %v3003_v7, %v2993_v0  ;;  %v620_v41 = vsel %vm611_vm5, %v2983_v60, %v3003_v7  ;;  %v575_v7 = vadd.f32 %v559_v59, %v2920_v28 }
 0x23f   :  { %v649_v34 = vmul.f32 %v3041_v12, %v620_v41  ;;  %v650_v61 = vmul.f32 %v3044_v11, %v616_v21 }
 0x241   :  { %v3018_v39 = vpop.permute.xlu0 %603  ;;  %v3020_v49 = vpop.permute.xlu1 %589 }
 0x242   :  { %v612_v35 = vsel %vm611_vm5, %v2993_v0, %v3018_v39  ;;  %v617_v55 = vsel %vm611_vm5, %v3020_v49, %v3005_v8  ;;  %v621_v0 = vsel %vm611_vm5, %v2995_v2, %v3020_v49 }
 0x243   :  { %v651_v21 = vmul.f32 %v3049_v46, %v612_v35 }
 0x245   :  { %v3046_v36 = vpop.permute.xlu1 %605  ;;  %v584_v6 = vpop.permute.xlu0 %583 }
 0x249   :  { %v600_v17 = vpop.permute.xlu0 %599  ;;  %v586_v18 = vpop.permute.xlu1 %585 }
 0x24d   :  { %v592_v47 = vpop.permute.xlu0 %591  ;;  %v602_v31 = vpop.permute.xlu1 %601 }
 0x24e   :  { %v618_v48 = vsel %vm611_vm5, %v592_v47, %v600_v17  ;;  %v622_v1 = vsel %vm611_vm5, %v584_v6, %v592_v47 }
 0x24f   :  { %v657_v23 = vmul.f32 %v3041_v12, %v622_v1  ;;  %v658_v25 = vmul.f32 %v3044_v11, %v618_v48  ;;  %v613_v1 = vsel %vm611_vm5, %v3005_v8, %v3046_v36 }
 0x251   :  { %v673_v42 = vadd.f32 %v657_v23, %v571_v54  ;;  %v674_v24 = vadd.f32 %v658_v25, %v572_v40  ;;  %v608_v45 = vpop.permute.xlu0 %607  ;;  %v594_v27 = vpop.permute.xlu1 %593 }
 0x252   :  { %v614_v44 = vsel %vm611_vm5, %v600_v17, %v608_v45  ;;  %v626_v30 = vsel %vm611_vm5, %v608_v45, %v584_v6  ;;  %v619_v29 = vsel %vm611_vm5, %v594_v27, %v602_v31  ;;  %v623_v28 = vsel %vm611_vm5, %v586_v18, %v594_v27 }
 0x253   :  { %v659_v33 = vmul.f32 %v3049_v46, %v614_v44  ;;  %v660_v56 = vmul.f32 %v3052_v37, %v626_v30  ;;  %v661_v17 = vmul.f32 %v3041_v12, %v623_v28  ;;  %v624_v6 = vsel %vm611_vm5, %v3018_v39, %v2983_v60 }
 0x254   :  { %v662_v43 = vmul.f32 %v3044_v11, %v619_v29  ;;  %v713_v16 = vadd.f32 %v2971_v9, %v673_v42  ;;  %v714_v14 = vadd.f32 %v2971_v9, %v674_v24  ;;  %v652_v48 = vmul.f32 %v3052_v37, %v624_v6 }
 0x255   :  { %v675_v38 = vadd.f32 %v659_v33, %v573_v13  ;;  %v677_v19 = vadd.f32 %v661_v17, %v575_v7  ;;  %v610_v59 = vpop.permute.xlu1 %609  ;;  %v676_v39 = vadd.f32 %v660_v56, %v574_v22  ;;  %v665_v45 = vadd.f32 %v649_v34, %v3075_v51 }
 0x256   :  { %v678_v60 = vadd.f32 %v662_v43, %v576_v26  ;;  %v615_v40 = vsel %vm611_vm5, %v602_v31, %v610_v59  ;;  %v627_v47 = vsel %vm611_vm5, %v610_v59, %v586_v18  ;;  %v625_v18 = vsel %vm611_vm5, %v3046_v36, %v2995_v2 }
 0x257   :  { %v717_v49 = vadd.f32 %v2973_v10, %v677_v19  ;;  %v663_v41 = vmul.f32 %v3049_v46, %v615_v40  ;;  %v664_v13 = vmul.f32 %v3052_v37, %v627_v47  ;;  %v729_v54 = vmax.f32 %v713_v16, 0.0 }
 0x258   :  { %v718_v31 = vadd.f32 %v2973_v10, %v678_v60  ;;  %v715_v26 = vadd.f32 %v2971_v9, %v675_v38  ;;  %v730_v7 = vmax.f32 %v714_v14, 0.0  ;;  %v716_v24 = vadd.f32 %v2971_v9, %v676_v39 }
 0x259   :  { %v733_v22 = vmax.f32 %v717_v49, 0.0  ;;  %v679_v23 = vadd.f32 %v663_v41, %v577_v3  ;;  %v680_v25 = vadd.f32 %v664_v13, %v578_v62  ;;  %v666_v2 = vadd.f32 %v650_v61, %v3055_v32  ;;  %v2657_v41 = vld [vmem:[%s4121_s7] sm:$0xff]  }
 0x25a   :  { %v734_v42 = vmax.f32 %v718_v31, 0.0  ;;  %v653_v36 = vmul.f32 %v3041_v12, %v621_v0  ;;  %v654_v3 = vmul.f32 %v3044_v11, %v617_v55  ;;  %v655_v30 = vmul.f32 %v3049_v46, %v613_v1  ;;  %v4223_v12 = vld [vmem:[#allocation18_spill] sm:$0xff] }
 0x25b   :  { %v719_v8 = vadd.f32 %v2973_v10, %v679_v23  ;;  %v745_v27 = vpack.c.bf16 %v733_v22, %v729_v54  ;;  %v720_v44 = vadd.f32 %v2973_v10, %v680_v25  ;;  %v656_v29 = vmul.f32 %v3052_v37, %v625_v18 }
 0x25c   :  { %v746_v62 = vpack.c.bf16 %v734_v42, %v730_v7  ;;  %v667_v51 = vadd.f32 %v651_v21, %v3058_v53  ;;  %v668_v34 = vadd.f32 %v652_v48, %v3078_v50  ;;  %v731_v35 = vmax.f32 %v715_v26, 0.0  ;;  %v2658_v48 = vld [vmem:[%s4121_s7 + $0x8] sm:$0xff]   ;;  %v43_v7 = vld [vmem:[%s4123_s1] sm:$0xf]  ;;  %s2683_s1 = smov 3  }
 0x25d   :  { %v735_v28 = vmax.f32 %v719_v8, 0.0  ;;  %v736_v9 = vmax.f32 %v720_v44, 0.0  ;;  %v732_v33 = vmax.f32 %v716_v24, 0.0  ;;  %v567_v32 = vadd.f32 %v3094_v5, %v2900_v20 }
 0x25e   :  { %801 = vmatprep.subr.bf16.mxu0 %v746_v62  ;;  %v688_v10 = vpop.permute.xlu0 %687  ;;  %v570_v11 = vadd.f32 %v3096_v15, %v4223_v12  ;;  %v670_v50 = vadd.f32 %v654_v3, %v3089_v52  ;;  %v671_v55 = vadd.f32 %v655_v30, %v3092_v57  ;;  %v4224_v13 = vmov 0   ;;  %v4228_v62 = vld [vmem:[#allocation20_spill] sm:$0xff] }
 0x25f   :  { %v705_v61 = vadd.f32 %v688_v10, %v665_v45  ;;  %v706_v46 = vadd.f32 %v688_v10, %v666_v2  ;;  %802 = vmatpush1.bf16.msra.mxu0 %v745_v27  ;;  %v707_v37 = vadd.f32 %v688_v10, %v667_v51  ;;  %v708_v56 = vadd.f32 %v688_v10, %v668_v34  ;;  %v4225_v2 = vld [vmem:[#allocation21_spill] sm:$0xff] }
 0x260   :  { %v748_v17 = vpack.c.bf16 %v736_v9, %v732_v33  ;;  %v747_v6 = vpack.c.bf16 %v735_v28, %v731_v35  ;;  %v669_v53 = vadd.f32 %v653_v36, %v567_v32  ;;  %v672_v0 = vadd.f32 %v656_v29, %v570_v11 }
 0x261   :  { %v721_v38 = vmax.f32 %v705_v61, 0.0  ;;  %v723_v19 = vmax.f32 %v707_v37, 0.0  ;;  %v722_v59 = vmax.f32 %v706_v46, 0.0  ;;  %v724_v14 = vmax.f32 %v708_v56, 0.0 }
 0x262   :  { %854 = vmatprep.subr.bf16.mxu1 %v748_v17  ;;  %v693_v43 = vpop.permute.xlu1 %692  ;;  %v766_v22 = vpop.permute.xlu0 %765  ;;  %v3206_v36 = vrot.slane %v43_v7, %v4225_v2  ;;  %v3209_v3 = vrot.slane %v43_v7, %v2999_v4  ;;  %v3212_v30 = vrot.slane %v43_v7, %v4228_v62  ;;  %v3215_v29 = vrot.slane %v43_v7, %v3009_v58  ;;  %v4243_v7 = vld [vmem:[#allocation8_spill] sm:$0xff] }
 0x263   :  { %855 = vmatpush1.bf16.msra.mxu1 %v747_v6  ;;  %v709_v20 = vadd.f32 %v693_v43, %v669_v53  ;;  %v710_v5 = vadd.f32 %v693_v43, %v670_v50  ;;  %v711_v16 = vadd.f32 %v693_v43, %v671_v55  ;;  %v712_v15 = vadd.f32 %v693_v43, %v672_v0  ;;  %v4231_v55 = vld [vmem:[#allocation2_spill] sm:$0xff]  ;;  %v4232_v43 = vld [vmem:[#allocation3_spill] sm:$0xff] }
 0x264   :  { %4226 = vst [vmem:[#allocation18_spill] sm:$0xff] %v3206_v36  ;;  %4227 = vst [vmem:[#allocation22_spill] sm:$0xff] %v3209_v3 }
 0x265   :  { %v725_v39 = vmax.f32 %v709_v20, 0.0  ;;  %v727_v60 = vmax.f32 %v711_v16, 0.0  ;;  %v726_v40 = vmax.f32 %v710_v5, 0.0  ;;  %v728_v47 = vmax.f32 %v712_v15, 0.0  ;;  %4229 = vst [vmem:[#allocation23_spill] sm:$0xff] %v3212_v30  ;;  %4230 = vst [vmem:[#allocation24_spill] sm:$0xff] %v3215_v29 }
 0x266   :  { %v771_v23 = vpop.permute.xlu1 %770  ;;  %v756_v27 = vpop.permute.xlu0 %755  ;;  %v4233_v5 = vld [vmem:[#allocation6_spill] sm:$0xff]  ;;  %v4234_v15 = vld [vmem:[#allocation7_spill] sm:$0xff] }
 0x267   :  { %v742_v21 = vpack.c.bf16 %v726_v40, %v722_v59  ;;  %v744_v52 = vpack.c.bf16 %v728_v47, %v724_v14  ;;  %v741_v49 = vpack.c.bf16 %v725_v39, %v721_v38  ;;  %v743_v57 = vpack.c.bf16 %v727_v60, %v723_v19  ;;  %v4235_v14 = vld [vmem:[#allocation4_spill] sm:$0xff]  ;;  %v4236_v60 = vld [vmem:[#allocation5_spill] sm:$0xff] }
 0x269   :  { %803 = vmatprep.subr.bf16.mxu0 %v742_v21  ;;  %856 = vmatprep.subr.bf16.mxu1 %v744_v52  ;;  %v4237_v52 = vld [vmem:[#allocation13_spill] sm:$0xff] }
 0x26a   :  { %804 = vmatpush1.bf16.msra.mxu0 %v741_v49  ;;  %857 = vmatpush1.bf16.msra.mxu1 %v743_v57  ;;  %v761_v44 = vpop.permute.xlu1 %760  ;;  %v4238_v57 = vld [vmem:[#allocation14_spill] sm:$0xff] }
 0x26d   :  { %2530 = vmatmul.mubr.msk.bf16.vlgmr.msra.gmra.mxu0 %vm266_vm1, %v2657_v41  ;;  %2532 = vmatmul.mubr.msk.bf16.vlgmr.msra.gmra.mxu1 %vm266_vm1, %v2657_v41 }
 0x26e   :  { %831 = vmatprep.mubr.bf16.mxu0 %v4224_v13  ;;  %884 = vmatprep.mubr.bf16.mxu1 %v4224_v13 }
 0x275   :  { %2531 = vmatmul.mubr.msk.bf16.gmra.mxu0 %vm266_vm1, %v2658_v48  ;;  %2533 = vmatmul.mubr.msk.bf16.gmra.mxu1 %vm266_vm1, %v2658_v48  ;;  %v4239_v48 = vld [vmem:[#allocation11_spill] sm:$0xff] }
 0x276   :  { %1049 = vmatprep.mubr.bf16.mxu0 %v4224_v13  ;;  %1142 = vmatprep.mubr.bf16.mxu1 %v4224_v13 }
 0x32d   :  { %v823_v1 = vpop.f32.mrf.mxu0  ;;  %v876_v18 = vpop.f32.mrf.mxu1 }
 0x32e   :  { %v824_v35 = vadd.f32 %v823_v1, %v756_v27  ;;  %v877_v10 = vadd.f32 %v876_v18, %v756_v27  ;;  %v4240_v18 = vld [vmem:[#allocation12_spill] sm:$0xff] }
 0x32f   :  { %v825_v31 = vpop.f32.mrf.mxu0  ;;  %v878_v54 = vpop.f32.mrf.mxu1 }
 0x330   :  { %v826_v33 = vadd.f32 %v825_v31, %v756_v27  ;;  %v879_v32 = vadd.f32 %v878_v54, %v756_v27  ;;  %v4241_v54 = vld [vmem:[#allocation15_spill] sm:$0xff] }
 0x331   :  { %v827_v25 = vpop.f32.mrf.mxu0  ;;  %v880_v26 = vpop.f32.mrf.mxu1 }
 0x332   :  { %v828_v17 = vadd.f32 %v827_v25, %v761_v44  ;;  %v881_v6 = vadd.f32 %v880_v26, %v761_v44  ;;  %v896_v49 = vadd.f32 %v826_v33, %v4237_v52  ;;  %v898_v41 = vadd.f32 %v879_v32, %v4238_v57  ;;  %v4242_v25 = vld [vmem:[#allocation16_spill] sm:$0xff]  ;;  %v4253_v33 = vld [vmem:[#allocation17_spill] sm:$0xff] }
 0x333   :  { %v829_v42 = vpop.f32.mrf.mxu0  ;;  %v882_v24 = vpop.f32.mrf.mxu1  ;;  %v895_v32 = vadd.f32 %v824_v35, %v4253_v33 }
 0x334   :  { %v830_v28 = vadd.f32 %v829_v42, %v761_v44  ;;  %v883_v9 = vadd.f32 %v882_v24, %v761_v44  ;;  %v901_v26 = vadd.f32 %v881_v6, %v4242_v25  ;;  %v4244_v24 = vld [vmem:[#allocation9_spill] sm:$0xff] }
 0x335   :  { %v833_v45 = vpop.f32.mrf.mxu0  ;;  %v886_v8 = vpop.f32.mrf.mxu1 }
 0x336   :  { %v834_v12 = vadd.f32 %v833_v45, %v766_v22  ;;  %v887_v11 = vadd.f32 %v886_v8, %v766_v22  ;;  %v900_v0 = vadd.f32 %v830_v28, %v4231_v55  ;;  %v902_v20 = vadd.f32 %v883_v9, %v4232_v43 }
 0x337   :  { %v835_v51 = vpop.f32.mrf.mxu0  ;;  %v888_v34 = vpop.f32.mrf.mxu1  ;;  %v3277_v6 = vmul.f32 %v3209_v3, %v901_v26  ;;  %v3288_v43 = vmul.f32 %v3206_v36, %v895_v32 }
 0x338   :  { %v836_v61 = vadd.f32 %v835_v51, %v766_v22  ;;  %v889_v46 = vadd.f32 %v888_v34, %v766_v22  ;;  %v903_v1 = vadd.f32 %v834_v12, %v4239_v48  ;;  %v905_v31 = vadd.f32 %v887_v11, %v4240_v18  ;;  %v4254_v12 = vld [vmem:[#allocation10_spill] sm:$0xff] }
 0x339   :  { %v837_v37 = vpop.f32.mrf.mxu0  ;;  %v890_v56 = vpop.f32.mrf.mxu1  ;;  %v899_v22 = vadd.f32 %v828_v17, %v4241_v54  ;;  %v3232_v8 = vmul.f32 %v3212_v30, %v900_v0  ;;  %v897_v11 = vadd.f32 %v877_v10, %v4254_v12  ;;  %4260 = vst [vmem:[#allocation9_spill] sm:$0xff] %v3277_v6  ;;  %4261 = vst [vmem:[#allocation17_spill] sm:$0xff] %v3288_v43 }
 0x33a   :  { %v838_v53 = vadd.f32 %v837_v37, %v771_v23  ;;  %v891_v50 = vadd.f32 %v890_v56, %v771_v23  ;;  %v904_v16 = vadd.f32 %v836_v61, %v4233_v5  ;;  %v906_v38 = vadd.f32 %v889_v46, %v4234_v15  ;;  %v2659_v15 = vld [vmem:[%s4119_s5 + $0x30] sm:$0xff]  }
 0x33b   :  { %v839_v19 = vpop.f32.mrf.mxu0  ;;  %v892_v59 = vpop.f32.mrf.mxu1  ;;  %4245 = vst [vmem:[#allocation2_spill] sm:$0xff] %v3232_v8  ;;  %v3258_v61 = vmul.f32 %v3206_v36, %v903_v1  ;;  %v3261_v46 = vmul.f32 %v3209_v3, %v905_v31  ;;  %v3264_v37 = vmul.f32 %v3212_v30, %v896_v49  ;;  %v3267_v56 = vmul.f32 %v3215_v29, %v898_v41 }
 0x33c   :  { %v907_v39 = vadd.f32 %v838_v53, %v4235_v14  ;;  %v909_v40 = vadd.f32 %v891_v50, %v4236_v60  ;;  %v840_v47 = vadd.f32 %v839_v19, %v771_v23  ;;  %v893_v21 = vadd.f32 %v892_v59, %v771_v23  ;;  %v2661_v19 = vld [vmem:[%s4119_s5 + $0x40] sm:$0xff]   ;;  %v2662_v59 = vld [vmem:[%s4119_s5 + $0x48] sm:$0xff]   ;;  %v2663_v14 = vld [vmem:[%s4119_s5 + $0x50] sm:$0xff]  }
 0x33d   :  { %v3235_v23 = vmul.f32 %v3215_v29, %v902_v20  ;;  %v3244_v28 = vmul.f32 %v3212_v30, %v904_v16  ;;  %v3247_v9 = vmul.f32 %v3215_v29, %v906_v38  ;;  %4255 = vst [vmem:[#allocation11_spill] sm:$0xff] %v3258_v61  ;;  %4256 = vst [vmem:[#allocation12_spill] sm:$0xff] %v3261_v46  ;;  %v2660_v38 = vld [vmem:[%s4119_s5 + $0x38] sm:$0xff]  }
 0x33e   :  { %v908_v42 = vadd.f32 %v840_v47, %v4243_v7  ;;  %v910_v45 = vadd.f32 %v893_v21, %v4244_v24  ;;  %v3238_v27 = vmul.f32 %v3206_v36, %v907_v39  ;;  %v3241_v44 = vmul.f32 %v3209_v3, %v909_v40  ;;  %4257 = vst [vmem:[#allocation15_spill] sm:$0xff] %v3264_v37  ;;  %v2664_v39 = vld [vmem:[%s4119_s5 + $0x58] sm:$0xff]  }
 0x33f   :  { %4246 = vst [vmem:[#allocation3_spill] sm:$0xff] %v3235_v23  ;;  %4249 = vst [vmem:[#allocation4_spill] sm:$0xff] %v3244_v28  ;;  %v3274_v10 = vmul.f32 %v3206_v36, %v899_v22  ;;  %v949_v55 = vpack.c.bf16 %v3232_v8, %v3264_v37  ;;  %v951_v0 = vpack.c.bf16 %v3235_v23, %v3267_v56 }
 0x340   :  { %4247 = vst [vmem:[#allocation6_spill] sm:$0xff] %v3238_v27  ;;  %4248 = vst [vmem:[#allocation7_spill] sm:$0xff] %v3241_v44  ;;  %v3250_v51 = vmul.f32 %v3212_v30, %v908_v42  ;;  %v3253_v34 = vmul.f32 %v3215_v29, %v910_v45  ;;  %v952_v53 = vpack.c.bf16 %v3238_v27, %v3258_v61 }
 0x341   :  { %4250 = vst [vmem:[#allocation5_spill] sm:$0xff] %v3247_v9  ;;  %4258 = vst [vmem:[#allocation16_spill] sm:$0xff] %v3267_v56  ;;  %v954_v50 = vpack.c.bf16 %v3241_v44, %v3261_v46  ;;  %v3291_v20 = vmul.f32 %v3209_v3, %v897_v11  ;;  %v948_v5 = vpack.c.bf16 %v3274_v10, %v3288_v43 }
 0x342   :  { %4251 = vst [vmem:[#allocation13_spill] sm:$0xff] %v3250_v51  ;;  %4252 = vst [vmem:[#allocation14_spill] sm:$0xff] %v3253_v34  ;;  %v953_v17 = vpack.c.bf16 %v3250_v51, %v3244_v28  ;;  %v955_v35 = vpack.c.bf16 %v3253_v34, %v3247_v9 }
 0x343   :  { %4259 = vst [vmem:[#allocation8_spill] sm:$0xff] %v3274_v10  ;;  %4262 = vst [vmem:[#allocation10_spill] sm:$0xff] %v3291_v20  ;;  %v950_v16 = vpack.c.bf16 %v3277_v6, %v3291_v20  ;;  %v4265_v20 = vmov 0.0  }
 0x344   :  { %1029 = vmatprep.subr.bf16.mxu0 %v953_v17  ;;  %1122 = vmatprep.subr.bf16.mxu1 %v955_v35 }
 0x345   :  { %1030 = vmatpush1.bf16.msra.mxu0 %v952_v53  ;;  %1123 = vmatpush1.bf16.msra.mxu1 %v954_v50 }
 0x346   :  { %1031 = vmatprep.subr.bf16.mxu0 %v949_v55  ;;  %1124 = vmatprep.subr.bf16.mxu1 %v951_v0 }
 0x349   :  { %1032 = vmatpush1.bf16.msra.mxu0 %v948_v5  ;;  %1125 = vmatpush1.bf16.msra.mxu1 %v950_v16 }
 0x34c   :  { %2552 = vmatmul.mubr.msk.bf16.vlgmr.msra.gmra.mxu0 %vm266_vm1, %v2659_v15  ;;  %2558 = vmatmul.mubr.msk.bf16.vlgmr.msra.gmra.mxu1 %vm266_vm1, %v2659_v15 }
 0x34d   :  { %1059 = vmatprep.mubr.bf16.mxu0 %v4224_v13  ;;  %1152 = vmatprep.mubr.bf16.mxu1 %v4224_v13 }
 0x354   :  { %2553 = vmatmul.mubr.msk.bf16.gmra.mxu0 %vm266_vm1, %v2660_v38  ;;  %2559 = vmatmul.mubr.msk.bf16.gmra.mxu1 %vm266_vm1, %v2660_v38 }
 0x355   :  { %1069 = vmatprep.mubr.bf16.mxu0 %v4224_v13  ;;  %1162 = vmatprep.mubr.bf16.mxu1 %v4224_v13 }
 0x35c   :  { %2554 = vmatmul.mubr.msk.bf16.gmra.mxu0 %vm266_vm1, %v2661_v19  ;;  %2560 = vmatmul.mubr.msk.bf16.gmra.mxu1 %vm266_vm1, %v2661_v19 }
 0x35d   :  { %1079 = vmatprep.mubr.bf16.mxu0 %v4224_v13  ;;  %1172 = vmatprep.mubr.bf16.mxu1 %v4224_v13 }
 0x364   :  { %2555 = vmatmul.mubr.msk.bf16.gmra.mxu0 %vm266_vm1, %v2662_v59  ;;  %2561 = vmatmul.mubr.msk.bf16.gmra.mxu1 %vm266_vm1, %v2662_v59 }
 0x365   :  { %1089 = vmatprep.mubr.bf16.mxu0 %v4224_v13  ;;  %1182 = vmatprep.mubr.bf16.mxu1 %v4224_v13 }
 0x36c   :  { %2556 = vmatmul.mubr.msk.bf16.gmra.mxu0 %vm266_vm1, %v2663_v14  ;;  %2562 = vmatmul.mubr.msk.bf16.gmra.mxu1 %vm266_vm1, %v2663_v14 }
 0x36d   :  { %1099 = vmatprep.mubr.bf16.mxu0 %v4224_v13  ;;  %1192 = vmatprep.mubr.bf16.mxu1 %v4224_v13 }
 0x374   :  { %2557 = vmatmul.mubr.msk.bf16.gmra.mxu0 %vm266_vm1, %v2664_v39  ;;  %2563 = vmatmul.mubr.msk.bf16.gmra.mxu1 %vm266_vm1, %v2664_v39 }
 0x375   :  { %1554 = vmatprep.mubr.bf16.mxu0 %v4224_v13  ;;  %1607 = vmatprep.mubr.bf16.mxu1 %v4224_v13 }
 0x40c   :  { %v1051_v60 = vpop.f32.mrf.mxu0  ;;  %v1144_v40 = vpop.f32.mrf.mxu1 }
 0x40d   :  { %1207 = vrot.lane.b32.xlu0 %v1051_v60, %s2681_s24 }
 0x40e   :  { %v1053_v47 = vpop.f32.mrf.mxu0  ;;  %v1146_v21 = vpop.f32.mrf.mxu1 }
 0x410   :  { %v1055_v52 = vpop.f32.mrf.mxu0  ;;  %v1148_v49 = vpop.f32.mrf.mxu1 }
 0x411   :  { %1223 = vrot.lane.b32.xlu0 %v1144_v40, %s2681_s24  ;;  %1209 = vrot.lane.b32.xlu1 %v1055_v52, %s2681_s24 }
 0x412   :  { %v1057_v57 = vpop.f32.mrf.mxu0  ;;  %v1150_v41 = vpop.f32.mrf.mxu1 }
 0x414   :  { %v1061_v48 = vpop.f32.mrf.mxu0  ;;  %v1154_v1 = vpop.f32.mrf.mxu1 }
 0x415   :  { %1215 = vrot.lane.b32.xlu0 %v1053_v47, %s2681_s24  ;;  %1225 = vrot.lane.b32.xlu1 %v1148_v49, %s2681_s24 }
 0x416   :  { %v1063_v18 = vpop.f32.mrf.mxu0  ;;  %v1156_v31 = vpop.f32.mrf.mxu1 }
 0x418   :  { %v1065_v54 = vpop.f32.mrf.mxu0  ;;  %v1158_v22 = vpop.f32.mrf.mxu1 }
 0x419   :  { %1231 = vrot.lane.b32.xlu0 %v1146_v21, %s2681_s24  ;;  %1217 = vrot.lane.b32.xlu1 %v1057_v57, %s2681_s24 }
 0x41a   :  { %v1067_v25 = vpop.f32.mrf.mxu0  ;;  %v1160_v26 = vpop.f32.mrf.mxu1 }
 0x41c   :  { %v3346_v7 = vpop.f32.mrf.mxu0  ;;  %v3348_v42 = vpop.f32.mrf.mxu1 }
 0x41d   :  { %1233 = vrot.lane.b32.xlu1 %v1150_v41, %s2681_s24  ;;  %1211 = vrot.lane.b32.xlu0 %v1061_v48, %s2681_s24 }
 0x41e   :  { %v3352_v24 = vpop.f32.mrf.mxu0  ;;  %v3354_v45 = vpop.f32.mrf.mxu1 }
 0x420   :  { %v3356_v33 = vpop.f32.mrf.mxu0  ;;  %v3358_v32 = vpop.f32.mrf.mxu1 }
 0x421   :  { %1227 = vrot.lane.b32.xlu0 %v1154_v1, %s2681_s24  ;;  %1213 = vrot.lane.b32.xlu1 %v1065_v54, %s2681_s24  ;;  %v2564_v1 = vld [vmem:[%s4118_s6 + $0x20] sm:$0xff]  ;;  %v2565_v54 = vld [vmem:[%s4118_s6 + $0x28] sm:$0xff] }
 0x422   :  { %v3362_v12 = vpop.f32.mrf.mxu0  ;;  %v3364_v11 = vpop.f32.mrf.mxu1 }
 0x423   :  { %4263 = vst [vmem:[#allocation25_spill] sm:$0xff] %v3364_v11 }
 0x424   :  { %v3366_v17 = vpop.f32.mrf.mxu0  ;;  %v3368_v35 = vpop.f32.mrf.mxu1 }
 0x425   :  { %1219 = vrot.lane.b32.xlu0 %v1063_v18, %s2681_s24  ;;  %1229 = vrot.lane.b32.xlu1 %v1158_v22, %s2681_s24  ;;  %v2572_v22 = vld [vmem:[%s4120_s8 + $0x20] sm:$0xff] }
 0x426   :  { %v3372_v53 = vpop.f32.mrf.mxu0  ;;  %v3374_v50 = vpop.f32.mrf.mxu1 }
 0x428   :  { %v3376_v55 = vpop.f32.mrf.mxu0  ;;  %v3378_v0 = vpop.f32.mrf.mxu1 }
 0x429   :  { %1235 = vrot.lane.b32.xlu0 %v1156_v31, %s2681_s24  ;;  %1221 = vrot.lane.b32.xlu1 %v1067_v25, %s2681_s24  ;;  %v2574_v31 = vld [vmem:[%s4120_s8 + $0x30] sm:$0xff]  ;;  %v2575_v25 = vld [vmem:[%s4120_s8 + $0x38] sm:$0xff] }
 0x42a   :  { %v3382_v5 = vpop.f32.mrf.mxu0  ;;  %v3384_v16 = vpop.f32.mrf.mxu1 }
 0x42c   :  { %v1091_v15 = vpop.f32.mrf.mxu0  ;;  %v1184_v38 = vpop.f32.mrf.mxu1 }
 0x42d   :  { %1237 = vrot.lane.b32.xlu1 %v1160_v26, %s2681_s24  ;;  %1309 = vrot.lane.b32.xlu0 %v1091_v15, %s2682_s25  ;;  %v2614_v26 = vld [vmem:[%s4118_s6 + $0x50] sm:$0xff]  ;;  %v2573_v15 = vld [vmem:[%s4120_s8 + $0x28] sm:$0xff] }
 0x42e   :  { %v1093_v19 = vpop.f32.mrf.mxu0  ;;  %v1186_v59 = vpop.f32.mrf.mxu1 }
 0x430   :  { %v1095_v14 = vpop.f32.mrf.mxu0  ;;  %v1188_v39 = vpop.f32.mrf.mxu1 }
 0x431   :  { %1325 = vrot.lane.b32.xlu0 %v1184_v38, %s2682_s25  ;;  %1311 = vrot.lane.b32.xlu1 %v1095_v14, %s2682_s25  ;;  %v2615_v38 = vld [vmem:[%s4118_s6 + $0x58] sm:$0xff] }
 0x432   :  { %v1097_v60 = vpop.f32.mrf.mxu0  ;;  %v1190_v47 = vpop.f32.mrf.mxu1 }
 0x434   :  { %v1101_v40 = vpop.f32.mrf.mxu0  ;;  %v1194_v52 = vpop.f32.mrf.mxu1 }
 0x435   :  { %1317 = vrot.lane.b32.xlu0 %v1093_v19, %s2682_s25  ;;  %1327 = vrot.lane.b32.xlu1 %v1188_v39, %s2682_s25  ;;  %v3427_v19 = vpop.permute.xlu0 %1428 }
 0x436   :  { %v1103_v21 = vpop.f32.mrf.mxu0  ;;  %v1196_v57 = vpop.f32.mrf.mxu1 }
 0x438   :  { %v1105_v49 = vpop.f32.mrf.mxu0  ;;  %v1198_v41 = vpop.f32.mrf.mxu1 }
 0x439   :  { %1333 = vrot.lane.b32.xlu0 %v1186_v59, %s2682_s25  ;;  %1319 = vrot.lane.b32.xlu1 %v1097_v60, %s2682_s25  ;;  %v3429_v59 = vpop.permute.xlu1 %1433 }
 0x43a   :  { %v1107_v48 = vpop.f32.mrf.mxu0  ;;  %v1200_v18 = vpop.f32.mrf.mxu1 }
 0x43d   :  { %1335 = vrot.lane.b32.xlu1 %v1190_v47, %s2682_s25  ;;  %1313 = vrot.lane.b32.xlu0 %v1101_v40, %s2682_s25 }
 0x441   :  { %1329 = vrot.lane.b32.xlu0 %v1194_v52, %s2682_s25  ;;  %1315 = vrot.lane.b32.xlu1 %v1105_v49, %s2682_s25 }
 0x445   :  { %1321 = vrot.lane.b32.xlu0 %v1103_v21, %s2682_s25  ;;  %1331 = vrot.lane.b32.xlu1 %v1198_v41, %s2682_s25 }
 0x449   :  { %1337 = vrot.lane.b32.xlu0 %v1196_v57, %s2682_s25  ;;  %1323 = vrot.lane.b32.xlu1 %v1107_v48, %s2682_s25 }
 0x44d   :  { %1418 = vperm.xlu0 %2641, %v2564_v1   ;;  %1339 = vrot.lane.b32.xlu1 %v1200_v18, %s2682_s25 }
 0x451   :  { %1498 = vperm.xlu0 %2641, %v2574_v31   ;;  %1423 = vperm.xlu1 %2642, %v2565_v54  }
 0x455   :  { %1488 = vperm.xlu0 %2641, %v2572_v22   ;;  %1503 = vperm.xlu1 %2642, %v2575_v25  }
 0x459   :  { %2140 = vperm.xlu0 %2641, %v2614_v26   ;;  %1493 = vperm.xlu1 %2642, %v2573_v15   ;;  %v4264_v26 = vld [vmem:[#allocation19_spill] sm:$0xff] }
 0x45a   :  { %vm1203_vm6 = vcmp.ge.s32.totalorder %v4264_v26, 2  ;;  %vm1205_vm8 = vcmp.lt.s32.totalorder %v4264_v26, 254 }
 0x45b   :  { %v1204_v43 = vsel %vm1203_vm6, 1.0, %v4265_v20  ;;  %v1206_v56 = vsel %vm1205_vm8, 1.0, %v4265_v20 }
 0x45c   :  { %v1264_v29 = vrot.slane %v1204_v43, %v4228_v62  ;;  %v1268_v30 = vrot.slane %v1204_v43, %v2999_v4  ;;  %v1260_v46 = vrot.slane %v1204_v43, %v4225_v2  ;;  %v1272_v61 = vrot.slane %v1204_v43, %v3009_v58 }
 0x45d   :  { %2145 = vperm.xlu1 %2642, %v2615_v38   ;;  %v3478_v43 = vrot.slane %v1206_v56, %v4225_v2  ;;  %v3489_v23 = vrot.slane %v1206_v56, %v3009_v58 }
 0x47f   :  { %v1208_v14 = vpop.permute.xlu0 %1207 }
 0x483   :  { %v1224_v39 = vpop.permute.xlu0 %1223  ;;  %v3431_v60 = vpop.permute.xlu1 %1209 }
 0x487   :  { %v1216_v40 = vpop.permute.xlu0 %1215  ;;  %v3433_v47 = vpop.permute.xlu1 %1225 }
 0x488   :  { %v1244_v34 = vsel %vm1239_vm7, %v1216_v40, %v1224_v39  ;;  %v1248_v51 = vsel %vm1239_vm7, %v1208_v14, %v1216_v40 }
 0x489   :  { %v1278_v37 = vmul.f32 %v1264_v29, %v1248_v51  ;;  %v1279_v44 = vmul.f32 %v1268_v30, %v1244_v34 }
 0x48b   :  { %v1232_v21 = vpop.permute.xlu0 %1231  ;;  %v1218_v52 = vpop.permute.xlu1 %1217  ;;  %v3492_v8 = vadd.f32 %v1278_v37, %v3352_v24 }
 0x48c   :  { %v1240_v26 = vsel %vm1239_vm7, %v1224_v39, %v1232_v21  ;;  %v1252_v27 = vsel %vm1239_vm7, %v1232_v21, %v1208_v14  ;;  %v1245_v40 = vsel %vm1239_vm7, %v1218_v52, %v3433_v47  ;;  %v1249_v9 = vsel %vm1239_vm7, %v3431_v60, %v1218_v52 }
 0x48d   :  { %v3481_v14 = vrot.slane %v1206_v56, %v4228_v62  ;;  %v1277_v20 = vmul.f32 %v1260_v46, %v1252_v27  ;;  %v1280_v28 = vmul.f32 %v1272_v61, %v1240_v26  ;;  %v3486_v52 = vrot.slane %v1206_v56, %v2999_v4 }
 0x48e   :  { %v1282_v2 = vmul.f32 %v1264_v29, %v1249_v9  ;;  %v1283_v62 = vmul.f32 %v1268_v30, %v1245_v40 }
 0x48f   :  { %v1212_v49 = vpop.permute.xlu0 %1211  ;;  %v1234_v57 = vpop.permute.xlu1 %1233  ;;  %v3510_v40 = vadd.f32 %v1277_v20, %v3346_v7 }
 0x493   :  { %v1228_v41 = vpop.permute.xlu0 %1227  ;;  %v1214_v48 = vpop.permute.xlu1 %1213 }
 0x497   :  { %v1220_v1 = vpop.permute.xlu0 %1219  ;;  %v1230_v18 = vpop.permute.xlu1 %1229 }
 0x498   :  { %v1246_v51 = vsel %vm1239_vm7, %v1220_v1, %v1228_v41  ;;  %v1250_v34 = vsel %vm1239_vm7, %v1212_v49, %v1220_v1  ;;  %v3495_v1 = vadd.f32 %v1279_v44, %v3348_v42 }
 0x499   :  { %v1286_v13 = vmul.f32 %v1264_v29, %v1250_v34  ;;  %v1287_v11 = vmul.f32 %v1268_v30, %v1246_v51 }
 0x49b   :  { %v1236_v31 = vpop.permute.xlu0 %1235  ;;  %v1222_v54 = vpop.permute.xlu1 %1221 }
 0x49c   :  { %v1242_v27 = vsel %vm1239_vm7, %v1228_v41, %v1236_v31  ;;  %v1254_v26 = vsel %vm1239_vm7, %v1236_v31, %v1212_v49  ;;  %v1247_v56 = vsel %vm1239_vm7, %v1222_v54, %v1230_v18  ;;  %v1251_v37 = vsel %vm1239_vm7, %v1214_v48, %v1222_v54 }
 0x49d   :  { %v3513_v41 = vadd.f32 %v1280_v28, %v3354_v45  ;;  %v1241_v49 = vsel %vm1239_vm7, %v3433_v47, %v1234_v57  ;;  %v1253_v31 = vsel %vm1239_vm7, %v1234_v57, %v3431_v60  ;;  %v1285_v54 = vmul.f32 %v1260_v46, %v1254_v26 }
 0x49e   :  { %v1288_v20 = vmul.f32 %v1272_v61, %v1242_v27  ;;  %v1290_v7 = vmul.f32 %v1264_v29, %v1251_v37  ;;  %v3527_v51 = vmul.f32 %v1260_v46, %v1253_v31  ;;  %v3529_v34 = vmul.f32 %v1272_v61, %v1241_v49 }
 0x49f   :  { %v3435_v22 = vpop.permute.xlu0 %1309  ;;  %v1238_v25 = vpop.permute.xlu1 %1237  ;;  %v1302_v47 = vadd.f32 %v1286_v13, %v3372_v53  ;;  %v1303_v60 = vadd.f32 %v1287_v11, %v3368_v35 }
 0x4a0   :  { %v1243_v44 = vsel %vm1239_vm7, %v1230_v18, %v1238_v25  ;;  %v1255_v9 = vsel %vm1239_vm7, %v1238_v25, %v1214_v48  ;;  %v3522_v18 = vadd.f32 %v1282_v2, %v3362_v12  ;;  %v3525_v48 = vadd.f32 %v1283_v62, %v3358_v32 }
 0x4a1   :  { %v1291_v25 = vmul.f32 %v1268_v30, %v1247_v56  ;;  %v1289_v28 = vmul.f32 %v1260_v46, %v1255_v9  ;;  %v1292_v45 = vmul.f32 %v1272_v61, %v1243_v44  ;;  %v1301_v61 = vadd.f32 %v1285_v54, %v3366_v17 }
 0x4a2   :  { %v1304_v46 = vadd.f32 %v1288_v20, %v3374_v50  ;;  %v1306_v11 = vadd.f32 %v1290_v7, %v3382_v5 }
 0x4a3   :  { %v3438_v15 = vpop.permute.xlu0 %1325  ;;  %v3440_v38 = vpop.permute.xlu1 %1311  ;;  %v1307_v35 = vadd.f32 %v1291_v25, %v3378_v0  ;;  %v1308_v53 = vadd.f32 %v1292_v45, %v3384_v16 }
 0x4a7   :  { %v3444_v3 = vpop.permute.xlu0 %1317  ;;  %v3446_v36 = vpop.permute.xlu1 %1327 }
 0x4a8   :  { %v1346_v62 = vsel %vm1341_vm9, %v3444_v3, %v3438_v15  ;;  %v1350_v30 = vsel %vm1341_vm9, %v3435_v22, %v3444_v3  ;;  %v1305_v3 = vadd.f32 %v1289_v28, %v3376_v55 }
 0x4a9   :  { %v1379_v27 = vmul.f32 %v3478_v43, %v1350_v30  ;;  %v1380_v26 = vmul.f32 %v3481_v14, %v1346_v62 }
 0x4ab   :  { %v3455_v6 = vpop.permute.xlu0 %1333  ;;  %v3457_v10 = vpop.permute.xlu1 %1319 }
 0x4ac   :  { %v1342_v16 = vsel %vm1341_vm9, %v3438_v15, %v3455_v6  ;;  %v1347_v31 = vsel %vm1341_vm9, %v3457_v10, %v3446_v36  ;;  %v1351_v15 = vsel %vm1341_vm9, %v3440_v38, %v3457_v10 }
 0x4ad   :  { %v1381_v62 = vmul.f32 %v3486_v52, %v1342_v16 }
 0x4af   :  { %v1314_v39 = vpop.permute.xlu0 %1313  ;;  %v3483_v21 = vpop.permute.xlu1 %1335 }
 0x4b3   :  { %v1330_v42 = vpop.permute.xlu0 %1329  ;;  %v1316_v24 = vpop.permute.xlu1 %1315 }
 0x4b7   :  { %v1322_v57 = vpop.permute.xlu0 %1321  ;;  %v1332_v2 = vpop.permute.xlu1 %1331 }
 0x4b8   :  { %v1348_v29 = vsel %vm1341_vm9, %v1322_v57, %v1330_v42  ;;  %v1352_v13 = vsel %vm1341_vm9, %v1314_v39, %v1322_v57 }
 0x4b9   :  { %v1387_v32 = vmul.f32 %v3478_v43, %v1352_v13  ;;  %v1388_v12 = vmul.f32 %v3481_v14, %v1348_v29  ;;  %v1343_v13 = vsel %vm1341_vm9, %v3446_v36, %v3483_v21 }
 0x4bb   :  { %v1403_v56 = vadd.f32 %v1387_v32, %v1301_v61  ;;  %v1404_v17 = vadd.f32 %v1388_v12, %v1302_v47  ;;  %v1338_v37 = vpop.permute.xlu0 %1337  ;;  %v1324_v50 = vpop.permute.xlu1 %1323 }
 0x4bc   :  { %v1344_v44 = vsel %vm1341_vm9, %v1330_v42, %v1338_v37  ;;  %v1356_v5 = vsel %vm1341_vm9, %v1338_v37, %v1314_v39  ;;  %v1349_v0 = vsel %vm1341_vm9, %v1324_v50, %v1332_v2  ;;  %v1353_v55 = vsel %vm1341_vm9, %v1316_v24, %v1324_v50 }
 0x4bd   :  { %v1389_v9 = vmul.f32 %v3486_v52, %v1344_v44  ;;  %v1390_v49 = vmul.f32 %v3489_v23, %v1356_v5  ;;  %v1391_v42 = vmul.f32 %v3478_v43, %v1353_v55  ;;  %v1354_v39 = vsel %vm1341_vm9, %v3455_v6, %v3435_v22 }
 0x4be   :  { %v1392_v54 = vmul.f32 %v3481_v14, %v1349_v0  ;;  %v1444_v20 = vadd.f32 %v3427_v19, %v1403_v56  ;;  %v1445_v45 = vadd.f32 %v3427_v19, %v1404_v17  ;;  %v1382_v29 = vmul.f32 %v3489_v23, %v1354_v39 }
 0x4bf   :  { %v1405_v7 = vadd.f32 %v1389_v9, %v1303_v60  ;;  %v1407_v25 = vadd.f32 %v1391_v42, %v1305_v3  ;;  %v1340_v28 = vpop.permute.xlu1 %1339  ;;  %v1406_v6 = vadd.f32 %v1390_v49, %v1304_v46  ;;  %v1395_v37 = vadd.f32 %v1379_v27, %v3510_v40 }
 0x4c0   :  { %v1408_v22 = vadd.f32 %v1392_v54, %v1306_v11  ;;  %v1345_v47 = vsel %vm1341_vm9, %v1332_v2, %v1340_v28  ;;  %v1357_v57 = vsel %vm1341_vm9, %v1340_v28, %v1316_v24  ;;  %v1355_v24 = vsel %vm1341_vm9, %v3483_v21, %v3440_v38 }
 0x4c1   :  { %v1448_v10 = vadd.f32 %v3429_v59, %v1407_v25  ;;  %v1393_v30 = vmul.f32 %v3486_v52, %v1345_v47  ;;  %v1394_v60 = vmul.f32 %v3489_v23, %v1357_v57  ;;  %v1460_v61 = vmax.f32 %v1444_v20, 0.0 }
 0x4c2   :  { %v1449_v2 = vadd.f32 %v3429_v59, %v1408_v22  ;;  %v1446_v11 = vadd.f32 %v3427_v19, %v1405_v7  ;;  %v1461_v3 = vmax.f32 %v1445_v45, 0.0  ;;  %v1447_v17 = vadd.f32 %v3427_v19, %v1406_v6 }
 0x4c3   :  { %v1464_v46 = vmax.f32 %v1448_v10, 0.0  ;;  %v1409_v32 = vadd.f32 %v1393_v30, %v1307_v35  ;;  %v1410_v12 = vadd.f32 %v1394_v60, %v1308_v53  ;;  %v1396_v38 = vadd.f32 %v1380_v26, %v3492_v8  ;;  %v2665_v30 = vld [vmem:[%s4121_s7 + $0x10] sm:$0xff]  }
 0x4c4   :  { %v1465_v56 = vmax.f32 %v1449_v2, 0.0  ;;  %v1383_v21 = vmul.f32 %v3478_v43, %v1351_v15  ;;  %v1384_v35 = vmul.f32 %v3481_v14, %v1347_v31  ;;  %v1385_v5 = vmul.f32 %v3486_v52, %v1343_v13  ;;  %v4266_v43 = vld [vmem:[#allocation25_spill] sm:$0xff] }
 0x4c5   :  { %v1450_v36 = vadd.f32 %v3429_v59, %v1409_v32  ;;  %v1477_v50 = vpack.c.bf16 %v1464_v46, %v1460_v61  ;;  %v1451_v44 = vadd.f32 %v3429_v59, %v1410_v12  ;;  %v1386_v0 = vmul.f32 %v3489_v23, %v1355_v24 }
 0x4c6   :  { %v1478_v53 = vpack.c.bf16 %v1465_v56, %v1461_v3  ;;  %v1397_v40 = vadd.f32 %v1381_v62, %v3495_v1  ;;  %v1398_v27 = vadd.f32 %v1382_v29, %v3513_v41  ;;  %v1462_v16 = vmax.f32 %v1446_v11, 0.0  ;;  %v2666_v29 = vld [vmem:[%s4121_s7 + $0x18] sm:$0xff]  }
 0x4c7   :  { %v1466_v55 = vmax.f32 %v1450_v36, 0.0  ;;  %v1467_v19 = vmax.f32 %v1451_v44, 0.0  ;;  %v1463_v9 = vmax.f32 %v1447_v17, 0.0  ;;  %v1297_v8 = vadd.f32 %v3527_v51, %v3356_v33 }
 0x4c8   :  { %1534 = vmatprep.subr.bf16.mxu0 %v1478_v53  ;;  %v1419_v59 = vpop.permute.xlu0 %1418  ;;  %v1300_v14 = vadd.f32 %v3529_v34, %v4266_v43  ;;  %v1400_v41 = vadd.f32 %v1384_v35, %v3522_v18  ;;  %v1401_v31 = vadd.f32 %v1385_v5, %v3525_v48  ;;  %v4267_v60 = vmov 0  }
 0x4c9   :  { %v1436_v26 = vadd.f32 %v1419_v59, %v1395_v37  ;;  %v1437_v52 = vadd.f32 %v1419_v59, %v1396_v38  ;;  %1535 = vmatpush1.bf16.msra.mxu0 %v1477_v50  ;;  %v1438_v23 = vadd.f32 %v1419_v59, %v1397_v40  ;;  %v1439_v49 = vadd.f32 %v1419_v59, %v1398_v27 }
 0x4ca   :  { %v1480_v42 = vpack.c.bf16 %v1467_v19, %v1463_v9  ;;  %v1479_v39 = vpack.c.bf16 %v1466_v55, %v1462_v16  ;;  %v1399_v1 = vadd.f32 %v1383_v21, %v1297_v8  ;;  %v1402_v15 = vadd.f32 %v1386_v0, %v1300_v14 }
 0x4cb   :  { %v1452_v7 = vmax.f32 %v1436_v26, 0.0  ;;  %v1454_v25 = vmax.f32 %v1438_v23, 0.0  ;;  %v1453_v28 = vmax.f32 %v1437_v52, 0.0  ;;  %v1455_v45 = vmax.f32 %v1439_v49, 0.0  ;;  %v4268_v52 = vld [vmem:[#allocation2_spill] sm:$0xff]  ;;  %v4269_v49 = vld [vmem:[#allocation3_spill] sm:$0xff] }
 0x4cc   :  { %1587 = vmatprep.subr.bf16.mxu1 %v1480_v42  ;;  %v1424_v54 = vpop.permute.xlu1 %1423  ;;  %v1499_v46 = vpop.permute.xlu0 %1498 }
 0x4cd   :  { %1588 = vmatpush1.bf16.msra.mxu1 %v1479_v39  ;;  %v1440_v33 = vadd.f32 %v1424_v54, %v1399_v1  ;;  %v1441_v51 = vadd.f32 %v1424_v54, %v1400_v41  ;;  %v1442_v20 = vadd.f32 %v1424_v54, %v1401_v31  ;;  %v1443_v34 = vadd.f32 %v1424_v54, %v1402_v15  ;;  %v4270_v39 = vld [vmem:[#allocation4_spill] sm:$0xff]  ;;  %v4271_v41 = vld [vmem:[#allocation5_spill] sm:$0xff] }
 0x4cf   :  { %v1456_v6 = vmax.f32 %v1440_v33, 0.0  ;;  %v1458_v22 = vmax.f32 %v1442_v20, 0.0  ;;  %v1457_v47 = vmax.f32 %v1441_v51, 0.0  ;;  %v1459_v57 = vmax.f32 %v1443_v34, 0.0  ;;  %v4272_v33 = vld [vmem:[#allocation6_spill] sm:$0xff]  ;;  %v4273_v20 = vld [vmem:[#allocation7_spill] sm:$0xff] }
 0x4d0   :  { %v1504_v32 = vpop.permute.xlu1 %1503  ;;  %v1489_v36 = vpop.permute.xlu0 %1488 }
 0x4d1   :  { %v1474_v62 = vpack.c.bf16 %v1457_v47, %v1453_v28  ;;  %v1476_v18 = vpack.c.bf16 %v1459_v57, %v1455_v45  ;;  %v1473_v10 = vpack.c.bf16 %v1456_v6, %v1452_v7  ;;  %v1475_v48 = vpack.c.bf16 %v1458_v22, %v1454_v25  ;;  %v4274_v28 = vld [vmem:[#allocation15_spill] sm:$0xff]  ;;  %v4275_v6 = vld [vmem:[#allocation16_spill] sm:$0xff] }
 0x4d2   :  { %v4276_v47 = vld [vmem:[#allocation11_spill] sm:$0xff] }
 0x4d3   :  { %1536 = vmatprep.subr.bf16.mxu0 %v1474_v62  ;;  %1589 = vmatprep.subr.bf16.mxu1 %v1476_v18  ;;  %v4277_v62 = vld [vmem:[#allocation12_spill] sm:$0xff] }
 0x4d4   :  { %1537 = vmatpush1.bf16.msra.mxu0 %v1473_v10  ;;  %1590 = vmatpush1.bf16.msra.mxu1 %v1475_v48  ;;  %v1494_v50 = vpop.permute.xlu1 %1493  ;;  %v4278_v10 = vld [vmem:[#allocation8_spill] sm:$0xff] }
 0x4d7   :  { %2578 = vmatmul.mubr.msk.bf16.vlgmr.msra.gmra.mxu0 %vm266_vm1, %v2665_v30  ;;  %2580 = vmatmul.mubr.msk.bf16.vlgmr.msra.gmra.mxu1 %vm266_vm1, %v2665_v30  ;;  %v4279_v30 = vld [vmem:[#allocation9_spill] sm:$0xff] }
 0x4d8   :  { %1564 = vmatprep.mubr.bf16.mxu0 %v4267_v60  ;;  %1617 = vmatprep.mubr.bf16.mxu1 %v4267_v60 }
 0x4df   :  { %2579 = vmatmul.mubr.msk.bf16.gmra.mxu0 %vm266_vm1, %v2666_v29  ;;  %2581 = vmatmul.mubr.msk.bf16.gmra.mxu1 %vm266_vm1, %v2666_v29 }
 0x4e0   :  { %1761 = vmatprep.mubr.bf16.mxu0 %v4267_v60  ;;  %1854 = vmatprep.mubr.bf16.mxu1 %v4267_v60 }
 0x597   :  { %v1556_v13 = vpop.f32.mrf.mxu0  ;;  %v1609_v24 = vpop.f32.mrf.mxu1 }
 0x598   :  { %v1557_v53 = vadd.f32 %v1556_v13, %v1489_v36  ;;  %v1610_v5 = vadd.f32 %v1609_v24, %v1489_v36  ;;  %v4280_v13 = vld [vmem:[#allocation13_spill] sm:$0xff] }
 0x599   :  { %v1558_v2 = vpop.f32.mrf.mxu0  ;;  %v1611_v61 = vpop.f32.mrf.mxu1 }
 0x59a   :  { %v1559_v0 = vadd.f32 %v1558_v2, %v1489_v36  ;;  %v1612_v55 = vadd.f32 %v1611_v61, %v1489_v36  ;;  %v4281_v2 = vld [vmem:[#allocation14_spill] sm:$0xff] }
 0x59b   :  { %v1560_v12 = vpop.f32.mrf.mxu0  ;;  %v1613_v11 = vpop.f32.mrf.mxu1 }
 0x59c   :  { %v1561_v8 = vadd.f32 %v1560_v12, %v1494_v50  ;;  %v1614_v43 = vadd.f32 %v1613_v11, %v1494_v50  ;;  %v1629_v45 = vadd.f32 %v1559_v0, %v4274_v28  ;;  %v1631_v22 = vadd.f32 %v1612_v55, %v4275_v6  ;;  %v4295_v0 = vld [vmem:[#allocation10_spill] sm:$0xff] }
 0x59d   :  { %v1562_v3 = vpop.f32.mrf.mxu0  ;;  %v1615_v56 = vpop.f32.mrf.mxu1  ;;  %v1630_v55 = vadd.f32 %v1610_v5, %v4295_v0 }
 0x59e   :  { %v1563_v44 = vadd.f32 %v1562_v3, %v1494_v50  ;;  %v1616_v38 = vadd.f32 %v1615_v56, %v1494_v50  ;;  %v1632_v48 = vadd.f32 %v1561_v8, %v4278_v10  ;;  %v1634_v29 = vadd.f32 %v1614_v43, %v4279_v30  ;;  %v4286_v3 = vld [vmem:[#allocation18_spill] sm:$0xff] }
 0x59f   :  { %v1566_v17 = vpop.f32.mrf.mxu0  ;;  %v1619_v37 = vpop.f32.mrf.mxu1 }
 0x5a0   :  { %v1567_v19 = vadd.f32 %v1566_v17, %v1499_v46  ;;  %v1620_v40 = vadd.f32 %v1619_v37, %v1499_v46  ;;  %v1633_v23 = vadd.f32 %v1563_v44, %v4268_v52  ;;  %v1635_v42 = vadd.f32 %v1616_v38, %v4269_v49  ;;  %v4288_v17 = vld [vmem:[#allocation22_spill] sm:$0xff] }
 0x5a1   :  { %v1568_v21 = vpop.f32.mrf.mxu0  ;;  %v1621_v35 = vpop.f32.mrf.mxu1  ;;  %v3692_v5 = vmul.f32 %v1632_v48, %v4286_v3 }
 0x5a2   :  { %v1569_v27 = vadd.f32 %v1568_v21, %v1499_v46  ;;  %v1622_v16 = vadd.f32 %v1621_v35, %v1499_v46  ;;  %v1636_v57 = vadd.f32 %v1567_v19, %v4276_v47  ;;  %v1638_v18 = vadd.f32 %v1620_v40, %v4277_v62  ;;  %v4282_v46 = vld [vmem:[#allocation23_spill] sm:$0xff]  ;;  %v4294_v21 = vld [vmem:[#allocation17_spill] sm:$0xff] }
 0x5a3   :  { %v1570_v59 = vpop.f32.mrf.mxu0  ;;  %v1623_v9 = vpop.f32.mrf.mxu1  ;;  %v3650_v12 = vmul.f32 %v1633_v23, %v4282_v46  ;;  %v1628_v35 = vadd.f32 %v1557_v53, %v4294_v21  ;;  %4300 = vst [vmem:[#allocation8_spill] sm:$0xff] %v3692_v5  ;;  %v3709_v23 = vmul.f32 %v1630_v55, %v4288_v17 }
 0x5a4   :  { %v1571_v14 = vadd.f32 %v1570_v59, %v1504_v32  ;;  %v1624_v26 = vadd.f32 %v1623_v9, %v1504_v32  ;;  %v1637_v1 = vadd.f32 %v1569_v27, %v4270_v39  ;;  %v1639_v31 = vadd.f32 %v1622_v16, %v4271_v41  ;;  %v2667_v39 = vld [vmem:[%s4119_s5 + $0x60] sm:$0xff]   ;;  %v2669_v41 = vld [vmem:[%s4119_s5 + $0x70] sm:$0xff]  }
 0x5a5   :  { %v1572_v15 = vpop.f32.mrf.mxu0  ;;  %v1625_v54 = vpop.f32.mrf.mxu1  ;;  %4283 = vst [vmem:[#allocation19_spill] sm:$0xff] %v3650_v12  ;;  %v3676_v19 = vmul.f32 %v1636_v57, %v4286_v3  ;;  %v3679_v40 = vmul.f32 %v1638_v18, %v4288_v17  ;;  %v3682_v27 = vmul.f32 %v1629_v45, %v4282_v46  ;;  %v3695_v9 = vmul.f32 %v1634_v29, %v4288_v17 }
 0x5a6   :  { %v1640_v51 = vadd.f32 %v1571_v14, %v4272_v33  ;;  %v1642_v34 = vadd.f32 %v1624_v26, %v4273_v20  ;;  %v1573_v7 = vadd.f32 %v1572_v15, %v1504_v32  ;;  %v1626_v25 = vadd.f32 %v1625_v54, %v1504_v32  ;;  %v4284_v32 = vld [vmem:[#allocation24_spill] sm:$0xff]  ;;  %4303 = vst [vmem:[#allocation14_spill] sm:$0xff] %v3709_v23  ;;  %v2671_v15 = vld [vmem:[%s4119_s5 + $0x80] sm:$0xff]   ;;  %v2672_v54 = vld [vmem:[%s4119_s5 + $0x88] sm:$0xff]  }
 0x5a7   :  { %v3653_v11 = vmul.f32 %v1635_v42, %v4284_v32  ;;  %v3662_v36 = vmul.f32 %v1637_v1, %v4282_v46  ;;  %v3665_v50 = vmul.f32 %v1639_v31, %v4284_v32  ;;  %4296 = vst [vmem:[#allocation15_spill] sm:$0xff] %v3676_v19  ;;  %4297 = vst [vmem:[#allocation16_spill] sm:$0xff] %v3679_v40  ;;  %v2668_v1 = vld [vmem:[%s4119_s5 + $0x68] sm:$0xff]   ;;  %v2670_v31 = vld [vmem:[%s4119_s5 + $0x78] sm:$0xff]   ;;  %s2684_s5 = smov 125  }
 0x5a8   :  { %v1641_v24 = vadd.f32 %v1573_v7, %v4280_v13  ;;  %v1643_v61 = vadd.f32 %v1626_v25, %v4281_v2  ;;  %v3656_v56 = vmul.f32 %v1640_v51, %v4286_v3  ;;  %v3659_v37 = vmul.f32 %v1642_v34, %v4288_v17  ;;  %4298 = vst [vmem:[#allocation11_spill] sm:$0xff] %v3682_v27  ;;  %v4306_v17 = vld [vmem:[#allocation20_spill] sm:$0xff] }
 0x5a9   :  { %4285 = vst [vmem:[#allocation25_spill] sm:$0xff] %v3653_v11  ;;  %4290 = vst [vmem:[#allocation4_spill] sm:$0xff] %v3662_v36  ;;  %v3685_v16 = vmul.f32 %v1631_v22, %v4284_v32  ;;  %v1661_v14 = vpack.c.bf16 %v3650_v12, %v3682_v27  ;;  %v3706_v52 = vmul.f32 %v1628_v35, %v4286_v3 }
 0x5aa   :  { %4287 = vst [vmem:[#allocation2_spill] sm:$0xff] %v3656_v56  ;;  %4289 = vst [vmem:[#allocation3_spill] sm:$0xff] %v3659_v37  ;;  %v3668_v44 = vmul.f32 %v1641_v24, %v4282_v46  ;;  %v3671_v38 = vmul.f32 %v1643_v61, %v4284_v32  ;;  %v1664_v8 = vpack.c.bf16 %v3656_v56, %v3676_v19 }
 0x5ab   :  { %4291 = vst [vmem:[#allocation5_spill] sm:$0xff] %v3665_v50  ;;  %4299 = vst [vmem:[#allocation12_spill] sm:$0xff] %v3685_v16  ;;  %v1666_v43 = vpack.c.bf16 %v3659_v37, %v3679_v40  ;;  %v1663_v26 = vpack.c.bf16 %v3653_v11, %v3685_v16  ;;  %v1660_v49 = vpack.c.bf16 %v3692_v5, %v3706_v52  ;;  %v4307_v5 = vld [vmem:[#allocation21_spill] sm:$0xff] }
 0x5ac   :  { %4292 = vst [vmem:[#allocation6_spill] sm:$0xff] %v3668_v44  ;;  %4293 = vst [vmem:[#allocation7_spill] sm:$0xff] %v3671_v38  ;;  %v1665_v59 = vpack.c.bf16 %v3668_v44, %v3662_v36  ;;  %v1667_v53 = vpack.c.bf16 %v3671_v38, %v3665_v50  ;;  %v1662_v42 = vpack.c.bf16 %v3695_v9, %v3709_v23 }
 0x5ad   :  { %4301 = vst [vmem:[#allocation9_spill] sm:$0xff] %v3695_v9  ;;  %4302 = vst [vmem:[#allocation13_spill] sm:$0xff] %v3706_v52 }
 0x5ae   :  { %1741 = vmatprep.subr.bf16.mxu0 %v1665_v59  ;;  %1834 = vmatprep.subr.bf16.mxu1 %v1667_v53 }
 0x5af   :  { %1742 = vmatpush1.bf16.msra.mxu0 %v1664_v8  ;;  %1835 = vmatpush1.bf16.msra.mxu1 %v1666_v43 }
 0x5b0   :  { %1743 = vmatprep.subr.bf16.mxu0 %v1661_v14  ;;  %1836 = vmatprep.subr.bf16.mxu1 %v1663_v26 }
 0x5b3   :  { %1744 = vmatpush1.bf16.msra.mxu0 %v1660_v49  ;;  %1837 = vmatpush1.bf16.msra.mxu1 %v1662_v42 }
 0x5b6   :  { %2600 = vmatmul.mubr.msk.bf16.vlgmr.msra.gmra.mxu0 %vm266_vm1, %v2667_v39  ;;  %2606 = vmatmul.mubr.msk.bf16.vlgmr.msra.gmra.mxu1 %vm266_vm1, %v2667_v39 }
 0x5b7   :  { %1771 = vmatprep.mubr.bf16.mxu0 %v4267_v60  ;;  %1864 = vmatprep.mubr.bf16.mxu1 %v4267_v60 }
 0x5be   :  { %2601 = vmatmul.mubr.msk.bf16.gmra.mxu0 %vm266_vm1, %v2668_v1  ;;  %2607 = vmatmul.mubr.msk.bf16.gmra.mxu1 %vm266_vm1, %v2668_v1 }
 0x5bf   :  { %1781 = vmatprep.mubr.bf16.mxu0 %v4267_v60  ;;  %1874 = vmatprep.mubr.bf16.mxu1 %v4267_v60 }
 0x5c6   :  { %2602 = vmatmul.mubr.msk.bf16.gmra.mxu0 %vm266_vm1, %v2669_v41  ;;  %2608 = vmatmul.mubr.msk.bf16.gmra.mxu1 %vm266_vm1, %v2669_v41 }
 0x5c7   :  { %1791 = vmatprep.mubr.bf16.mxu0 %v4267_v60  ;;  %1884 = vmatprep.mubr.bf16.mxu1 %v4267_v60 }
 0x5ce   :  { %2603 = vmatmul.mubr.msk.bf16.gmra.mxu0 %vm266_vm1, %v2670_v31  ;;  %2609 = vmatmul.mubr.msk.bf16.gmra.mxu1 %vm266_vm1, %v2670_v31 }
 0x5cf   :  { %1801 = vmatprep.mubr.bf16.mxu0 %v4267_v60  ;;  %1894 = vmatprep.mubr.bf16.mxu1 %v4267_v60 }
 0x5d6   :  { %2604 = vmatmul.mubr.msk.bf16.gmra.mxu0 %vm266_vm1, %v2671_v15  ;;  %2610 = vmatmul.mubr.msk.bf16.gmra.mxu1 %vm266_vm1, %v2671_v15 }
 0x5d7   :  { %1811 = vmatprep.mubr.bf16.mxu0 %v4267_v60  ;;  %1904 = vmatprep.mubr.bf16.mxu1 %v4267_v60 }
 0x5de   :  { %2605 = vmatmul.mubr.msk.bf16.gmra.mxu0 %vm266_vm1, %v2672_v54  ;;  %2611 = vmatmul.mubr.msk.bf16.gmra.mxu1 %vm266_vm1, %v2672_v54 }
 0x5df   :  { %2266 = vmatprep.mubr.bf16.mxu0 %v4267_v60  ;;  %2319 = vmatprep.mubr.bf16.mxu1 %v4267_v60 }
 0x676   :  { %v1763_v33 = vpop.f32.mrf.mxu0  ;;  %v1856_v51 = vpop.f32.mrf.mxu1 }
 0x677   :  { %1919 = vrot.lane.b32.xlu0 %v1763_v33, %s2683_s1 }
 0x678   :  { %v1765_v20 = vpop.f32.mrf.mxu0  ;;  %v1858_v34 = vpop.f32.mrf.mxu1 }
 0x67a   :  { %v1767_v7 = vpop.f32.mrf.mxu0  ;;  %v1860_v25 = vpop.f32.mrf.mxu1 }
 0x67b   :  { %1935 = vrot.lane.b32.xlu0 %v1856_v51, %s2683_s1  ;;  %1921 = vrot.lane.b32.xlu1 %v1767_v7, %s2683_s1 }
 0x67c   :  { %v1769_v28 = vpop.f32.mrf.mxu0  ;;  %v1862_v45 = vpop.f32.mrf.mxu1 }
 0x67e   :  { %v1773_v6 = vpop.f32.mrf.mxu0  ;;  %v1866_v22 = vpop.f32.mrf.mxu1 }
 0x67f   :  { %1927 = vrot.lane.b32.xlu0 %v1765_v20, %s2683_s1  ;;  %1937 = vrot.lane.b32.xlu1 %v1860_v25, %s2683_s1 }
 0x680   :  { %v1775_v47 = vpop.f32.mrf.mxu0  ;;  %v1868_v57 = vpop.f32.mrf.mxu1 }
 0x682   :  { %v1777_v62 = vpop.f32.mrf.mxu0  ;;  %v1870_v18 = vpop.f32.mrf.mxu1 }
 0x683   :  { %1943 = vrot.lane.b32.xlu0 %v1858_v34, %s2683_s1  ;;  %1929 = vrot.lane.b32.xlu1 %v1769_v28, %s2683_s1 }
 0x684   :  { %v1779_v10 = vpop.f32.mrf.mxu0  ;;  %v1872_v48 = vpop.f32.mrf.mxu1 }
 0x686   :  { %v3764_v30 = vpop.f32.mrf.mxu0  ;;  %v3766_v29 = vpop.f32.mrf.mxu1 }
 0x687   :  { %1945 = vrot.lane.b32.xlu1 %v1862_v45, %s2683_s1  ;;  %1923 = vrot.lane.b32.xlu0 %v1773_v6, %s2683_s1  ;;  %v2612_v45 = vld [vmem:[%s4118_s6 + $0x40] sm:$0xff] }
 0x688   :  { %v3770_v13 = vpop.f32.mrf.mxu0  ;;  %v3772_v24 = vpop.f32.mrf.mxu1 }
 0x68a   :  { %v3774_v2 = vpop.f32.mrf.mxu0  ;;  %v3776_v61 = vpop.f32.mrf.mxu1 }
 0x68b   :  { %1939 = vrot.lane.b32.xlu0 %v1866_v22, %s2683_s1  ;;  %1925 = vrot.lane.b32.xlu1 %v1777_v62, %s2683_s1  ;;  %v2622_v22 = vld [vmem:[%s4120_s8 + $0x50] sm:$0xff]  ;;  %v2623_v62 = vld [vmem:[%s4120_s8 + $0x58] sm:$0xff] }
 0x68c   :  { %v3780_v21 = vpop.f32.mrf.mxu0  ;;  %v3782_v35 = vpop.f32.mrf.mxu1 }
 0x68d   :  { %4304 = vst [vmem:[#allocation17_spill] sm:$0xff] %v3782_v35 }
 0x68e   :  { %v3784_v0 = vpop.f32.mrf.mxu0  ;;  %v3786_v55 = vpop.f32.mrf.mxu1 }
 0x68f   :  { %1931 = vrot.lane.b32.xlu0 %v1775_v47, %s2683_s1  ;;  %1941 = vrot.lane.b32.xlu1 %v1870_v18, %s2683_s1  ;;  %v2613_v47 = vld [vmem:[%s4118_s6 + $0x48] sm:$0xff]  ;;  %v2382_v18 = vld [vmem:[%s4124_s10] sm:$0xff] }
 0x690   :  { %v3790_v59 = vpop.f32.mrf.mxu0  ;;  %v3792_v53 = vpop.f32.mrf.mxu1 }
 0x692   :  { %v3794_v8 = vpop.f32.mrf.mxu0  ;;  %v3796_v43 = vpop.f32.mrf.mxu1 }
 0x693   :  { %1947 = vrot.lane.b32.xlu0 %v1868_v57, %s2683_s1  ;;  %1933 = vrot.lane.b32.xlu1 %v1779_v10, %s2683_s1  ;;  %v2620_v57 = vld [vmem:[%s4120_s8 + $0x40] sm:$0xff]  ;;  %v2621_v10 = vld [vmem:[%s4120_s8 + $0x48] sm:$0xff] }
 0x694   :  { %v3800_v14 = vpop.f32.mrf.mxu0  ;;  %v3802_v26 = vpop.f32.mrf.mxu1 }
 0x696   :  { %v1803_v49 = vpop.f32.mrf.mxu0  ;;  %v1896_v42 = vpop.f32.mrf.mxu1 }
 0x697   :  { %1949 = vrot.lane.b32.xlu1 %v1872_v48, %s2683_s1  ;;  %2021 = vrot.lane.b32.xlu0 %v1803_v49, %s2684_s5  ;;  %v2383_v48 = vld [vmem:[%s4124_s10 + $0x8] sm:$0xff]  ;;  %v3845_v49 = vpop.permute.xlu0 %2140 }
 0x698   :  { %v1805_v39 = vpop.f32.mrf.mxu0  ;;  %v1898_v1 = vpop.f32.mrf.mxu1 }
 0x69a   :  { %v1807_v41 = vpop.f32.mrf.mxu0  ;;  %v1900_v31 = vpop.f32.mrf.mxu1 }
 0x69b   :  { %2037 = vrot.lane.b32.xlu0 %v1896_v42, %s2684_s5  ;;  %2023 = vrot.lane.b32.xlu1 %v1807_v41, %s2684_s5  ;;  %v3847_v42 = vpop.permute.xlu1 %2145 }
 0x69c   :  { %v1809_v15 = vpop.f32.mrf.mxu0  ;;  %v1902_v33 = vpop.f32.mrf.mxu1 }
 0x69e   :  { %v1813_v54 = vpop.f32.mrf.mxu0  ;;  %v1906_v20 = vpop.f32.mrf.mxu1 }
 0x69f   :  { %2029 = vrot.lane.b32.xlu0 %v1805_v39, %s2684_s5  ;;  %2039 = vrot.lane.b32.xlu1 %v1900_v31, %s2684_s5 }
 0x6a0   :  { %v1815_v51 = vpop.f32.mrf.mxu0  ;;  %v1908_v7 = vpop.f32.mrf.mxu1 }
 0x6a2   :  { %v1817_v34 = vpop.f32.mrf.mxu0  ;;  %v1910_v25 = vpop.f32.mrf.mxu1 }
 0x6a3   :  { %2045 = vrot.lane.b32.xlu0 %v1898_v1, %s2684_s5  ;;  %2031 = vrot.lane.b32.xlu1 %v1809_v15, %s2684_s5 }
 0x6a4   :  { %v1819_v28 = vpop.f32.mrf.mxu0  ;;  %v1912_v6 = vpop.f32.mrf.mxu1 }
 0x6a7   :  { %2047 = vrot.lane.b32.xlu1 %v1902_v33, %s2684_s5  ;;  %2025 = vrot.lane.b32.xlu0 %v1813_v54, %s2684_s5 }
 0x6ab   :  { %2041 = vrot.lane.b32.xlu0 %v1906_v20, %s2684_s5  ;;  %2027 = vrot.lane.b32.xlu1 %v1817_v34, %s2684_s5 }
 0x6af   :  { %2033 = vrot.lane.b32.xlu0 %v1815_v51, %s2684_s5  ;;  %2043 = vrot.lane.b32.xlu1 %v1910_v25, %s2684_s5 }
 0x6b3   :  { %2049 = vrot.lane.b32.xlu0 %v1908_v7, %s2684_s5  ;;  %2035 = vrot.lane.b32.xlu1 %v1819_v28, %s2684_s5 }
 0x6b7   :  { %2130 = vperm.xlu0 %2641, %v2612_v45   ;;  %2051 = vrot.lane.b32.xlu1 %v1912_v6, %s2684_s5 }
 0x6bb   :  { %2210 = vperm.xlu0 %2641, %v2622_v22   ;;  %2135 = vperm.xlu1 %2642, %v2613_v47  }
 0x6bf   :  { %2200 = vperm.xlu0 %2641, %v2620_v57   ;;  %2215 = vperm.xlu1 %2642, %v2623_v62   ;;  %v2676_v57 = vld [vmem:[%s4122_s2] sm:$0xf] }
 0x6c0   :  { %vm1915_vm10 = vcmp.ge.s32.totalorder %v2676_v57, 3  ;;  %vm1917_vm12 = vcmp.lt.s32.totalorder %v2676_v57, 253 }
 0x6c3   :  { %2386 = vperm.xlu0 %2641, %v2382_v18   ;;  %2205 = vperm.xlu1 %2642, %v2621_v10   ;;  %v4305_v10 = vmov 0.0  }
 0x6c4   :  { %v1918_v16 = vsel %vm1917_vm12, 1.0, %v4305_v10 }
 0x6c5   :  { %v3908_v11 = vrot.slane %v1918_v16, %v3009_v58 }
 0x6c7   :  { %2391 = vperm.xlu1 %2642, %v2383_v48   ;;  %v1916_v48 = vsel %vm1915_vm10, 1.0, %v4305_v10 }
 0x6c8   :  { %v1976_v3 = vrot.slane %v1916_v48, %v4306_v17  ;;  %v1980_v32 = vrot.slane %v1916_v48, %v2999_v4  ;;  %v1972_v40 = vrot.slane %v1916_v48, %v4307_v5  ;;  %v1984_v19 = vrot.slane %v1916_v48, %v3009_v58 }
 0x6e9   :  { %v1920_v39 = vpop.permute.xlu0 %1919 }
 0x6ed   :  { %v1936_v1 = vpop.permute.xlu0 %1935  ;;  %v3849_v41 = vpop.permute.xlu1 %1921 }
 0x6f1   :  { %v1928_v31 = vpop.permute.xlu0 %1927  ;;  %v3851_v15 = vpop.permute.xlu1 %1937 }
 0x6f2   :  { %v1956_v46 = vsel %vm1951_vm11, %v1928_v31, %v1936_v1  ;;  %v1960_v38 = vsel %vm1951_vm11, %v1920_v39, %v1928_v31 }
 0x6f3   :  { %v1990_v27 = vmul.f32 %v1976_v3, %v1960_v38  ;;  %v1991_v37 = vmul.f32 %v1980_v32, %v1956_v46 }
 0x6f5   :  { %v1944_v54 = vpop.permute.xlu0 %1943  ;;  %v1930_v33 = vpop.permute.xlu1 %1929  ;;  %v3911_v12 = vadd.f32 %v1990_v27, %v3770_v13 }
 0x6f6   :  { %v1952_v57 = vsel %vm1951_vm11, %v1936_v1, %v1944_v54  ;;  %v1964_v56 = vsel %vm1951_vm11, %v1944_v54, %v1920_v39  ;;  %v1957_v31 = vsel %vm1951_vm11, %v1930_v33, %v3851_v15  ;;  %v1961_v50 = vsel %vm1951_vm11, %v3849_v41, %v1930_v33 }
 0x6f7   :  { %v3897_v1 = vrot.slane %v1918_v16, %v4307_v5  ;;  %v3900_v39 = vrot.slane %v1918_v16, %v4306_v17  ;;  %v1989_v48 = vmul.f32 %v1972_v40, %v1964_v56  ;;  %v1992_v36 = vmul.f32 %v1984_v19, %v1952_v57 }
 0x6f8   :  { %v3905_v33 = vrot.slane %v1918_v16, %v2999_v4  ;;  %v3914_v5 = vadd.f32 %v1991_v37, %v3766_v29  ;;  %v1995_v17 = vmul.f32 %v1980_v32, %v1957_v31 }
 0x6f9   :  { %v1924_v51 = vpop.permute.xlu0 %1923  ;;  %v1946_v20 = vpop.permute.xlu1 %1945  ;;  %v3929_v13 = vadd.f32 %v1989_v48, %v3764_v30 }
 0x6fd   :  { %v1940_v34 = vpop.permute.xlu0 %1939  ;;  %v1926_v7 = vpop.permute.xlu1 %1925 }
 0x701   :  { %v1932_v25 = vpop.permute.xlu0 %1931  ;;  %v1942_v28 = vpop.permute.xlu1 %1941 }
 0x702   :  { %v1958_v38 = vsel %vm1951_vm11, %v1932_v25, %v1940_v34  ;;  %v1962_v46 = vsel %vm1951_vm11, %v1924_v51, %v1932_v25  ;;  %v1994_v25 = vmul.f32 %v1976_v3, %v1961_v50 }
 0x703   :  { %v1998_v60 = vmul.f32 %v1976_v3, %v1962_v46  ;;  %v1999_v35 = vmul.f32 %v1980_v32, %v1958_v38 }
 0x705   :  { %v1948_v45 = vpop.permute.xlu0 %1947  ;;  %v1934_v6 = vpop.permute.xlu1 %1933 }
 0x706   :  { %v1954_v56 = vsel %vm1951_vm11, %v1940_v34, %v1948_v45  ;;  %v1966_v4 = vsel %vm1951_vm11, %v1948_v45, %v1924_v51  ;;  %v1959_v58 = vsel %vm1951_vm11, %v1934_v6, %v1942_v28  ;;  %v1963_v27 = vsel %vm1951_vm11, %v1926_v7, %v1934_v6 }
 0x707   :  { %v3932_v34 = vadd.f32 %v1992_v36, %v3772_v24  ;;  %v1953_v51 = vsel %vm1951_vm11, %v3851_v15, %v1946_v20  ;;  %v1965_v45 = vsel %vm1951_vm11, %v1946_v20, %v3849_v41  ;;  %v1997_v6 = vmul.f32 %v1972_v40, %v1966_v4 }
 0x708   :  { %v2000_v30 = vmul.f32 %v1984_v19, %v1954_v56  ;;  %v2003_v57 = vmul.f32 %v1980_v32, %v1959_v58  ;;  %v3946_v31 = vmul.f32 %v1972_v40, %v1965_v45  ;;  %v3948_v38 = vmul.f32 %v1984_v19, %v1953_v51 }
 0x709   :  { %v3853_v22 = vpop.permute.xlu0 %2021  ;;  %v1950_v47 = vpop.permute.xlu1 %1949  ;;  %v2014_v15 = vadd.f32 %v1998_v60, %v3790_v59  ;;  %v2015_v41 = vadd.f32 %v1999_v35, %v3786_v55 }
 0x70a   :  { %v1955_v37 = vsel %vm1951_vm11, %v1942_v28, %v1950_v47  ;;  %v1967_v50 = vsel %vm1951_vm11, %v1950_v47, %v1926_v7  ;;  %v3941_v28 = vadd.f32 %v1994_v25, %v3780_v21  ;;  %v3944_v7 = vadd.f32 %v1995_v17, %v3776_v61 }
 0x70b   :  { %v2002_v47 = vmul.f32 %v1976_v3, %v1963_v27  ;;  %v2001_v36 = vmul.f32 %v1972_v40, %v1967_v50  ;;  %v2004_v24 = vmul.f32 %v1984_v19, %v1955_v37  ;;  %v2013_v19 = vadd.f32 %v1997_v6, %v3784_v0 }
 0x70c   :  { %v2016_v40 = vadd.f32 %v2000_v30, %v3792_v53  ;;  %v2019_v46 = vadd.f32 %v2003_v57, %v3796_v43 }
 0x70d   :  { %v3858_v62 = vpop.permute.xlu0 %2037  ;;  %v3860_v18 = vpop.permute.xlu1 %2023  ;;  %v2018_v59 = vadd.f32 %v2002_v47, %v3800_v14  ;;  %v2020_v48 = vadd.f32 %v2004_v24, %v3802_v26 }
 0x711   :  { %v3864_v23 = vpop.permute.xlu0 %2029  ;;  %v3866_v52 = vpop.permute.xlu1 %2039 }
 0x712   :  { %v2058_v61 = vsel %vm2053_vm13, %v3864_v23, %v3858_v62  ;;  %v2062_v32 = vsel %vm2053_vm13, %v3853_v22, %v3864_v23  ;;  %v2017_v23 = vadd.f32 %v2001_v36, %v3794_v8 }
 0x713   :  { %v2091_v25 = vmul.f32 %v3897_v1, %v2062_v32  ;;  %v2092_v17 = vmul.f32 %v3900_v39, %v2058_v61 }
 0x715   :  { %v3874_v44 = vpop.permute.xlu0 %2045  ;;  %v3876_v9 = vpop.permute.xlu1 %2031 }
 0x716   :  { %v2054_v26 = vsel %vm2053_vm13, %v3858_v62, %v3874_v44  ;;  %v2063_v62 = vsel %vm2053_vm13, %v3860_v18, %v3876_v9 }
 0x719   :  { %v2026_v54 = vpop.permute.xlu0 %2025  ;;  %v3902_v10 = vpop.permute.xlu1 %2047 }
 0x71a   :  { %v2055_v32 = vsel %vm2053_vm13, %v3866_v52, %v3902_v10 }
 0x71d   :  { %v2042_v16 = vpop.permute.xlu0 %2041  ;;  %v2028_v29 = vpop.permute.xlu1 %2027 }
 0x721   :  { %v2034_v20 = vpop.permute.xlu0 %2033  ;;  %v2044_v21 = vpop.permute.xlu1 %2043 }
 0x722   :  { %v2060_v3 = vsel %vm2053_vm13, %v2034_v20, %v2042_v16  ;;  %v2064_v60 = vsel %vm2053_vm13, %v2026_v54, %v2034_v20 }
 0x723   :  { %v2099_v35 = vmul.f32 %v3897_v1, %v2064_v60  ;;  %v2100_v55 = vmul.f32 %v3900_v39, %v2060_v3 }
 0x725   :  { %v2115_v56 = vadd.f32 %v2099_v35, %v2013_v19  ;;  %v2116_v0 = vadd.f32 %v2100_v55, %v2014_v15  ;;  %v2050_v4 = vpop.permute.xlu0 %2049  ;;  %v2036_v53 = vpop.permute.xlu1 %2035  ;;  %v2093_v15 = vmul.f32 %v3905_v33, %v2054_v26 }
 0x726   :  { %v2056_v58 = vsel %vm2053_vm13, %v2042_v16, %v2050_v4  ;;  %v2068_v14 = vsel %vm2053_vm13, %v2050_v4, %v2026_v54  ;;  %v2061_v43 = vsel %vm2053_vm13, %v2036_v53, %v2044_v21  ;;  %v2065_v8 = vsel %vm2053_vm13, %v2028_v29, %v2036_v53 }
 0x727   :  { %v2101_v27 = vmul.f32 %v3905_v33, %v2056_v58  ;;  %v2102_v37 = vmul.f32 %v3908_v11, %v2068_v14  ;;  %v2103_v50 = vmul.f32 %v3897_v1, %v2065_v8  ;;  %v2066_v54 = vsel %vm2053_vm13, %v3874_v44, %v3853_v22 }
 0x728   :  { %v2059_v16 = vsel %vm2053_vm13, %v3876_v9, %v3866_v52  ;;  %v2104_v51 = vmul.f32 %v3900_v39, %v2061_v43  ;;  %v2156_v45 = vadd.f32 %v3845_v49, %v2115_v56  ;;  %v2157_v57 = vadd.f32 %v3845_v49, %v2116_v0 }
 0x729   :  { %v2117_v6 = vadd.f32 %v2101_v27, %v2015_v41  ;;  %v2119_v30 = vadd.f32 %v2103_v50, %v2017_v23  ;;  %v2052_v47 = vpop.permute.xlu1 %2051  ;;  %v2118_v44 = vadd.f32 %v2102_v37, %v2016_v40  ;;  %v2094_v61 = vmul.f32 %v3908_v11, %v2066_v54 }
 0x72a   :  { %v2120_v22 = vadd.f32 %v2104_v51, %v2018_v59  ;;  %v2057_v36 = vsel %vm2053_vm13, %v2044_v21, %v2052_v47  ;;  %v2069_v24 = vsel %vm2053_vm13, %v2052_v47, %v2028_v29  ;;  %v2067_v29 = vsel %vm2053_vm13, %v3902_v10, %v3860_v18 }
 0x72b   :  { %v2160_v9 = vadd.f32 %v3847_v42, %v2119_v30  ;;  %v2105_v20 = vmul.f32 %v3905_v33, %v2057_v36  ;;  %v2106_v41 = vmul.f32 %v3908_v11, %v2069_v24  ;;  %v2172_v3 = vmax.f32 %v2156_v45, 0.0  ;;  %v2673_v24 = vld [vmem:[%s4121_s7 + $0x20] sm:$0xff]  }
 0x72c   :  { %v2161_v21 = vadd.f32 %v3847_v42, %v2120_v22  ;;  %v2158_v35 = vadd.f32 %v3845_v49, %v2117_v6  ;;  %v2173_v55 = vmax.f32 %v2157_v57, 0.0  ;;  %v2159_v23 = vadd.f32 %v3845_v49, %v2118_v44 }
 0x72d   :  { %v2176_v60 = vmax.f32 %v2160_v9, 0.0  ;;  %v2121_v19 = vadd.f32 %v2105_v20, %v2019_v46  ;;  %v2122_v40 = vadd.f32 %v2106_v41, %v2020_v48  ;;  %v2107_v56 = vadd.f32 %v2091_v25, %v3929_v13  ;;  %v2674_v9 = vld [vmem:[%s4121_s7 + $0x28] sm:$0xff]  }
 0x72e   :  { %v2177_v59 = vmax.f32 %v2161_v21, 0.0  ;;  %v2108_v18 = vadd.f32 %v2092_v17, %v3911_v12  ;;  %v2095_v10 = vmul.f32 %v3897_v1, %v2063_v62  ;;  %v2096_v46 = vmul.f32 %v3900_v39, %v2059_v16  ;;  %v4308_v1 = vld [vmem:[#allocation17_spill] sm:$0xff] }
 0x72f   :  { %v2162_v52 = vadd.f32 %v3847_v42, %v2121_v19  ;;  %v2189_v0 = vpack.c.bf16 %v2176_v60, %v2172_v3  ;;  %v2163_v63 = vadd.f32 %v3847_v42, %v2122_v40  ;;  %v2097_v4 = vmul.f32 %v3905_v33, %v2055_v32 }
 0x730   :  { %v2190_v48 = vpack.c.bf16 %v2177_v59, %v2173_v55  ;;  %v2098_v53 = vmul.f32 %v3908_v11, %v2067_v29  ;;  %v2109_v13 = vadd.f32 %v2093_v15, %v3914_v5  ;;  %v2110_v25 = vadd.f32 %v2094_v61, %v3932_v34 }
 0x731   :  { %v2178_v58 = vmax.f32 %v2162_v52, 0.0  ;;  %v2179_v49 = vmax.f32 %v2163_v63, 0.0  ;;  %v2174_v14 = vmax.f32 %v2158_v35, 0.0  ;;  %v2175_v43 = vmax.f32 %v2159_v23, 0.0 }
 0x732   :  { %2246 = vmatprep.subr.bf16.mxu0 %v2190_v48  ;;  %v2131_v42 = vpop.permute.xlu0 %2130  ;;  %v2009_v12 = vadd.f32 %v3946_v31, %v3774_v2  ;;  %v2012_v39 = vadd.f32 %v3948_v38, %v4308_v1  ;;  %v2112_v34 = vadd.f32 %v2096_v46, %v3941_v28  ;;  %v2113_v37 = vadd.f32 %v2097_v4, %v3944_v7  ;;  %v4310_v1 = vld [vmem:[#allocation19_spill] sm:$0xff] }
 0x733   :  { %v2148_v17 = vadd.f32 %v2131_v42, %v2107_v56  ;;  %v2149_v33 = vadd.f32 %v2131_v42, %v2108_v18  ;;  %2247 = vmatpush1.bf16.msra.mxu0 %v2189_v0  ;;  %v2150_v11 = vadd.f32 %v2131_v42, %v2109_v13  ;;  %v2151_v8 = vadd.f32 %v2131_v42, %v2110_v25 }
 0x734   :  { %v2192_v26 = vpack.c.bf16 %v2179_v49, %v2175_v43  ;;  %v2191_v27 = vpack.c.bf16 %v2178_v58, %v2174_v14  ;;  %v2111_v5 = vadd.f32 %v2095_v10, %v2009_v12  ;;  %v2114_v50 = vadd.f32 %v2098_v53, %v2012_v39 }
 0x735   :  { %v2164_v62 = vmax.f32 %v2148_v17, 0.0  ;;  %v2166_v51 = vmax.f32 %v2150_v11, 0.0  ;;  %v2165_v45 = vmax.f32 %v2149_v33, 0.0  ;;  %v2167_v6 = vmax.f32 %v2151_v8, 0.0  ;;  %v4311_v17 = vld [vmem:[#allocation25_spill] sm:$0xff]  ;;  %v4312_v11 = vld [vmem:[#allocation4_spill] sm:$0xff] }
 0x736   :  { %2299 = vmatprep.subr.bf16.mxu1 %v2192_v26  ;;  %v2136_v54 = vpop.permute.xlu1 %2135  ;;  %v4309_v15 = vmov 0   ;;  %v2211_v29 = vpop.permute.xlu0 %2210  ;;  %v4313_v26 = vld [vmem:[#allocation5_spill] sm:$0xff] }
 0x737   :  { %2300 = vmatpush1.bf16.msra.mxu1 %v2191_v27  ;;  %v2152_v2 = vadd.f32 %v2136_v54, %v2111_v5  ;;  %v2153_v31 = vadd.f32 %v2136_v54, %v2112_v34  ;;  %v2154_v16 = vadd.f32 %v2136_v54, %v2113_v37  ;;  %v2155_v38 = vadd.f32 %v2136_v54, %v2114_v50  ;;  %v4314_v37 = vld [vmem:[#allocation2_spill] sm:$0xff]  ;;  %v4315_v54 = vld [vmem:[#allocation3_spill] sm:$0xff] }
 0x739   :  { %v2168_v30 = vmax.f32 %v2152_v2, 0.0  ;;  %v2170_v47 = vmax.f32 %v2154_v16, 0.0  ;;  %v2169_v57 = vmax.f32 %v2153_v31, 0.0  ;;  %v2171_v44 = vmax.f32 %v2155_v38, 0.0  ;;  %v4316_v38 = vld [vmem:[#allocation11_spill] sm:$0xff] }
 0x73a   :  { %v2216_v21 = vpop.permute.xlu1 %2215  ;;  %v2201_v59 = vpop.permute.xlu0 %2200 }
 0x73b   :  { %v2186_v22 = vpack.c.bf16 %v2169_v57, %v2165_v45  ;;  %v2188_v28 = vpack.c.bf16 %v2171_v44, %v2167_v6  ;;  %v2185_v36 = vpack.c.bf16 %v2168_v30, %v2164_v62  ;;  %v2187_v7 = vpack.c.bf16 %v2170_v47, %v2166_v51  ;;  %v4317_v51 = vld [vmem:[#allocation12_spill] sm:$0xff]  ;;  %v4318_v6 = vld [vmem:[#allocation15_spill] sm:$0xff] }
 0x73c   :  { %v4319_v47 = vld [vmem:[#allocation16_spill] sm:$0xff] }
 0x73d   :  { %2248 = vmatprep.subr.bf16.mxu0 %v2186_v22  ;;  %2301 = vmatprep.subr.bf16.mxu1 %v2188_v28  ;;  %v4320_v44 = vld [vmem:[#allocation8_spill] sm:$0xff]  ;;  %v4321_v28 = vld [vmem:[#allocation9_spill] sm:$0xff] }
 0x73e   :  { %2249 = vmatpush1.bf16.msra.mxu0 %v2185_v36  ;;  %2302 = vmatpush1.bf16.msra.mxu1 %v2187_v7  ;;  %v2206_v23 = vpop.permute.xlu1 %2205  ;;  %v4322_v7 = vld [vmem:[#allocation6_spill] sm:$0xff] }
 0x741   :  { %2626 = vmatmul.mubr.msk.bf16.vlgmr.msra.gmra.mxu0 %vm266_vm1, %v2673_v24  ;;  %2628 = vmatmul.mubr.msk.bf16.vlgmr.msra.gmra.mxu1 %vm266_vm1, %v2673_v24 }
 0x742   :  { %2276 = vmatprep.mubr.bf16.mxu0 %v4309_v15  ;;  %2329 = vmatprep.mubr.bf16.mxu1 %v4309_v15 }
 0x749   :  { %2627 = vmatmul.mubr.msk.bf16.gmra.mxu0 %vm266_vm1, %v2674_v9  ;;  %2629 = vmatmul.mubr.msk.bf16.gmra.mxu1 %vm266_vm1, %v2674_v9 }
 0x74a   :  { %2434 = vmatprep.mubr.bf16.mxu0 %v4309_v15  ;;  %2477 = vmatprep.mubr.bf16.mxu1 %v4309_v15  ;;  %v4323_v15 = vld [vmem:[#allocation7_spill] sm:$0xff] }
 0x801   :  { %v2268_v20 = vpop.f32.mrf.mxu0  ;;  %v2321_v41 = vpop.f32.mrf.mxu1 }
 0x802   :  { %v2269_v18 = vadd.f32 %v2268_v20, %v2201_v59  ;;  %v2322_v10 = vadd.f32 %v2321_v41, %v2201_v59  ;;  %v4324_v20 = vld [vmem:[#allocation23_spill] sm:$0xff] }
 0x803   :  { %v2270_v61 = vpop.f32.mrf.mxu0  ;;  %v2323_v32 = vpop.f32.mrf.mxu1 }
 0x804   :  { %v2271_v46 = vadd.f32 %v2270_v61, %v2201_v59  ;;  %v2324_v48 = vadd.f32 %v2323_v32, %v2201_v59  ;;  %v4325_v61 = vld [vmem:[#allocation24_spill] sm:$0xff]  ;;  %v4328_v59 = vld [vmem:[#allocation13_spill] sm:$0xff] }
 0x805   :  { %v2272_v3 = vpop.f32.mrf.mxu0  ;;  %v2325_v60 = vpop.f32.mrf.mxu1 }
 0x806   :  { %v2273_v14 = vadd.f32 %v2272_v3, %v2206_v23  ;;  %v2326_v42 = vadd.f32 %v2325_v60, %v2206_v23  ;;  %v2341_v62 = vadd.f32 %v2271_v46, %v4316_v38  ;;  %v2343_v45 = vadd.f32 %v2324_v48, %v4317_v51  ;;  %v4327_v3 = vld [vmem:[#allocation22_spill] sm:$0xff] }
 0x807   :  { %v2274_v19 = vpop.f32.mrf.mxu0  ;;  %v2327_v40 = vpop.f32.mrf.mxu1 }
 0x808   :  { %v2275_v56 = vadd.f32 %v2274_v19, %v2206_v23  ;;  %v2328_v52 = vadd.f32 %v2327_v40, %v2206_v23  ;;  %v2344_v22 = vadd.f32 %v2273_v14, %v4320_v44  ;;  %v2346_v36 = vadd.f32 %v2326_v42, %v4321_v28 }
 0x809   :  { %v2278_v35 = vpop.f32.mrf.mxu0  ;;  %v2331_v55 = vpop.f32.mrf.mxu1  ;;  %v2340_v23 = vadd.f32 %v2269_v18, %v4328_v59  ;;  %v2357_v46 = vmul.f32 %v2341_v62, %v4324_v20  ;;  %v2359_v48 = vmul.f32 %v2343_v45, %v4325_v61 }
 0x80a   :  { %v2279_v4 = vadd.f32 %v2278_v35, %v2211_v29  ;;  %v2332_v53 = vadd.f32 %v2331_v55, %v2211_v29  ;;  %v2345_v39 = vadd.f32 %v2275_v56, %v4310_v1  ;;  %v2347_v33 = vadd.f32 %v2328_v52, %v4311_v17  ;;  %v4329_v56 = vld [vmem:[#allocation14_spill] sm:$0xff] }
 0x80b   :  { %v2280_v0 = vpop.f32.mrf.mxu0  ;;  %v2333_v63 = vpop.f32.mrf.mxu1  ;;  %v2342_v52 = vadd.f32 %v2322_v10, %v4329_v56  ;;  %v2675_v1 = vld [vmem:[%s4125_s9] sm:$0xff]  }
 0x80c   :  { %v2281_v58 = vadd.f32 %v2280_v0, %v2211_v29  ;;  %v2334_v49 = vadd.f32 %v2333_v63, %v2211_v29  ;;  %v2348_v30 = vadd.f32 %v2279_v4, %v4318_v6  ;;  %v2350_v57 = vadd.f32 %v2332_v53, %v4319_v47  ;;  %v4326_v29 = vld [vmem:[#allocation18_spill] sm:$0xff] }
 0x80d   :  { %v2282_v13 = vpop.f32.mrf.mxu0  ;;  %v2335_v25 = vpop.f32.mrf.mxu1  ;;  %v2361_v41 = vmul.f32 %v2345_v39, %v4324_v20  ;;  %v2363_v32 = vmul.f32 %v2347_v33, %v4325_v61  ;;  %v2356_v14 = vmul.f32 %v2340_v23, %v4326_v29  ;;  %v2358_v42 = vmul.f32 %v2342_v52, %v4327_v3 }
 0x80e   :  { %v2283_v43 = vadd.f32 %v2282_v13, %v2216_v21  ;;  %v2336_v12 = vadd.f32 %v2335_v25, %v2216_v21  ;;  %v2349_v8 = vadd.f32 %v2281_v58, %v4312_v11  ;;  %v2351_v27 = vadd.f32 %v2334_v49, %v4313_v26  ;;  %v2387_v39 = vpop.permute.xlu0 %2386 }
 0x80f   :  { %v2284_v5 = vpop.f32.mrf.mxu0  ;;  %v2337_v34 = vpop.f32.mrf.mxu1  ;;  %v2364_v0 = vmul.f32 %v2348_v30, %v4326_v29  ;;  %v2366_v63 = vmul.f32 %v2350_v57, %v4327_v3  ;;  %v2360_v58 = vmul.f32 %v2344_v22, %v4326_v29  ;;  %v2362_v49 = vmul.f32 %v2346_v36, %v4327_v3 }
 0x810   :  { %v2352_v50 = vadd.f32 %v2283_v43, %v4314_v37  ;;  %v2354_v2 = vadd.f32 %v2336_v12, %v4315_v54  ;;  %v2285_v31 = vadd.f32 %v2284_v5, %v2216_v21  ;;  %v2338_v16 = vadd.f32 %v2337_v34, %v2216_v21  ;;  %v2392_v5 = vpop.permute.xlu1 %2391 }
 0x811   :  { %v2365_v19 = vmul.f32 %v2349_v8, %v4324_v20  ;;  %v2367_v40 = vmul.f32 %v2351_v27, %v4325_v61  ;;  %v2375_v18 = vpack.c.bf16 %v2361_v41, %v2357_v46  ;;  %v2377_v10 = vpack.c.bf16 %v2363_v32, %v2359_v48 }
 0x812   :  { %v2353_v24 = vadd.f32 %v2285_v31, %v4322_v7  ;;  %v2355_v9 = vadd.f32 %v2338_v16, %v4323_v15  ;;  %v2368_v21 = vmul.f32 %v2352_v50, %v4326_v29  ;;  %v2370_v60 = vmul.f32 %v2354_v2, %v4327_v3 }
 0x813   :  { %v2374_v43 = vpack.c.bf16 %v2360_v58, %v2356_v14  ;;  %v2376_v12 = vpack.c.bf16 %v2362_v49, %v2358_v42 }
 0x814   :  { %v2369_v35 = vmul.f32 %v2353_v24, %v4324_v20  ;;  %v2371_v55 = vmul.f32 %v2355_v9, %v4325_v61  ;;  %v2378_v13 = vpack.c.bf16 %v2368_v21, %v2364_v0  ;;  %v2380_v25 = vpack.c.bf16 %v2370_v60, %v2366_v63 }
 0x816   :  { %v2379_v4 = vpack.c.bf16 %v2369_v35, %v2365_v19  ;;  %v2381_v53 = vpack.c.bf16 %v2371_v55, %v2367_v40 }
 0x818   :  { %2414 = vmatprep.subr.bf16.mxu0 %v2379_v4  ;;  %2457 = vmatprep.subr.bf16.mxu1 %v2381_v53 }
 0x819   :  { %2415 = vmatpush1.bf16.msra.mxu0 %v2378_v13  ;;  %2458 = vmatpush1.bf16.msra.mxu1 %v2380_v25 }
 0x81a   :  { %2416 = vmatprep.subr.bf16.mxu0 %v2375_v18  ;;  %2459 = vmatprep.subr.bf16.mxu1 %v2377_v10 }
 0x81d   :  { %2417 = vmatpush1.bf16.msra.mxu0 %v2374_v43  ;;  %2460 = vmatpush1.bf16.msra.mxu1 %v2376_v12 }
 0x820   :  { %2631 = vmatmul.mubr.msk.bf16.vlgmr.msra.gmra.mxu0 %vm266_vm1, %v2675_v1  ;;  %2632 = vmatmul.mubr.msk.bf16.vlgmr.msra.gmra.mxu1 %vm266_vm1, %v2675_v1 }
 0x8e0   :  { %v2436_v17 = vpop.f32.mrf.mxu0  ;;  %v2479_v33 = vpop.f32.mrf.mxu1 }
 0x8e1   :  { %v2437_v11 = vadd.f32 %v2436_v17, %v2387_v39  ;;  %v2480_v8 = vadd.f32 %v2479_v33, %v2387_v39 }
 0x8e2   :  { %v2438_v26 = vpop.f32.mrf.mxu0  ;;  %v2481_v27 = vpop.f32.mrf.mxu1 }
 0x8e3   :  { %2488 = vst [vmem:[%s4126_s11] sm:$0xff] %v2437_v11  ;;  %2490 = vst [vmem:[%s4126_s11 + $0x10] sm:$0xff] %v2480_v8  ;;  %v2439_v34 = vadd.f32 %v2438_v26, %v2387_v39  ;;  %v2482_v37 = vadd.f32 %v2481_v27, %v2387_v39 }
 0x8e4   :  { %v2440_v50 = vpop.f32.mrf.mxu0  ;;  %v2483_v54 = vpop.f32.mrf.mxu1 }
 0x8e5   :  { %2489 = vst [vmem:[%s4126_s11 + $0x8] sm:$0xff] %v2439_v34  ;;  %2491 = vst [vmem:[%s4126_s11 + $0x18] sm:$0xff] %v2482_v37  ;;  %v2441_v2 = vadd.f32 %v2440_v50, %v2392_v5  ;;  %v2484_v31 = vadd.f32 %v2483_v54, %v2392_v5 }
 0x8e6   :  { %v2442_v16 = vpop.f32.mrf.mxu0  ;;  %v2485_v38 = vpop.f32.mrf.mxu1 }
 0x8e7   :  { %2492 = vst [vmem:[%s4126_s11 + $0x20] sm:$0xff] %v2441_v2  ;;  %2494 = vst [vmem:[%s4126_s11 + $0x30] sm:$0xff] %v2484_v31  ;;  %v2443_v62 = vadd.f32 %v2442_v16, %v2392_v5  ;;  %v2486_v51 = vadd.f32 %v2485_v38, %v2392_v5 }
 0x8e9   :  { %2493 = vst [vmem:[%s4126_s11 + $0x28] sm:$0xff] %v2443_v62  ;;  %2495 = vst [vmem:[%s4126_s11 + $0x38] sm:$0xff] %v2486_v51 }

</bundles_post_ra>
